<compile_context>
chip_gen: v7x
topology: tpu7x:2x2x1
jax: 0.10.0
libtpu: 0.0.40
codegen_flags: <defaults>
</compile_context>

<pallas_src>
import functools
import math

import jax
import jax.numpy as jnp
from jax.experimental import pallas as pl
from jax.experimental.pallas import tpu as pltpu

EPS = 1e-12  # LayerNorm eps from the reference implementation


# ----------------------------- shared math helpers -------------------------------
# These operate on plain arrays and are used both inside the Pallas kernel and in
# the pure-JAX reference, so the two paths compute identical math (modulo the
# approximate reciprocal used only in-kernel).

def _bf16(x):
    return x.astype(jnp.bfloat16)


def _dot_nn(a, b):
    """a (M,K) @ b (K,N) -> (M,N); bf16 operands, f32 accumulation."""
    return jax.lax.dot_general(
        _bf16(a), _bf16(b), (((1,), (0,)), ((), ())),
        preferred_element_type=jnp.float32)


def _dot_tb(a, b):
    """a (M,K) · b (N,K)^T -> (M,N) (contract last dims, no explicit transpose)."""
    return jax.lax.dot_general(
        _bf16(a), _bf16(b), (((1,), (1,)), ((), ())),
        preferred_element_type=jnp.float32)


def _layernorm(x, gamma, beta):
    mean = jnp.mean(x, axis=-1, keepdims=True)
    xc = x - mean
    var = jnp.mean(xc * xc, axis=-1, keepdims=True)  # unbiased=False
    return xc * jax.lax.rsqrt(var + EPS) * gamma + beta


def _softmax(s, recip):
    m = jnp.max(s, axis=-1, keepdims=True)
    e = jnp.exp(s - m)
    return e * recip(jnp.sum(e, axis=-1, keepdims=True))


def _mha_heads(q_in, k_in, v_in, bias, wq, bq, wk, bk, wv, bv, wo, bo, recip):
    """Multi-head attention with per-head weight slabs.

    q_in (Sq,D); k_in/v_in (Sk,D); bias additive (Sq,Sk) or (1,Sk).
    wq/wk/wv[h]: (dh, D) (PyTorch (out,in) layout, used with trans-B contraction)
    bq/bk/bv[h]: (1, dh);  wo[h]: (dh, D);  bo: (1, D)
    """
    n_head = len(wq)
    dh = wq[0].shape[0]
    scale = 1.0 / math.sqrt(dh)
    out = None
    for h in range(n_head):                       # static unroll over heads
        q = _dot_tb(q_in, wq[h]) + bq[h]          # (Sq, dh)   K = D (large)
        k = _dot_tb(k_in, wk[h]) + bk[h]          # (Sk, dh)
        v = _dot_tb(v_in, wv[h]) + bv[h]          # (Sk, dh)
        s = _dot_tb(q, k) * scale + bias          # (Sq, Sk)   additive mask bias
        p = _softmax(s, recip)
        ctx = _dot_nn(p, v)                       # (Sq, dh)
        oh = _dot_nn(ctx, wo[h])                  # (Sq, D)    output proj, accumulated
        out = oh if out is None else out + oh     # replaces the old concat
    return out + bo


def _decoder_block(dec_q, dec_kv, enc, trg_bias, src_bias,
                   w_qkv, b_qkv, w_out, vecs, w_ffn1, b_ffn1, w_ffn2,
                   n_head, recip):
    """One decoder layer on a (block_q, D) query slab.

    w_qkv / b_qkv / w_out / vecs are indexable (Pallas refs or jnp arrays):
      w_qkv[(layer*3 + j)*n_head + h]  -> (dh, D)   layer in {0 self, 1 cross}, j in {q,k,v}
      b_qkv[...]                       -> (1, dh)
      w_out[layer*n_head + h]          -> (dh, D)
      vecs[i], i=0..8                  -> (1, D):  bo1,g1,be1, bo2,g2,be2, b2_ffn,g3,be3
    """
    n = n_head

    def W(l, j):
        return [w_qkv[(l * 3 + j) * n + h] for h in range(n)]

    def Bv(l, j):
        return [b_qkv[(l * 3 + j) * n + h] for h in range(n)]

    def WO(l):
        return [w_out[l * n + h] for h in range(n)]

    # --- self attention + dropout(identity) + add & norm1 ---
    a = _mha_heads(dec_q, dec_kv, dec_kv, trg_bias,
                   W(0, 0), Bv(0, 0), W(0, 1), Bv(0, 1), W(0, 2), Bv(0, 2),
                   WO(0), vecs[0], recip)
    x = _layernorm(a + dec_q, vecs[1], vecs[2])

    # --- encoder-decoder attention + dropout(identity) + add & norm2 ---
    a = _mha_heads(x, enc, enc, src_bias,
                   W(1, 0), Bv(1, 0), W(1, 1), Bv(1, 1), W(1, 2), Bv(1, 2),
                   WO(1), vecs[3], recip)
    x = _layernorm(a + x, vecs[4], vecs[5])

    # --- positionwise FFN + dropout(identity) + add & norm3 ---
    h = jnp.maximum(_dot_nn(x, w_ffn1) + b_ffn1, 0.0)
    y = _dot_nn(h, w_ffn2) + vecs[6]
    return _layernorm(y + x, vecs[7], vecs[8])


# ----------------------------- Pallas kernel -------------------------------------

def decoder_layer_kernel(dec_q_ref, dec_kv_ref, enc_ref, src_kpm_ref,
                         w_qkv_ref, b_qkv_ref, w_out_ref, vecs_ref,
                         w_ffn1_ref, b_ffn1_ref, w_ffn2_ref,
                         out_ref, *, n_head, block_q):
    dec_q = dec_q_ref[0]        # (block_q, D)  query tile + residual
    dec_kv = dec_kv_ref[0]      # (S, D)        self-attn keys/values (full seq)
    enc = enc_ref[0]            # (S_enc, D)
    src_keep = src_kpm_ref[0]   # (1, S_enc)    1 = attend, 0 = masked

    S = dec_kv.shape[0]

    # Causal (tril) target-mask bias for this query tile, built in-kernel
    # (no O(B*S^2) mask DMA).  score + (-10000) at masked positions is
    # numerically equivalent to torch masked_fill(mask==0, -10000).
    q0 = pl.program_id(1) * block_q
    rows = jax.lax.broadcasted_iota(jnp.int32, (block_q, S), 0) + q0
    cols = jax.lax.broadcasted_iota(jnp.int32, (block_q, S), 1)
    trg_bias = jnp.where(cols > rows, -10000.0, 0.0).astype(jnp.float32)

    # Key-padding src mask -> additive bias, broadcast over query rows.
    src_bias = (src_keep - 1.0) * 10000.0            # (1, S_enc)

    recip = lambda x: pl.reciprocal(x, approx=True)  # EUP, frees VALU

    out_ref[0] = _decoder_block(
        dec_q, dec_kv, enc, trg_bias, src_bias,
        w_qkv_ref, b_qkv_ref, w_out_ref, vecs_ref,
        w_ffn1_ref[...], b_ffn1_ref[...], w_ffn2_ref[...],
        n_head, recip)


# ----------------------------- wrapper --------------------------------------------

def _pick_block_q(S):
    for t in (256, 128, 64, 32, 16, 8):
        if S % t == 0:
            return t
    return S


def decoder_layer(dec, enc, src_kpm, packed, n_head, block_q=None):
    """dec (B,S,D) f32, enc (B,S_enc,D) f32, src_kpm (B,1,S_enc) f32 {0,1}."""
    B, S, D = dec.shape
    S_enc = enc.shape[1]
    (w_qkv, b_qkv, w_out, vecs, w_ffn1, b_ffn1, w_ffn2) = packed

    if block_q is None:
        block_q = _pick_block_q(S)
    assert S % block_q == 0, "block_q must divide the decoder sequence length"
    n_q = S // block_q

    def const_spec(arr):
        nd = arr.ndim
        return pl.BlockSpec(arr.shape, lambda b, i, _nd=nd: (0,) * _nd)

    in_specs = [
        pl.BlockSpec((1, block_q, D), lambda b, i: (b, i, 0)),   # dec query tile
        pl.BlockSpec((1, S, D), lambda b, i: (b, 0, 0)),         # dec full (K/V)
        pl.BlockSpec((1, S_enc, D), lambda b, i: (b, 0, 0)),     # enc full (K/V)
        pl.BlockSpec((1, 1, S_enc), lambda b, i: (b, 0, 0)),     # src key-padding mask
    ] + [const_spec(a) for a in (w_qkv, b_qkv, w_out, vecs, w_ffn1, b_ffn1, w_ffn2)]

    grid_spec = pltpu.PrefetchScalarGridSpec(
        num_scalar_prefetch=0,
        grid=(B, n_q),
        in_specs=in_specs,
        out_specs=pl.BlockSpec((1, block_q, D), lambda b, i: (b, i, 0)),
    )

    kernel = functools.partial(decoder_layer_kernel, n_head=n_head, block_q=block_q)
    return pl.pallas_call(
        kernel,
        out_shape=jax.ShapeDtypeStruct((B, S, D), jnp.float32),
        grid_spec=grid_spec,
        compiler_params=pltpu.CompilerParams(
            dimension_semantics=("parallel", "parallel"),
            vmem_limit_bytes=32 * 1024 * 1024),
    )(dec, dec, enc, src_kpm, w_qkv, b_qkv, w_out, vecs, w_ffn1, b_ffn1, w_ffn2)


# ----------------------------- parameter packing ----------------------------------

def pack_params(p, n_head):
    """Pack the 26 'natural' DecoderLayer params into 7 lane-dense arrays.

    Natural convention: q = x @ Wq + bq with Wq (D,D); LayerNorm gamma/beta (1,D).
    """
    (wq1, bq1, wk1, bk1, wv1, bv1, wo1, bo1, g1, be1,
     wq2, bq2, wk2, bk2, wv2, bv2, wo2, bo2, g2, be2,
     w1, b1, w2, b2, g3, be3) = p
    D = wq1.shape[0]
    assert D % n_head == 0
    dh = D // n_head

    def split_qkv(w):   # column chunks -> per-head (dh, D) for trans-B contraction
        return [w[:, h * dh:(h + 1) * dh].T for h in range(n_head)]

    def split_b(bvec):  # (1, D) -> per-head (1, dh)
        return [bvec[:, h * dh:(h + 1) * dh] for h in range(n_head)]

    def split_o(w):     # row chunks -> per-head (dh, D)
        return [w[h * dh:(h + 1) * dh, :] for h in range(n_head)]

    w_qkv = jnp.stack(split_qkv(wq1) + split_qkv(wk1) + split_qkv(wv1) +
                      split_qkv(wq2) + split_qkv(wk2) + split_qkv(wv2)
                      ).astype(jnp.bfloat16)                       # (6*n_head, dh, D)
    b_qkv = jnp.stack(split_b(bq1) + split_b(bk1) + split_b(bv1) +
                      split_b(bq2) + split_b(bk2) + split_b(bv2))  # (6*n_head, 1, dh) f32
    w_out = jnp.stack(split_o(wo1) + split_o(wo2)).astype(jnp.bfloat16)  # (2*n_head, dh, D)
    vecs = jnp.stack([bo1, g1, be1, bo2, g2, be2, b2, g3, be3])    # (9, 1, D) f32
    return (w_qkv, b_qkv, w_out, vecs,
            w1.astype(jnp.bfloat16), b1, w2.astype(jnp.bfloat16))


# ----------------------------- pure-JAX reference ----------------------------------

def decoder_layer_ref(dec, enc, src_kpm, packed, n_head):
    (w_qkv, b_qkv, w_out, vecs, w_ffn1, b_ffn1, w_ffn2) = packed
    B, S, _ = dec.shape
    recip = lambda x: 1.0 / x

    rows = jax.lax.broadcasted_iota(jnp.int32, (S, S), 0)
    cols = jax.lax.broadcasted_iota(jnp.int32, (S, S), 1)
    trg_bias = jnp.where(cols > rows, -10000.0, 0.0).astype(jnp.float32)

    outs = []
    for b in range(B):
        src_bias = (src_kpm[b] - 1.0) * 10000.0      # (1, S_enc)
        outs.append(_decoder_block(
            dec[b], dec[b], enc[b], trg_bias, src_bias,
            w_qkv, b_qkv, w_out, vecs, w_ffn1, b_ffn1, w_ffn2,
            n_head, recip))
    return jnp.stack(outs)


# ----------------------------- main -------------------------------------------------

if __name__ == "__main__":
    B, S, S_enc = 2, 16, 8
    d_model, ffn_hidden, n_head = 32, 64, 4

    key = jax.random.PRNGKey(0)
    keys = jax.random.split(key, 32)
    ki = iter(keys)

    def rand(shape, scale=0.05):
        return jax.random.normal(next(ki), shape, jnp.float32) * scale

    # inputs
    dec = rand((B, S, d_model), scale=1.0)
    enc = rand((B, S_enc, d_model), scale=1.0)
    # src key-padding mask: 1 = attend, 0 = masked (mask last 2 enc positions of batch 1)
    src_kpm = jnp.ones((B, 1, S_enc), jnp.float32)
    src_kpm = src_kpm.at[1, 0, S_enc - 2:].set(0.0)
    # trg mask is the standard causal (tril) mask, generated inside the kernel.

    # parameters in their natural (unpacked) shapes, then packed for the kernel
    def mha_params():
        return [rand((d_model, d_model)), rand((1, d_model)),   # Wq, bq
                rand((d_model, d_model)), rand((1, d_model)),   # Wk, bk
                rand((d_model, d_model)), rand((1, d_model)),   # Wv, bv
                rand((d_model, d_model)), rand((1, d_model))]   # Wo, bo

    def ln_params():
        return [jnp.ones((1, d_model), jnp.float32),
                jnp.zeros((1, d_model), jnp.float32)]

    raw = (mha_params() + ln_params() +               # self-attn + norm1
           mha_params() + ln_params() +               # cross-attn + norm2
           [rand((d_model, ffn_hidden)), rand((1, ffn_hidden)),
            rand((ffn_hidden, d_model)), rand((1, d_model))] +
           ln_params())                               # ffn + norm3
    packed = pack_params(tuple(raw), n_head)

    # block_q=8 exercises the q-tiling path (grid = (B, S//block_q) = (2, 2));
    # use 128/256 in production.
    out = decoder_layer(dec, enc, src_kpm, packed, n_head, block_q=8)
    out = jax.block_until_ready(out)

    ref = decoder_layer_ref(dec, enc, src_kpm, packed, n_head)
    ref = jax.block_until_ready(ref)

    assert out.shape == (B, S, d_model)
    max_diff = float(jnp.max(jnp.abs(out - ref)))
    assert jnp.allclose(out, ref, atol=1e-2, rtol=1e-2), (
        f"mismatch vs reference, max abs diff = {max_diff}")

    print("KERNEL_OK")
</pallas_src>

<mosaic_0001>
module attributes {stable_mosaic.version = 11 : i64} {
  func.func @decoder_layer_kernel(%arg0: i32, %arg1: i32, %arg2: memref<1x8x32xf32, #tpu.memory_space<vmem>>, %arg3: memref<1x16x32xf32, #tpu.memory_space<vmem>>, %arg4: memref<1x8x32xf32, #tpu.memory_space<vmem>>, %arg5: memref<1x1x8xf32, #tpu.memory_space<vmem>>, %arg6: memref<24x8x32xbf16, #tpu.memory_space<vmem>>, %arg7: memref<24x1x8xf32, #tpu.memory_space<vmem>>, %arg8: memref<8x8x32xbf16, #tpu.memory_space<vmem>>, %arg9: memref<9x1x32xf32, #tpu.memory_space<vmem>>, %arg10: memref<32x64xbf16, #tpu.memory_space<vmem>>, %arg11: memref<1x64xf32, #tpu.memory_space<vmem>>, %arg12: memref<64x32xbf16, #tpu.memory_space<vmem>>, %arg13: memref<1x8x32xf32, #tpu.memory_space<vmem>>) attributes {dimension_semantics = [#tpu.dimension_semantics<parallel>, #tpu.dimension_semantics<parallel>], iteration_bounds = array<i64: 2, 2>, scalar_prefetch = 0 : i64, scratch_operands = 0 : i64, tpu.core_type = #tpu.core_type<tc>, window_params = [{transform_indices = @transform_0, window_bounds = array<i64: 1, 8, 32>}, {transform_indices = @transform_1, window_bounds = array<i64: 1, 16, 32>}, {transform_indices = @transform_2, window_bounds = array<i64: 1, 8, 32>}, {transform_indices = @transform_3, window_bounds = array<i64: 1, 1, 8>}, {pipeline_mode = #tpu.pipeline_mode<synchronous>, transform_indices = @transform_4, window_bounds = array<i64: 24, 8, 32>}, {pipeline_mode = #tpu.pipeline_mode<synchronous>, transform_indices = @transform_5, window_bounds = array<i64: 24, 1, 8>}, {pipeline_mode = #tpu.pipeline_mode<synchronous>, transform_indices = @transform_6, window_bounds = array<i64: 8, 8, 32>}, {pipeline_mode = #tpu.pipeline_mode<synchronous>, transform_indices = @transform_7, window_bounds = array<i64: 9, 1, 32>}, {pipeline_mode = #tpu.pipeline_mode<synchronous>, transform_indices = @transform_8, window_bounds = array<i64: 32, 64>}, {pipeline_mode = #tpu.pipeline_mode<synchronous>, transform_indices = @transform_9, window_bounds = array<i64: 1, 64>}, {pipeline_mode = #tpu.pipeline_mode<synchronous>, transform_indices = @transform_10, window_bounds = array<i64: 64, 32>}, {transform_indices = @transform_11, window_bounds = array<i64: 1, 8, 32>}]} {
    %c0 = arith.constant 0 : index
    %c0_0 = arith.constant 0 : index
    %c0_1 = arith.constant 0 : index
    %0 = vector.load %arg2[%c0, %c0_0, %c0_1] : memref<1x8x32xf32, #tpu.memory_space<vmem>>, vector<1x8x32xf32>
    %1 = vector.shape_cast %0 : vector<1x8x32xf32> to vector<8x32xf32>
    %c0_2 = arith.constant 0 : index
    %c0_3 = arith.constant 0 : index
    %c0_4 = arith.constant 0 : index
    %2 = vector.load %arg3[%c0_2, %c0_3, %c0_4] : memref<1x16x32xf32, #tpu.memory_space<vmem>>, vector<1x16x32xf32>
    %3 = vector.shape_cast %2 : vector<1x16x32xf32> to vector<16x32xf32>
    %c0_5 = arith.constant 0 : index
    %c0_6 = arith.constant 0 : index
    %c0_7 = arith.constant 0 : index
    %4 = vector.load %arg4[%c0_5, %c0_6, %c0_7] : memref<1x8x32xf32, #tpu.memory_space<vmem>>, vector<1x8x32xf32>
    %5 = vector.shape_cast %4 : vector<1x8x32xf32> to vector<8x32xf32>
    %c0_8 = arith.constant 0 : index
    %c0_9 = arith.constant 0 : index
    %c0_10 = arith.constant 0 : index
    %6 = vector.load %arg5[%c0_8, %c0_9, %c0_10] : memref<1x1x8xf32, #tpu.memory_space<vmem>>, vector<1x1x8xf32>
    %7 = vector.shape_cast %6 : vector<1x1x8xf32> to vector<1x8xf32>
    %c8_i32 = arith.constant 8 : i32
    %8 = arith.muli %arg1, %c8_i32 : i32
    %9 = tpu.iota {dimensions = array<i32: 0>} : vector<8x16xi32>
    %10 = vector.broadcast %8 : i32 to vector<8x16xi32>
    %11 = arith.addi %9, %10 : vector<8x16xi32>
    %12 = tpu.iota {dimensions = array<i32: 1>} : vector<8x16xi32>
    %13 = arith.cmpi sgt, %12, %11 : vector<8x16xi32>
    %cst = arith.constant -1.000000e+04 : f32
    %cst_11 = arith.constant 0.000000e+00 : f32
    %14 = vector.broadcast %cst : f32 to vector<8x16xf32>
    %15 = vector.broadcast %cst_11 : f32 to vector<8x16xf32>
    %16 = arith.select %13, %14, %15 : vector<8x16xi1>, vector<8x16xf32>
    %cst_12 = arith.constant 1.000000e+00 : f32
    %17 = vector.broadcast %cst_12 : f32 to vector<1x8xf32>
    %18 = arith.subf %7, %17 : vector<1x8xf32>
    %cst_13 = arith.constant 1.000000e+04 : f32
    %19 = vector.broadcast %cst_13 : f32 to vector<1x8xf32>
    %20 = arith.mulf %18, %19 : vector<1x8xf32>
    %c0_14 = arith.constant 0 : index
    %c0_15 = arith.constant 0 : index
    %21 = vector.load %arg10[%c0_14, %c0_15] : memref<32x64xbf16, #tpu.memory_space<vmem>>, vector<32x64xbf16>
    %c0_16 = arith.constant 0 : index
    %c0_17 = arith.constant 0 : index
    %22 = vector.load %arg11[%c0_16, %c0_17] : memref<1x64xf32, #tpu.memory_space<vmem>>, vector<1x64xf32>
    %c0_18 = arith.constant 0 : index
    %c0_19 = arith.constant 0 : index
    %23 = vector.load %arg12[%c0_18, %c0_19] : memref<64x32xbf16, #tpu.memory_space<vmem>>, vector<64x32xbf16>
    %c0_20 = arith.constant 0 : index
    %c0_21 = arith.constant 0 : index
    %c0_22 = arith.constant 0 : index
    %24 = vector.load %arg6[%c0_20, %c0_21, %c0_22] : memref<24x8x32xbf16, #tpu.memory_space<vmem>>, vector<1x8x32xbf16>
    %25 = vector.shape_cast %24 : vector<1x8x32xbf16> to vector<8x32xbf16>
    %c1 = arith.constant 1 : index
    %c0_23 = arith.constant 0 : index
    %c0_24 = arith.constant 0 : index
    %26 = vector.load %arg6[%c1, %c0_23, %c0_24] : memref<24x8x32xbf16, #tpu.memory_space<vmem>>, vector<1x8x32xbf16>
    %27 = vector.shape_cast %26 : vector<1x8x32xbf16> to vector<8x32xbf16>
    %c2 = arith.constant 2 : index
    %c0_25 = arith.constant 0 : index
    %c0_26 = arith.constant 0 : index
    %28 = vector.load %arg6[%c2, %c0_25, %c0_26] : memref<24x8x32xbf16, #tpu.memory_space<vmem>>, vector<1x8x32xbf16>
    %29 = vector.shape_cast %28 : vector<1x8x32xbf16> to vector<8x32xbf16>
    %c3 = arith.constant 3 : index
    %c0_27 = arith.constant 0 : index
    %c0_28 = arith.constant 0 : index
    %30 = vector.load %arg6[%c3, %c0_27, %c0_28] : memref<24x8x32xbf16, #tpu.memory_space<vmem>>, vector<1x8x32xbf16>
    %31 = vector.shape_cast %30 : vector<1x8x32xbf16> to vector<8x32xbf16>
    %c0_29 = arith.constant 0 : index
    %c0_30 = arith.constant 0 : index
    %c0_31 = arith.constant 0 : index
    %32 = vector.load %arg7[%c0_29, %c0_30, %c0_31] : memref<24x1x8xf32, #tpu.memory_space<vmem>>, vector<1x1x8xf32>
    %33 = vector.shape_cast %32 : vector<1x1x8xf32> to vector<1x8xf32>
    %c1_32 = arith.constant 1 : index
    %c0_33 = arith.constant 0 : index
    %c0_34 = arith.constant 0 : index
    %34 = vector.load %arg7[%c1_32, %c0_33, %c0_34] : memref<24x1x8xf32, #tpu.memory_space<vmem>>, vector<1x1x8xf32>
    %35 = vector.shape_cast %34 : vector<1x1x8xf32> to vector<1x8xf32>
    %c2_35 = arith.constant 2 : index
    %c0_36 = arith.constant 0 : index
    %c0_37 = arith.constant 0 : index
    %36 = vector.load %arg7[%c2_35, %c0_36, %c0_37] : memref<24x1x8xf32, #tpu.memory_space<vmem>>, vector<1x1x8xf32>
    %37 = vector.shape_cast %36 : vector<1x1x8xf32> to vector<1x8xf32>
    %c3_38 = arith.constant 3 : index
    %c0_39 = arith.constant 0 : index
    %c0_40 = arith.constant 0 : index
    %38 = vector.load %arg7[%c3_38, %c0_39, %c0_40] : memref<24x1x8xf32, #tpu.memory_space<vmem>>, vector<1x1x8xf32>
    %39 = vector.shape_cast %38 : vector<1x1x8xf32> to vector<1x8xf32>
    %c4 = arith.constant 4 : index
    %c0_41 = arith.constant 0 : index
    %c0_42 = arith.constant 0 : index
    %40 = vector.load %arg6[%c4, %c0_41, %c0_42] : memref<24x8x32xbf16, #tpu.memory_space<vmem>>, vector<1x8x32xbf16>
    %41 = vector.shape_cast %40 : vector<1x8x32xbf16> to vector<8x32xbf16>
    %c5 = arith.constant 5 : index
    %c0_43 = arith.constant 0 : index
    %c0_44 = arith.constant 0 : index
    %42 = vector.load %arg6[%c5, %c0_43, %c0_44] : memref<24x8x32xbf16, #tpu.memory_space<vmem>>, vector<1x8x32xbf16>
    %43 = vector.shape_cast %42 : vector<1x8x32xbf16> to vector<8x32xbf16>
    %c6 = arith.constant 6 : index
    %c0_45 = arith.constant 0 : index
    %c0_46 = arith.constant 0 : index
    %44 = vector.load %arg6[%c6, %c0_45, %c0_46] : memref<24x8x32xbf16, #tpu.memory_space<vmem>>, vector<1x8x32xbf16>
    %45 = vector.shape_cast %44 : vector<1x8x32xbf16> to vector<8x32xbf16>
    %c7 = arith.constant 7 : index
    %c0_47 = arith.constant 0 : index
    %c0_48 = arith.constant 0 : index
    %46 = vector.load %arg6[%c7, %c0_47, %c0_48] : memref<24x8x32xbf16, #tpu.memory_space<vmem>>, vector<1x8x32xbf16>
    %47 = vector.shape_cast %46 : vector<1x8x32xbf16> to vector<8x32xbf16>
    %c4_49 = arith.constant 4 : index
    %c0_50 = arith.constant 0 : index
    %c0_51 = arith.constant 0 : index
    %48 = vector.load %arg7[%c4_49, %c0_50, %c0_51] : memref<24x1x8xf32, #tpu.memory_space<vmem>>, vector<1x1x8xf32>
    %49 = vector.shape_cast %48 : vector<1x1x8xf32> to vector<1x8xf32>
    %c5_52 = arith.constant 5 : index
    %c0_53 = arith.constant 0 : index
    %c0_54 = arith.constant 0 : index
    %50 = vector.load %arg7[%c5_52, %c0_53, %c0_54] : memref<24x1x8xf32, #tpu.memory_space<vmem>>, vector<1x1x8xf32>
    %51 = vector.shape_cast %50 : vector<1x1x8xf32> to vector<1x8xf32>
    %c6_55 = arith.constant 6 : index
    %c0_56 = arith.constant 0 : index
    %c0_57 = arith.constant 0 : index
    %52 = vector.load %arg7[%c6_55, %c0_56, %c0_57] : memref<24x1x8xf32, #tpu.memory_space<vmem>>, vector<1x1x8xf32>
    %53 = vector.shape_cast %52 : vector<1x1x8xf32> to vector<1x8xf32>
    %c7_58 = arith.constant 7 : index
    %c0_59 = arith.constant 0 : index
    %c0_60 = arith.constant 0 : index
    %54 = vector.load %arg7[%c7_58, %c0_59, %c0_60] : memref<24x1x8xf32, #tpu.memory_space<vmem>>, vector<1x1x8xf32>
    %55 = vector.shape_cast %54 : vector<1x1x8xf32> to vector<1x8xf32>
    %c8 = arith.constant 8 : index
    %c0_61 = arith.constant 0 : index
    %c0_62 = arith.constant 0 : index
    %56 = vector.load %arg6[%c8, %c0_61, %c0_62] : memref<24x8x32xbf16, #tpu.memory_space<vmem>>, vector<1x8x32xbf16>
    %57 = vector.shape_cast %56 : vector<1x8x32xbf16> to vector<8x32xbf16>
    %c9 = arith.constant 9 : index
    %c0_63 = arith.constant 0 : index
    %c0_64 = arith.constant 0 : index
    %58 = vector.load %arg6[%c9, %c0_63, %c0_64] : memref<24x8x32xbf16, #tpu.memory_space<vmem>>, vector<1x8x32xbf16>
    %59 = vector.shape_cast %58 : vector<1x8x32xbf16> to vector<8x32xbf16>
    %c10 = arith.constant 10 : index
    %c0_65 = arith.constant 0 : index
    %c0_66 = arith.constant 0 : index
    %60 = vector.load %arg6[%c10, %c0_65, %c0_66] : memref<24x8x32xbf16, #tpu.memory_space<vmem>>, vector<1x8x32xbf16>
    %61 = vector.shape_cast %60 : vector<1x8x32xbf16> to vector<8x32xbf16>
    %c11 = arith.constant 11 : index
    %c0_67 = arith.constant 0 : index
    %c0_68 = arith.constant 0 : index
    %62 = vector.load %arg6[%c11, %c0_67, %c0_68] : memref<24x8x32xbf16, #tpu.memory_space<vmem>>, vector<1x8x32xbf16>
    %63 = vector.shape_cast %62 : vector<1x8x32xbf16> to vector<8x32xbf16>
    %c8_69 = arith.constant 8 : index
    %c0_70 = arith.constant 0 : index
    %c0_71 = arith.constant 0 : index
    %64 = vector.load %arg7[%c8_69, %c0_70, %c0_71] : memref<24x1x8xf32, #tpu.memory_space<vmem>>, vector<1x1x8xf32>
    %65 = vector.shape_cast %64 : vector<1x1x8xf32> to vector<1x8xf32>
    %c9_72 = arith.constant 9 : index
    %c0_73 = arith.constant 0 : index
    %c0_74 = arith.constant 0 : index
    %66 = vector.load %arg7[%c9_72, %c0_73, %c0_74] : memref<24x1x8xf32, #tpu.memory_space<vmem>>, vector<1x1x8xf32>
    %67 = vector.shape_cast %66 : vector<1x1x8xf32> to vector<1x8xf32>
    %c10_75 = arith.constant 10 : index
    %c0_76 = arith.constant 0 : index
    %c0_77 = arith.constant 0 : index
    %68 = vector.load %arg7[%c10_75, %c0_76, %c0_77] : memref<24x1x8xf32, #tpu.memory_space<vmem>>, vector<1x1x8xf32>
    %69 = vector.shape_cast %68 : vector<1x1x8xf32> to vector<1x8xf32>
    %c11_78 = arith.constant 11 : index
    %c0_79 = arith.constant 0 : index
    %c0_80 = arith.constant 0 : index
    %70 = vector.load %arg7[%c11_78, %c0_79, %c0_80] : memref<24x1x8xf32, #tpu.memory_space<vmem>>, vector<1x1x8xf32>
    %71 = vector.shape_cast %70 : vector<1x1x8xf32> to vector<1x8xf32>
    %c0_81 = arith.constant 0 : index
    %c0_82 = arith.constant 0 : index
    %c0_83 = arith.constant 0 : index
    %72 = vector.load %arg8[%c0_81, %c0_82, %c0_83] : memref<8x8x32xbf16, #tpu.memory_space<vmem>>, vector<1x8x32xbf16>
    %73 = vector.shape_cast %72 : vector<1x8x32xbf16> to vector<8x32xbf16>
    %c1_84 = arith.constant 1 : index
    %c0_85 = arith.constant 0 : index
    %c0_86 = arith.constant 0 : index
    %74 = vector.load %arg8[%c1_84, %c0_85, %c0_86] : memref<8x8x32xbf16, #tpu.memory_space<vmem>>, vector<1x8x32xbf16>
    %75 = vector.shape_cast %74 : vector<1x8x32xbf16> to vector<8x32xbf16>
    %c2_87 = arith.constant 2 : index
    %c0_88 = arith.constant 0 : index
    %c0_89 = arith.constant 0 : index
    %76 = vector.load %arg8[%c2_87, %c0_88, %c0_89] : memref<8x8x32xbf16, #tpu.memory_space<vmem>>, vector<1x8x32xbf16>
    %77 = vector.shape_cast %76 : vector<1x8x32xbf16> to vector<8x32xbf16>
    %c3_90 = arith.constant 3 : index
    %c0_91 = arith.constant 0 : index
    %c0_92 = arith.constant 0 : index
    %78 = vector.load %arg8[%c3_90, %c0_91, %c0_92] : memref<8x8x32xbf16, #tpu.memory_space<vmem>>, vector<1x8x32xbf16>
    %79 = vector.shape_cast %78 : vector<1x8x32xbf16> to vector<8x32xbf16>
    %c0_93 = arith.constant 0 : index
    %c0_94 = arith.constant 0 : index
    %c0_95 = arith.constant 0 : index
    %80 = vector.load %arg9[%c0_93, %c0_94, %c0_95] : memref<9x1x32xf32, #tpu.memory_space<vmem>>, vector<1x1x32xf32>
    %81 = vector.shape_cast %80 : vector<1x1x32xf32> to vector<1x32xf32>
    %82 = arith.truncf %1 : vector<8x32xf32> to vector<8x32xbf16>
    %cst_96 = arith.constant dense<0.000000e+00> : vector<8x8xf32>
    %83 = tpu.matmul %82, %25, %cst_96 {dimension_numbers = #tpu.dot_dimension_numbers<[1], [1], [0], [0], [0, 0, 1, 0], [], []>} : vector<8x32xbf16>, vector<8x32xbf16>, vector<8x8xf32> -> vector<8x8xf32>
    %84 = vector.broadcast %33 : vector<1x8xf32> to vector<8x8xf32>
    %85 = arith.addf %83, %84 : vector<8x8xf32>
    %86 = arith.truncf %3 : vector<16x32xf32> to vector<16x32xbf16>
    %cst_97 = arith.constant dense<0.000000e+00> : vector<16x8xf32>
    %87 = tpu.matmul %86, %41, %cst_97 {dimension_numbers = #tpu.dot_dimension_numbers<[1], [1], [0], [0], [0, 0, 1, 0], [], []>} : vector<16x32xbf16>, vector<8x32xbf16>, vector<16x8xf32> -> vector<16x8xf32>
    %88 = vector.broadcast %49 : vector<1x8xf32> to vector<16x8xf32>
    %89 = arith.addf %87, %88 : vector<16x8xf32>
    %90 = arith.truncf %3 : vector<16x32xf32> to vector<16x32xbf16>
    %cst_98 = arith.constant dense<0.000000e+00> : vector<16x8xf32>
    %91 = tpu.matmul %90, %57, %cst_98 {dimension_numbers = #tpu.dot_dimension_numbers<[1], [1], [0], [0], [0, 0, 1, 0], [], []>} : vector<16x32xbf16>, vector<8x32xbf16>, vector<16x8xf32> -> vector<16x8xf32>
    %92 = vector.broadcast %65 : vector<1x8xf32> to vector<16x8xf32>
    %93 = arith.addf %91, %92 : vector<16x8xf32>
    %94 = arith.truncf %85 : vector<8x8xf32> to vector<8x8xbf16>
    %95 = arith.truncf %89 : vector<16x8xf32> to vector<16x8xbf16>
    %cst_99 = arith.constant dense<0.000000e+00> : vector<8x16xf32>
    %96 = tpu.matmul %94, %95, %cst_99 {dimension_numbers = #tpu.dot_dimension_numbers<[1], [1], [0], [0], [0, 0, 1, 0], [], []>} : vector<8x8xbf16>, vector<16x8xbf16>, vector<8x16xf32> -> vector<8x16xf32>
    %cst_100 = arith.constant 0.353553385 : f32
    %97 = vector.broadcast %cst_100 : f32 to vector<8x16xf32>
    %98 = arith.mulf %96, %97 : vector<8x16xf32>
    %99 = arith.addf %98, %16 : vector<8x16xf32>
    %cst_101 = arith.constant dense<0xFF800000> : vector<8xf32>
    %100 = vector.multi_reduction <maximumf>, %99, %cst_101 [1] : vector<8x16xf32> to vector<8xf32>
    %101 = vector.shape_cast %100 : vector<8xf32> to vector<8x1xf32>
    %102 = vector.broadcast %101 : vector<8x1xf32> to vector<8x16xf32>
    %103 = arith.subf %99, %102 : vector<8x16xf32>
    %104 = math.exp %103 : vector<8x16xf32>
    %cst_102 = arith.constant dense<0.000000e+00> : vector<8xf32>
    %105 = vector.multi_reduction <add>, %104, %cst_102 [1] : vector<8x16xf32> to vector<8xf32>
    %106 = vector.shape_cast %105 : vector<8xf32> to vector<8x1xf32>
    %107 = tpu.reciprocal %106 {approx = true} : vector<8x1xf32> -> vector<8x1xf32>
    %108 = vector.broadcast %107 : vector<8x1xf32> to vector<8x16xf32>
    %109 = arith.mulf %104, %108 : vector<8x16xf32>
    %110 = arith.truncf %109 : vector<8x16xf32> to vector<8x16xbf16>
    %111 = arith.truncf %93 : vector<16x8xf32> to vector<16x8xbf16>
    %cst_103 = arith.constant dense<0.000000e+00> : vector<8x8xf32>
    %112 = tpu.matmul %110, %111, %cst_103 {dimension_numbers = #tpu.dot_dimension_numbers<[1], [0], [0], [1], [0, 0, 1, 1], [], []>} : vector<8x16xbf16>, vector<16x8xbf16>, vector<8x8xf32> -> vector<8x8xf32>
    %113 = arith.truncf %112 : vector<8x8xf32> to vector<8x8xbf16>
    %cst_104 = arith.constant dense<0.000000e+00> : vector<8x32xf32>
    %114 = tpu.matmul %113, %73, %cst_104 {dimension_numbers = #tpu.dot_dimension_numbers<[1], [0], [0], [1], [0, 0, 1, 1], [], []>} : vector<8x8xbf16>, vector<8x32xbf16>, vector<8x32xf32> -> vector<8x32xf32>
    %115 = arith.truncf %1 : vector<8x32xf32> to vector<8x32xbf16>
    %cst_105 = arith.constant dense<0.000000e+00> : vector<8x8xf32>
    %116 = tpu.matmul %115, %27, %cst_105 {dimension_numbers = #tpu.dot_dimension_numbers<[1], [1], [0], [0], [0, 0, 1, 0], [], []>} : vector<8x32xbf16>, vector<8x32xbf16>, vector<8x8xf32> -> vector<8x8xf32>
    %117 = vector.broadcast %35 : vector<1x8xf32> to vector<8x8xf32>
    %118 = arith.addf %116, %117 : vector<8x8xf32>
    %119 = arith.truncf %3 : vector<16x32xf32> to vector<16x32xbf16>
    %cst_106 = arith.constant dense<0.000000e+00> : vector<16x8xf32>
    %120 = tpu.matmul %119, %43, %cst_106 {dimension_numbers = #tpu.dot_dimension_numbers<[1], [1], [0], [0], [0, 0, 1, 0], [], []>} : vector<16x32xbf16>, vector<8x32xbf16>, vector<16x8xf32> -> vector<16x8xf32>
    %121 = vector.broadcast %51 : vector<1x8xf32> to vector<16x8xf32>
    %122 = arith.addf %120, %121 : vector<16x8xf32>
    %123 = arith.truncf %3 : vector<16x32xf32> to vector<16x32xbf16>
    %cst_107 = arith.constant dense<0.000000e+00> : vector<16x8xf32>
    %124 = tpu.matmul %123, %59, %cst_107 {dimension_numbers = #tpu.dot_dimension_numbers<[1], [1], [0], [0], [0, 0, 1, 0], [], []>} : vector<16x32xbf16>, vector<8x32xbf16>, vector<16x8xf32> -> vector<16x8xf32>
    %125 = vector.broadcast %67 : vector<1x8xf32> to vector<16x8xf32>
    %126 = arith.addf %124, %125 : vector<16x8xf32>
    %127 = arith.truncf %118 : vector<8x8xf32> to vector<8x8xbf16>
    %128 = arith.truncf %122 : vector<16x8xf32> to vector<16x8xbf16>
    %cst_108 = arith.constant dense<0.000000e+00> : vector<8x16xf32>
    %129 = tpu.matmul %127, %128, %cst_108 {dimension_numbers = #tpu.dot_dimension_numbers<[1], [1], [0], [0], [0, 0, 1, 0], [], []>} : vector<8x8xbf16>, vector<16x8xbf16>, vector<8x16xf32> -> vector<8x16xf32>
    %cst_109 = arith.constant 0.353553385 : f32
    %130 = vector.broadcast %cst_109 : f32 to vector<8x16xf32>
    %131 = arith.mulf %129, %130 : vector<8x16xf32>
    %132 = arith.addf %131, %16 : vector<8x16xf32>
    %cst_110 = arith.constant dense<0xFF800000> : vector<8xf32>
    %133 = vector.multi_reduction <maximumf>, %132, %cst_110 [1] : vector<8x16xf32> to vector<8xf32>
    %134 = vector.shape_cast %133 : vector<8xf32> to vector<8x1xf32>
    %135 = vector.broadcast %134 : vector<8x1xf32> to vector<8x16xf32>
    %136 = arith.subf %132, %135 : vector<8x16xf32>
    %137 = math.exp %136 : vector<8x16xf32>
    %cst_111 = arith.constant dense<0.000000e+00> : vector<8xf32>
    %138 = vector.multi_reduction <add>, %137, %cst_111 [1] : vector<8x16xf32> to vector<8xf32>
    %139 = vector.shape_cast %138 : vector<8xf32> to vector<8x1xf32>
    %140 = tpu.reciprocal %139 {approx = true} : vector<8x1xf32> -> vector<8x1xf32>
    %141 = vector.broadcast %140 : vector<8x1xf32> to vector<8x16xf32>
    %142 = arith.mulf %137, %141 : vector<8x16xf32>
    %143 = arith.truncf %142 : vector<8x16xf32> to vector<8x16xbf16>
    %144 = arith.truncf %126 : vector<16x8xf32> to vector<16x8xbf16>
    %cst_112 = arith.constant dense<0.000000e+00> : vector<8x8xf32>
    %145 = tpu.matmul %143, %144, %cst_112 {dimension_numbers = #tpu.dot_dimension_numbers<[1], [0], [0], [1], [0, 0, 1, 1], [], []>} : vector<8x16xbf16>, vector<16x8xbf16>, vector<8x8xf32> -> vector<8x8xf32>
    %146 = arith.truncf %145 : vector<8x8xf32> to vector<8x8xbf16>
    %cst_113 = arith.constant dense<0.000000e+00> : vector<8x32xf32>
    %147 = tpu.matmul %146, %75, %cst_113 {dimension_numbers = #tpu.dot_dimension_numbers<[1], [0], [0], [1], [0, 0, 1, 1], [], []>} : vector<8x8xbf16>, vector<8x32xbf16>, vector<8x32xf32> -> vector<8x32xf32>
    %148 = arith.addf %114, %147 : vector<8x32xf32>
    %149 = arith.truncf %1 : vector<8x32xf32> to vector<8x32xbf16>
    %cst_114 = arith.constant dense<0.000000e+00> : vector<8x8xf32>
    %150 = tpu.matmul %149, %29, %cst_114 {dimension_numbers = #tpu.dot_dimension_numbers<[1], [1], [0], [0], [0, 0, 1, 0], [], []>} : vector<8x32xbf16>, vector<8x32xbf16>, vector<8x8xf32> -> vector<8x8xf32>
    %151 = vector.broadcast %37 : vector<1x8xf32> to vector<8x8xf32>
    %152 = arith.addf %150, %151 : vector<8x8xf32>
    %153 = arith.truncf %3 : vector<16x32xf32> to vector<16x32xbf16>
    %cst_115 = arith.constant dense<0.000000e+00> : vector<16x8xf32>
    %154 = tpu.matmul %153, %45, %cst_115 {dimension_numbers = #tpu.dot_dimension_numbers<[1], [1], [0], [0], [0, 0, 1, 0], [], []>} : vector<16x32xbf16>, vector<8x32xbf16>, vector<16x8xf32> -> vector<16x8xf32>
    %155 = vector.broadcast %53 : vector<1x8xf32> to vector<16x8xf32>
    %156 = arith.addf %154, %155 : vector<16x8xf32>
    %157 = arith.truncf %3 : vector<16x32xf32> to vector<16x32xbf16>
    %cst_116 = arith.constant dense<0.000000e+00> : vector<16x8xf32>
    %158 = tpu.matmul %157, %61, %cst_116 {dimension_numbers = #tpu.dot_dimension_numbers<[1], [1], [0], [0], [0, 0, 1, 0], [], []>} : vector<16x32xbf16>, vector<8x32xbf16>, vector<16x8xf32> -> vector<16x8xf32>
    %159 = vector.broadcast %69 : vector<1x8xf32> to vector<16x8xf32>
    %160 = arith.addf %158, %159 : vector<16x8xf32>
    %161 = arith.truncf %152 : vector<8x8xf32> to vector<8x8xbf16>
    %162 = arith.truncf %156 : vector<16x8xf32> to vector<16x8xbf16>
    %cst_117 = arith.constant dense<0.000000e+00> : vector<8x16xf32>
    %163 = tpu.matmul %161, %162, %cst_117 {dimension_numbers = #tpu.dot_dimension_numbers<[1], [1], [0], [0], [0, 0, 1, 0], [], []>} : vector<8x8xbf16>, vector<16x8xbf16>, vector<8x16xf32> -> vector<8x16xf32>
    %cst_118 = arith.constant 0.353553385 : f32
    %164 = vector.broadcast %cst_118 : f32 to vector<8x16xf32>
    %165 = arith.mulf %163, %164 : vector<8x16xf32>
    %166 = arith.addf %165, %16 : vector<8x16xf32>
    %cst_119 = arith.constant dense<0xFF800000> : vector<8xf32>
    %167 = vector.multi_reduction <maximumf>, %166, %cst_119 [1] : vector<8x16xf32> to vector<8xf32>
    %168 = vector.shape_cast %167 : vector<8xf32> to vector<8x1xf32>
    %169 = vector.broadcast %168 : vector<8x1xf32> to vector<8x16xf32>
    %170 = arith.subf %166, %169 : vector<8x16xf32>
    %171 = math.exp %170 : vector<8x16xf32>
    %cst_120 = arith.constant dense<0.000000e+00> : vector<8xf32>
    %172 = vector.multi_reduction <add>, %171, %cst_120 [1] : vector<8x16xf32> to vector<8xf32>
    %173 = vector.shape_cast %172 : vector<8xf32> to vector<8x1xf32>
    %174 = tpu.reciprocal %173 {approx = true} : vector<8x1xf32> -> vector<8x1xf32>
    %175 = vector.broadcast %174 : vector<8x1xf32> to vector<8x16xf32>
    %176 = arith.mulf %171, %175 : vector<8x16xf32>
    %177 = arith.truncf %176 : vector<8x16xf32> to vector<8x16xbf16>
    %178 = arith.truncf %160 : vector<16x8xf32> to vector<16x8xbf16>
    %cst_121 = arith.constant dense<0.000000e+00> : vector<8x8xf32>
    %179 = tpu.matmul %177, %178, %cst_121 {dimension_numbers = #tpu.dot_dimension_numbers<[1], [0], [0], [1], [0, 0, 1, 1], [], []>} : vector<8x16xbf16>, vector<16x8xbf16>, vector<8x8xf32> -> vector<8x8xf32>
    %180 = arith.truncf %179 : vector<8x8xf32> to vector<8x8xbf16>
    %cst_122 = arith.constant dense<0.000000e+00> : vector<8x32xf32>
    %181 = tpu.matmul %180, %77, %cst_122 {dimension_numbers = #tpu.dot_dimension_numbers<[1], [0], [0], [1], [0, 0, 1, 1], [], []>} : vector<8x8xbf16>, vector<8x32xbf16>, vector<8x32xf32> -> vector<8x32xf32>
    %182 = arith.addf %148, %181 : vector<8x32xf32>
    %183 = arith.truncf %1 : vector<8x32xf32> to vector<8x32xbf16>
    %cst_123 = arith.constant dense<0.000000e+00> : vector<8x8xf32>
    %184 = tpu.matmul %183, %31, %cst_123 {dimension_numbers = #tpu.dot_dimension_numbers<[1], [1], [0], [0], [0, 0, 1, 0], [], []>} : vector<8x32xbf16>, vector<8x32xbf16>, vector<8x8xf32> -> vector<8x8xf32>
    %185 = vector.broadcast %39 : vector<1x8xf32> to vector<8x8xf32>
    %186 = arith.addf %184, %185 : vector<8x8xf32>
    %187 = arith.truncf %3 : vector<16x32xf32> to vector<16x32xbf16>
    %cst_124 = arith.constant dense<0.000000e+00> : vector<16x8xf32>
    %188 = tpu.matmul %187, %47, %cst_124 {dimension_numbers = #tpu.dot_dimension_numbers<[1], [1], [0], [0], [0, 0, 1, 0], [], []>} : vector<16x32xbf16>, vector<8x32xbf16>, vector<16x8xf32> -> vector<16x8xf32>
    %189 = vector.broadcast %55 : vector<1x8xf32> to vector<16x8xf32>
    %190 = arith.addf %188, %189 : vector<16x8xf32>
    %191 = arith.truncf %3 : vector<16x32xf32> to vector<16x32xbf16>
    %cst_125 = arith.constant dense<0.000000e+00> : vector<16x8xf32>
    %192 = tpu.matmul %191, %63, %cst_125 {dimension_numbers = #tpu.dot_dimension_numbers<[1], [1], [0], [0], [0, 0, 1, 0], [], []>} : vector<16x32xbf16>, vector<8x32xbf16>, vector<16x8xf32> -> vector<16x8xf32>
    %193 = vector.broadcast %71 : vector<1x8xf32> to vector<16x8xf32>
    %194 = arith.addf %192, %193 : vector<16x8xf32>
    %195 = arith.truncf %186 : vector<8x8xf32> to vector<8x8xbf16>
    %196 = arith.truncf %190 : vector<16x8xf32> to vector<16x8xbf16>
    %cst_126 = arith.constant dense<0.000000e+00> : vector<8x16xf32>
    %197 = tpu.matmul %195, %196, %cst_126 {dimension_numbers = #tpu.dot_dimension_numbers<[1], [1], [0], [0], [0, 0, 1, 0], [], []>} : vector<8x8xbf16>, vector<16x8xbf16>, vector<8x16xf32> -> vector<8x16xf32>
    %cst_127 = arith.constant 0.353553385 : f32
    %198 = vector.broadcast %cst_127 : f32 to vector<8x16xf32>
    %199 = arith.mulf %197, %198 : vector<8x16xf32>
    %200 = arith.addf %199, %16 : vector<8x16xf32>
    %cst_128 = arith.constant dense<0xFF800000> : vector<8xf32>
    %201 = vector.multi_reduction <maximumf>, %200, %cst_128 [1] : vector<8x16xf32> to vector<8xf32>
    %202 = vector.shape_cast %201 : vector<8xf32> to vector<8x1xf32>
    %203 = vector.broadcast %202 : vector<8x1xf32> to vector<8x16xf32>
    %204 = arith.subf %200, %203 : vector<8x16xf32>
    %205 = math.exp %204 : vector<8x16xf32>
    %cst_129 = arith.constant dense<0.000000e+00> : vector<8xf32>
    %206 = vector.multi_reduction <add>, %205, %cst_129 [1] : vector<8x16xf32> to vector<8xf32>
    %207 = vector.shape_cast %206 : vector<8xf32> to vector<8x1xf32>
    %208 = tpu.reciprocal %207 {approx = true} : vector<8x1xf32> -> vector<8x1xf32>
    %209 = vector.broadcast %208 : vector<8x1xf32> to vector<8x16xf32>
    %210 = arith.mulf %205, %209 : vector<8x16xf32>
    %211 = arith.truncf %210 : vector<8x16xf32> to vector<8x16xbf16>
    %212 = arith.truncf %194 : vector<16x8xf32> to vector<16x8xbf16>
    %cst_130 = arith.constant dense<0.000000e+00> : vector<8x8xf32>
    %213 = tpu.matmul %211, %212, %cst_130 {dimension_numbers = #tpu.dot_dimension_numbers<[1], [0], [0], [1], [0, 0, 1, 1], [], []>} : vector<8x16xbf16>, vector<16x8xbf16>, vector<8x8xf32> -> vector<8x8xf32>
    %214 = arith.truncf %213 : vector<8x8xf32> to vector<8x8xbf16>
    %cst_131 = arith.constant dense<0.000000e+00> : vector<8x32xf32>
    %215 = tpu.matmul %214, %79, %cst_131 {dimension_numbers = #tpu.dot_dimension_numbers<[1], [0], [0], [1], [0, 0, 1, 1], [], []>} : vector<8x8xbf16>, vector<8x32xbf16>, vector<8x32xf32> -> vector<8x32xf32>
    %216 = arith.addf %182, %215 : vector<8x32xf32>
    %217 = vector.broadcast %81 : vector<1x32xf32> to vector<8x32xf32>
    %218 = arith.addf %216, %217 : vector<8x32xf32>
    %219 = arith.addf %218, %1 : vector<8x32xf32>
    %c1_132 = arith.constant 1 : index
    %c0_133 = arith.constant 0 : index
    %c0_134 = arith.constant 0 : index
    %220 = vector.load %arg9[%c1_132, %c0_133, %c0_134] : memref<9x1x32xf32, #tpu.memory_space<vmem>>, vector<1x1x32xf32>
    %221 = vector.shape_cast %220 : vector<1x1x32xf32> to vector<1x32xf32>
    %c2_135 = arith.constant 2 : index
    %c0_136 = arith.constant 0 : index
    %c0_137 = arith.constant 0 : index
    %222 = vector.load %arg9[%c2_135, %c0_136, %c0_137] : memref<9x1x32xf32, #tpu.memory_space<vmem>>, vector<1x1x32xf32>
    %223 = vector.shape_cast %222 : vector<1x1x32xf32> to vector<1x32xf32>
    %cst_138 = arith.constant dense<0.000000e+00> : vector<8xf32>
    %224 = vector.multi_reduction <add>, %219, %cst_138 [1] : vector<8x32xf32> to vector<8xf32>
    %225 = vector.shape_cast %224 : vector<8xf32> to vector<8x1xf32>
    %cst_139 = arith.constant 3.200000e+01 : f32
    %226 = vector.broadcast %cst_139 : f32 to vector<8x1xf32>
    %227 = arith.divf %225, %226 : vector<8x1xf32>
    %228 = vector.broadcast %227 : vector<8x1xf32> to vector<8x32xf32>
    %229 = arith.subf %219, %228 : vector<8x32xf32>
    %230 = arith.mulf %229, %229 : vector<8x32xf32>
    %cst_140 = arith.constant dense<0.000000e+00> : vector<8xf32>
    %231 = vector.multi_reduction <add>, %230, %cst_140 [1] : vector<8x32xf32> to vector<8xf32>
    %232 = vector.shape_cast %231 : vector<8xf32> to vector<8x1xf32>
    %cst_141 = arith.constant 3.200000e+01 : f32
    %233 = vector.broadcast %cst_141 : f32 to vector<8x1xf32>
    %234 = arith.divf %232, %233 : vector<8x1xf32>
    %cst_142 = arith.constant 9.99999996E-13 : f32
    %235 = vector.broadcast %cst_142 : f32 to vector<8x1xf32>
    %236 = arith.addf %234, %235 : vector<8x1xf32>
    %237 = math.rsqrt %236 : vector<8x1xf32>
    %238 = vector.broadcast %237 : vector<8x1xf32> to vector<8x32xf32>
    %239 = arith.mulf %229, %238 : vector<8x32xf32>
    %240 = vector.broadcast %221 : vector<1x32xf32> to vector<8x32xf32>
    %241 = arith.mulf %239, %240 : vector<8x32xf32>
    %242 = vector.broadcast %223 : vector<1x32xf32> to vector<8x32xf32>
    %243 = arith.addf %241, %242 : vector<8x32xf32>
    %c12 = arith.constant 12 : index
    %c0_143 = arith.constant 0 : index
    %c0_144 = arith.constant 0 : index
    %244 = vector.load %arg6[%c12, %c0_143, %c0_144] : memref<24x8x32xbf16, #tpu.memory_space<vmem>>, vector<1x8x32xbf16>
    %245 = vector.shape_cast %244 : vector<1x8x32xbf16> to vector<8x32xbf16>
    %c13 = arith.constant 13 : index
    %c0_145 = arith.constant 0 : index
    %c0_146 = arith.constant 0 : index
    %246 = vector.load %arg6[%c13, %c0_145, %c0_146] : memref<24x8x32xbf16, #tpu.memory_space<vmem>>, vector<1x8x32xbf16>
    %247 = vector.shape_cast %246 : vector<1x8x32xbf16> to vector<8x32xbf16>
    %c14 = arith.constant 14 : index
    %c0_147 = arith.constant 0 : index
    %c0_148 = arith.constant 0 : index
    %248 = vector.load %arg6[%c14, %c0_147, %c0_148] : memref<24x8x32xbf16, #tpu.memory_space<vmem>>, vector<1x8x32xbf16>
    %249 = vector.shape_cast %248 : vector<1x8x32xbf16> to vector<8x32xbf16>
    %c15 = arith.constant 15 : index
    %c0_149 = arith.constant 0 : index
    %c0_150 = arith.constant 0 : index
    %250 = vector.load %arg6[%c15, %c0_149, %c0_150] : memref<24x8x32xbf16, #tpu.memory_space<vmem>>, vector<1x8x32xbf16>
    %251 = vector.shape_cast %250 : vector<1x8x32xbf16> to vector<8x32xbf16>
    %c12_151 = arith.constant 12 : index
    %c0_152 = arith.constant 0 : index
    %c0_153 = arith.constant 0 : index
    %252 = vector.load %arg7[%c12_151, %c0_152, %c0_153] : memref<24x1x8xf32, #tpu.memory_space<vmem>>, vector<1x1x8xf32>
    %253 = vector.shape_cast %252 : vector<1x1x8xf32> to vector<1x8xf32>
    %c13_154 = arith.constant 13 : index
    %c0_155 = arith.constant 0 : index
    %c0_156 = arith.constant 0 : index
    %254 = vector.load %arg7[%c13_154, %c0_155, %c0_156] : memref<24x1x8xf32, #tpu.memory_space<vmem>>, vector<1x1x8xf32>
    %255 = vector.shape_cast %254 : vector<1x1x8xf32> to vector<1x8xf32>
    %c14_157 = arith.constant 14 : index
    %c0_158 = arith.constant 0 : index
    %c0_159 = arith.constant 0 : index
    %256 = vector.load %arg7[%c14_157, %c0_158, %c0_159] : memref<24x1x8xf32, #tpu.memory_space<vmem>>, vector<1x1x8xf32>
    %257 = vector.shape_cast %256 : vector<1x1x8xf32> to vector<1x8xf32>
    %c15_160 = arith.constant 15 : index
    %c0_161 = arith.constant 0 : index
    %c0_162 = arith.constant 0 : index
    %258 = vector.load %arg7[%c15_160, %c0_161, %c0_162] : memref<24x1x8xf32, #tpu.memory_space<vmem>>, vector<1x1x8xf32>
    %259 = vector.shape_cast %258 : vector<1x1x8xf32> to vector<1x8xf32>
    %c16 = arith.constant 16 : index
    %c0_163 = arith.constant 0 : index
    %c0_164 = arith.constant 0 : index
    %260 = vector.load %arg6[%c16, %c0_163, %c0_164] : memref<24x8x32xbf16, #tpu.memory_space<vmem>>, vector<1x8x32xbf16>
    %261 = vector.shape_cast %260 : vector<1x8x32xbf16> to vector<8x32xbf16>
    %c17 = arith.constant 17 : index
    %c0_165 = arith.constant 0 : index
    %c0_166 = arith.constant 0 : index
    %262 = vector.load %arg6[%c17, %c0_165, %c0_166] : memref<24x8x32xbf16, #tpu.memory_space<vmem>>, vector<1x8x32xbf16>
    %263 = vector.shape_cast %262 : vector<1x8x32xbf16> to vector<8x32xbf16>
    %c18 = arith.constant 18 : index
    %c0_167 = arith.constant 0 : index
    %c0_168 = arith.constant 0 : index
    %264 = vector.load %arg6[%c18, %c0_167, %c0_168] : memref<24x8x32xbf16, #tpu.memory_space<vmem>>, vector<1x8x32xbf16>
    %265 = vector.shape_cast %264 : vector<1x8x32xbf16> to vector<8x32xbf16>
    %c19 = arith.constant 19 : index
    %c0_169 = arith.constant 0 : index
    %c0_170 = arith.constant 0 : index
    %266 = vector.load %arg6[%c19, %c0_169, %c0_170] : memref<24x8x32xbf16, #tpu.memory_space<vmem>>, vector<1x8x32xbf16>
    %267 = vector.shape_cast %266 : vector<1x8x32xbf16> to vector<8x32xbf16>
    %c16_171 = arith.constant 16 : index
    %c0_172 = arith.constant 0 : index
    %c0_173 = arith.constant 0 : index
    %268 = vector.load %arg7[%c16_171, %c0_172, %c0_173] : memref<24x1x8xf32, #tpu.memory_space<vmem>>, vector<1x1x8xf32>
    %269 = vector.shape_cast %268 : vector<1x1x8xf32> to vector<1x8xf32>
    %c17_174 = arith.constant 17 : index
    %c0_175 = arith.constant 0 : index
    %c0_176 = arith.constant 0 : index
    %270 = vector.load %arg7[%c17_174, %c0_175, %c0_176] : memref<24x1x8xf32, #tpu.memory_space<vmem>>, vector<1x1x8xf32>
    %271 = vector.shape_cast %270 : vector<1x1x8xf32> to vector<1x8xf32>
    %c18_177 = arith.constant 18 : index
    %c0_178 = arith.constant 0 : index
    %c0_179 = arith.constant 0 : index
    %272 = vector.load %arg7[%c18_177, %c0_178, %c0_179] : memref<24x1x8xf32, #tpu.memory_space<vmem>>, vector<1x1x8xf32>
    %273 = vector.shape_cast %272 : vector<1x1x8xf32> to vector<1x8xf32>
    %c19_180 = arith.constant 19 : index
    %c0_181 = arith.constant 0 : index
    %c0_182 = arith.constant 0 : index
    %274 = vector.load %arg7[%c19_180, %c0_181, %c0_182] : memref<24x1x8xf32, #tpu.memory_space<vmem>>, vector<1x1x8xf32>
    %275 = vector.shape_cast %274 : vector<1x1x8xf32> to vector<1x8xf32>
    %c20 = arith.constant 20 : index
    %c0_183 = arith.constant 0 : index
    %c0_184 = arith.constant 0 : index
    %276 = vector.load %arg6[%c20, %c0_183, %c0_184] : memref<24x8x32xbf16, #tpu.memory_space<vmem>>, vector<1x8x32xbf16>
    %277 = vector.shape_cast %276 : vector<1x8x32xbf16> to vector<8x32xbf16>
    %c21 = arith.constant 21 : index
    %c0_185 = arith.constant 0 : index
    %c0_186 = arith.constant 0 : index
    %278 = vector.load %arg6[%c21, %c0_185, %c0_186] : memref<24x8x32xbf16, #tpu.memory_space<vmem>>, vector<1x8x32xbf16>
    %279 = vector.shape_cast %278 : vector<1x8x32xbf16> to vector<8x32xbf16>
    %c22 = arith.constant 22 : index
    %c0_187 = arith.constant 0 : index
    %c0_188 = arith.constant 0 : index
    %280 = vector.load %arg6[%c22, %c0_187, %c0_188] : memref<24x8x32xbf16, #tpu.memory_space<vmem>>, vector<1x8x32xbf16>
    %281 = vector.shape_cast %280 : vector<1x8x32xbf16> to vector<8x32xbf16>
    %c23 = arith.constant 23 : index
    %c0_189 = arith.constant 0 : index
    %c0_190 = arith.constant 0 : index
    %282 = vector.load %arg6[%c23, %c0_189, %c0_190] : memref<24x8x32xbf16, #tpu.memory_space<vmem>>, vector<1x8x32xbf16>
    %283 = vector.shape_cast %282 : vector<1x8x32xbf16> to vector<8x32xbf16>
    %c20_191 = arith.constant 20 : index
    %c0_192 = arith.constant 0 : index
    %c0_193 = arith.constant 0 : index
    %284 = vector.load %arg7[%c20_191, %c0_192, %c0_193] : memref<24x1x8xf32, #tpu.memory_space<vmem>>, vector<1x1x8xf32>
    %285 = vector.shape_cast %284 : vector<1x1x8xf32> to vector<1x8xf32>
    %c21_194 = arith.constant 21 : index
    %c0_195 = arith.constant 0 : index
    %c0_196 = arith.constant 0 : index
    %286 = vector.load %arg7[%c21_194, %c0_195, %c0_196] : memref<24x1x8xf32, #tpu.memory_space<vmem>>, vector<1x1x8xf32>
    %287 = vector.shape_cast %286 : vector<1x1x8xf32> to vector<1x8xf32>
    %c22_197 = arith.constant 22 : index
    %c0_198 = arith.constant 0 : index
    %c0_199 = arith.constant 0 : index
    %288 = vector.load %arg7[%c22_197, %c0_198, %c0_199] : memref<24x1x8xf32, #tpu.memory_space<vmem>>, vector<1x1x8xf32>
    %289 = vector.shape_cast %288 : vector<1x1x8xf32> to vector<1x8xf32>
    %c23_200 = arith.constant 23 : index
    %c0_201 = arith.constant 0 : index
    %c0_202 = arith.constant 0 : index
    %290 = vector.load %arg7[%c23_200, %c0_201, %c0_202] : memref<24x1x8xf32, #tpu.memory_space<vmem>>, vector<1x1x8xf32>
    %291 = vector.shape_cast %290 : vector<1x1x8xf32> to vector<1x8xf32>
    %c4_203 = arith.constant 4 : index
    %c0_204 = arith.constant 0 : index
    %c0_205 = arith.constant 0 : index
    %292 = vector.load %arg8[%c4_203, %c0_204, %c0_205] : memref<8x8x32xbf16, #tpu.memory_space<vmem>>, vector<1x8x32xbf16>
    %293 = vector.shape_cast %292 : vector<1x8x32xbf16> to vector<8x32xbf16>
    %c5_206 = arith.constant 5 : index
    %c0_207 = arith.constant 0 : index
    %c0_208 = arith.constant 0 : index
    %294 = vector.load %arg8[%c5_206, %c0_207, %c0_208] : memref<8x8x32xbf16, #tpu.memory_space<vmem>>, vector<1x8x32xbf16>
    %295 = vector.shape_cast %294 : vector<1x8x32xbf16> to vector<8x32xbf16>
    %c6_209 = arith.constant 6 : index
    %c0_210 = arith.constant 0 : index
    %c0_211 = arith.constant 0 : index
    %296 = vector.load %arg8[%c6_209, %c0_210, %c0_211] : memref<8x8x32xbf16, #tpu.memory_space<vmem>>, vector<1x8x32xbf16>
    %297 = vector.shape_cast %296 : vector<1x8x32xbf16> to vector<8x32xbf16>
    %c7_212 = arith.constant 7 : index
    %c0_213 = arith.constant 0 : index
    %c0_214 = arith.constant 0 : index
    %298 = vector.load %arg8[%c7_212, %c0_213, %c0_214] : memref<8x8x32xbf16, #tpu.memory_space<vmem>>, vector<1x8x32xbf16>
    %299 = vector.shape_cast %298 : vector<1x8x32xbf16> to vector<8x32xbf16>
    %c3_215 = arith.constant 3 : index
    %c0_216 = arith.constant 0 : index
    %c0_217 = arith.constant 0 : index
    %300 = vector.load %arg9[%c3_215, %c0_216, %c0_217] : memref<9x1x32xf32, #tpu.memory_space<vmem>>, vector<1x1x32xf32>
    %301 = vector.shape_cast %300 : vector<1x1x32xf32> to vector<1x32xf32>
    %302 = arith.truncf %243 : vector<8x32xf32> to vector<8x32xbf16>
    %cst_218 = arith.constant dense<0.000000e+00> : vector<8x8xf32>
    %303 = tpu.matmul %302, %245, %cst_218 {dimension_numbers = #tpu.dot_dimension_numbers<[1], [1], [0], [0], [0, 0, 1, 0], [], []>} : vector<8x32xbf16>, vector<8x32xbf16>, vector<8x8xf32> -> vector<8x8xf32>
    %304 = vector.broadcast %253 : vector<1x8xf32> to vector<8x8xf32>
    %305 = arith.addf %303, %304 : vector<8x8xf32>
    %306 = arith.truncf %5 : vector<8x32xf32> to vector<8x32xbf16>
    %cst_219 = arith.constant dense<0.000000e+00> : vector<8x8xf32>
    %307 = tpu.matmul %306, %261, %cst_219 {dimension_numbers = #tpu.dot_dimension_numbers<[1], [1], [0], [0], [0, 0, 1, 0], [], []>} : vector<8x32xbf16>, vector<8x32xbf16>, vector<8x8xf32> -> vector<8x8xf32>
    %308 = vector.broadcast %269 : vector<1x8xf32> to vector<8x8xf32>
    %309 = arith.addf %307, %308 : vector<8x8xf32>
    %310 = arith.truncf %5 : vector<8x32xf32> to vector<8x32xbf16>
    %cst_220 = arith.constant dense<0.000000e+00> : vector<8x8xf32>
    %311 = tpu.matmul %310, %277, %cst_220 {dimension_numbers = #tpu.dot_dimension_numbers<[1], [1], [0], [0], [0, 0, 1, 0], [], []>} : vector<8x32xbf16>, vector<8x32xbf16>, vector<8x8xf32> -> vector<8x8xf32>
    %312 = vector.broadcast %285 : vector<1x8xf32> to vector<8x8xf32>
    %313 = arith.addf %311, %312 : vector<8x8xf32>
    %314 = arith.truncf %305 : vector<8x8xf32> to vector<8x8xbf16>
    %315 = arith.truncf %309 : vector<8x8xf32> to vector<8x8xbf16>
    %cst_221 = arith.constant dense<0.000000e+00> : vector<8x8xf32>
    %316 = tpu.matmul %314, %315, %cst_221 {dimension_numbers = #tpu.dot_dimension_numbers<[1], [1], [0], [0], [0, 0, 1, 0], [], []>} : vector<8x8xbf16>, vector<8x8xbf16>, vector<8x8xf32> -> vector<8x8xf32>
    %cst_222 = arith.constant 0.353553385 : f32
    %317 = vector.broadcast %cst_222 : f32 to vector<8x8xf32>
    %318 = arith.mulf %316, %317 : vector<8x8xf32>
    %319 = vector.broadcast %20 : vector<1x8xf32> to vector<8x8xf32>
    %320 = arith.addf %318, %319 : vector<8x8xf32>
    %cst_223 = arith.constant dense<0xFF800000> : vector<8xf32>
    %321 = vector.multi_reduction <maximumf>, %320, %cst_223 [1] : vector<8x8xf32> to vector<8xf32>
    %322 = vector.shape_cast %321 : vector<8xf32> to vector<8x1xf32>
    %323 = vector.broadcast %322 : vector<8x1xf32> to vector<8x8xf32>
    %324 = arith.subf %320, %323 : vector<8x8xf32>
    %325 = math.exp %324 : vector<8x8xf32>
    %cst_224 = arith.constant dense<0.000000e+00> : vector<8xf32>
    %326 = vector.multi_reduction <add>, %325, %cst_224 [1] : vector<8x8xf32> to vector<8xf32>
    %327 = vector.shape_cast %326 : vector<8xf32> to vector<8x1xf32>
    %328 = tpu.reciprocal %327 {approx = true} : vector<8x1xf32> -> vector<8x1xf32>
    %329 = vector.broadcast %328 : vector<8x1xf32> to vector<8x8xf32>
    %330 = arith.mulf %325, %329 : vector<8x8xf32>
    %331 = arith.truncf %330 : vector<8x8xf32> to vector<8x8xbf16>
    %332 = arith.truncf %313 : vector<8x8xf32> to vector<8x8xbf16>
    %cst_225 = arith.constant dense<0.000000e+00> : vector<8x8xf32>
    %333 = tpu.matmul %331, %332, %cst_225 {dimension_numbers = #tpu.dot_dimension_numbers<[1], [0], [0], [1], [0, 0, 1, 1], [], []>} : vector<8x8xbf16>, vector<8x8xbf16>, vector<8x8xf32> -> vector<8x8xf32>
    %334 = arith.truncf %333 : vector<8x8xf32> to vector<8x8xbf16>
    %cst_226 = arith.constant dense<0.000000e+00> : vector<8x32xf32>
    %335 = tpu.matmul %334, %293, %cst_226 {dimension_numbers = #tpu.dot_dimension_numbers<[1], [0], [0], [1], [0, 0, 1, 1], [], []>} : vector<8x8xbf16>, vector<8x32xbf16>, vector<8x32xf32> -> vector<8x32xf32>
    %336 = arith.truncf %243 : vector<8x32xf32> to vector<8x32xbf16>
    %cst_227 = arith.constant dense<0.000000e+00> : vector<8x8xf32>
    %337 = tpu.matmul %336, %247, %cst_227 {dimension_numbers = #tpu.dot_dimension_numbers<[1], [1], [0], [0], [0, 0, 1, 0], [], []>} : vector<8x32xbf16>, vector<8x32xbf16>, vector<8x8xf32> -> vector<8x8xf32>
    %338 = vector.broadcast %255 : vector<1x8xf32> to vector<8x8xf32>
    %339 = arith.addf %337, %338 : vector<8x8xf32>
    %340 = arith.truncf %5 : vector<8x32xf32> to vector<8x32xbf16>
    %cst_228 = arith.constant dense<0.000000e+00> : vector<8x8xf32>
    %341 = tpu.matmul %340, %263, %cst_228 {dimension_numbers = #tpu.dot_dimension_numbers<[1], [1], [0], [0], [0, 0, 1, 0], [], []>} : vector<8x32xbf16>, vector<8x32xbf16>, vector<8x8xf32> -> vector<8x8xf32>
    %342 = vector.broadcast %271 : vector<1x8xf32> to vector<8x8xf32>
    %343 = arith.addf %341, %342 : vector<8x8xf32>
    %344 = arith.truncf %5 : vector<8x32xf32> to vector<8x32xbf16>
    %cst_229 = arith.constant dense<0.000000e+00> : vector<8x8xf32>
    %345 = tpu.matmul %344, %279, %cst_229 {dimension_numbers = #tpu.dot_dimension_numbers<[1], [1], [0], [0], [0, 0, 1, 0], [], []>} : vector<8x32xbf16>, vector<8x32xbf16>, vector<8x8xf32> -> vector<8x8xf32>
    %346 = vector.broadcast %287 : vector<1x8xf32> to vector<8x8xf32>
    %347 = arith.addf %345, %346 : vector<8x8xf32>
    %348 = arith.truncf %339 : vector<8x8xf32> to vector<8x8xbf16>
    %349 = arith.truncf %343 : vector<8x8xf32> to vector<8x8xbf16>
    %cst_230 = arith.constant dense<0.000000e+00> : vector<8x8xf32>
    %350 = tpu.matmul %348, %349, %cst_230 {dimension_numbers = #tpu.dot_dimension_numbers<[1], [1], [0], [0], [0, 0, 1, 0], [], []>} : vector<8x8xbf16>, vector<8x8xbf16>, vector<8x8xf32> -> vector<8x8xf32>
    %cst_231 = arith.constant 0.353553385 : f32
    %351 = vector.broadcast %cst_231 : f32 to vector<8x8xf32>
    %352 = arith.mulf %350, %351 : vector<8x8xf32>
    %353 = vector.broadcast %20 : vector<1x8xf32> to vector<8x8xf32>
    %354 = arith.addf %352, %353 : vector<8x8xf32>
    %cst_232 = arith.constant dense<0xFF800000> : vector<8xf32>
    %355 = vector.multi_reduction <maximumf>, %354, %cst_232 [1] : vector<8x8xf32> to vector<8xf32>
    %356 = vector.shape_cast %355 : vector<8xf32> to vector<8x1xf32>
    %357 = vector.broadcast %356 : vector<8x1xf32> to vector<8x8xf32>
    %358 = arith.subf %354, %357 : vector<8x8xf32>
    %359 = math.exp %358 : vector<8x8xf32>
    %cst_233 = arith.constant dense<0.000000e+00> : vector<8xf32>
    %360 = vector.multi_reduction <add>, %359, %cst_233 [1] : vector<8x8xf32> to vector<8xf32>
    %361 = vector.shape_cast %360 : vector<8xf32> to vector<8x1xf32>
    %362 = tpu.reciprocal %361 {approx = true} : vector<8x1xf32> -> vector<8x1xf32>
    %363 = vector.broadcast %362 : vector<8x1xf32> to vector<8x8xf32>
    %364 = arith.mulf %359, %363 : vector<8x8xf32>
    %365 = arith.truncf %364 : vector<8x8xf32> to vector<8x8xbf16>
    %366 = arith.truncf %347 : vector<8x8xf32> to vector<8x8xbf16>
    %cst_234 = arith.constant dense<0.000000e+00> : vector<8x8xf32>
    %367 = tpu.matmul %365, %366, %cst_234 {dimension_numbers = #tpu.dot_dimension_numbers<[1], [0], [0], [1], [0, 0, 1, 1], [], []>} : vector<8x8xbf16>, vector<8x8xbf16>, vector<8x8xf32> -> vector<8x8xf32>
    %368 = arith.truncf %367 : vector<8x8xf32> to vector<8x8xbf16>
    %cst_235 = arith.constant dense<0.000000e+00> : vector<8x32xf32>
    %369 = tpu.matmul %368, %295, %cst_235 {dimension_numbers = #tpu.dot_dimension_numbers<[1], [0], [0], [1], [0, 0, 1, 1], [], []>} : vector<8x8xbf16>, vector<8x32xbf16>, vector<8x32xf32> -> vector<8x32xf32>
    %370 = arith.addf %335, %369 : vector<8x32xf32>
    %371 = arith.truncf %243 : vector<8x32xf32> to vector<8x32xbf16>
    %cst_236 = arith.constant dense<0.000000e+00> : vector<8x8xf32>
    %372 = tpu.matmul %371, %249, %cst_236 {dimension_numbers = #tpu.dot_dimension_numbers<[1], [1], [0], [0], [0, 0, 1, 0], [], []>} : vector<8x32xbf16>, vector<8x32xbf16>, vector<8x8xf32> -> vector<8x8xf32>
    %373 = vector.broadcast %257 : vector<1x8xf32> to vector<8x8xf32>
    %374 = arith.addf %372, %373 : vector<8x8xf32>
    %375 = arith.truncf %5 : vector<8x32xf32> to vector<8x32xbf16>
    %cst_237 = arith.constant dense<0.000000e+00> : vector<8x8xf32>
    %376 = tpu.matmul %375, %265, %cst_237 {dimension_numbers = #tpu.dot_dimension_numbers<[1], [1], [0], [0], [0, 0, 1, 0], [], []>} : vector<8x32xbf16>, vector<8x32xbf16>, vector<8x8xf32> -> vector<8x8xf32>
    %377 = vector.broadcast %273 : vector<1x8xf32> to vector<8x8xf32>
    %378 = arith.addf %376, %377 : vector<8x8xf32>
    %379 = arith.truncf %5 : vector<8x32xf32> to vector<8x32xbf16>
    %cst_238 = arith.constant dense<0.000000e+00> : vector<8x8xf32>
    %380 = tpu.matmul %379, %281, %cst_238 {dimension_numbers = #tpu.dot_dimension_numbers<[1], [1], [0], [0], [0, 0, 1, 0], [], []>} : vector<8x32xbf16>, vector<8x32xbf16>, vector<8x8xf32> -> vector<8x8xf32>
    %381 = vector.broadcast %289 : vector<1x8xf32> to vector<8x8xf32>
    %382 = arith.addf %380, %381 : vector<8x8xf32>
    %383 = arith.truncf %374 : vector<8x8xf32> to vector<8x8xbf16>
    %384 = arith.truncf %378 : vector<8x8xf32> to vector<8x8xbf16>
    %cst_239 = arith.constant dense<0.000000e+00> : vector<8x8xf32>
    %385 = tpu.matmul %383, %384, %cst_239 {dimension_numbers = #tpu.dot_dimension_numbers<[1], [1], [0], [0], [0, 0, 1, 0], [], []>} : vector<8x8xbf16>, vector<8x8xbf16>, vector<8x8xf32> -> vector<8x8xf32>
    %cst_240 = arith.constant 0.353553385 : f32
    %386 = vector.broadcast %cst_240 : f32 to vector<8x8xf32>
    %387 = arith.mulf %385, %386 : vector<8x8xf32>
    %388 = vector.broadcast %20 : vector<1x8xf32> to vector<8x8xf32>
    %389 = arith.addf %387, %388 : vector<8x8xf32>
    %cst_241 = arith.constant dense<0xFF800000> : vector<8xf32>
    %390 = vector.multi_reduction <maximumf>, %389, %cst_241 [1] : vector<8x8xf32> to vector<8xf32>
    %391 = vector.shape_cast %390 : vector<8xf32> to vector<8x1xf32>
    %392 = vector.broadcast %391 : vector<8x1xf32> to vector<8x8xf32>
    %393 = arith.subf %389, %392 : vector<8x8xf32>
    %394 = math.exp %393 : vector<8x8xf32>
    %cst_242 = arith.constant dense<0.000000e+00> : vector<8xf32>
    %395 = vector.multi_reduction <add>, %394, %cst_242 [1] : vector<8x8xf32> to vector<8xf32>
    %396 = vector.shape_cast %395 : vector<8xf32> to vector<8x1xf32>
    %397 = tpu.reciprocal %396 {approx = true} : vector<8x1xf32> -> vector<8x1xf32>
    %398 = vector.broadcast %397 : vector<8x1xf32> to vector<8x8xf32>
    %399 = arith.mulf %394, %398 : vector<8x8xf32>
    %400 = arith.truncf %399 : vector<8x8xf32> to vector<8x8xbf16>
    %401 = arith.truncf %382 : vector<8x8xf32> to vector<8x8xbf16>
    %cst_243 = arith.constant dense<0.000000e+00> : vector<8x8xf32>
    %402 = tpu.matmul %400, %401, %cst_243 {dimension_numbers = #tpu.dot_dimension_numbers<[1], [0], [0], [1], [0, 0, 1, 1], [], []>} : vector<8x8xbf16>, vector<8x8xbf16>, vector<8x8xf32> -> vector<8x8xf32>
    %403 = arith.truncf %402 : vector<8x8xf32> to vector<8x8xbf16>
    %cst_244 = arith.constant dense<0.000000e+00> : vector<8x32xf32>
    %404 = tpu.matmul %403, %297, %cst_244 {dimension_numbers = #tpu.dot_dimension_numbers<[1], [0], [0], [1], [0, 0, 1, 1], [], []>} : vector<8x8xbf16>, vector<8x32xbf16>, vector<8x32xf32> -> vector<8x32xf32>
    %405 = arith.addf %370, %404 : vector<8x32xf32>
    %406 = arith.truncf %243 : vector<8x32xf32> to vector<8x32xbf16>
    %cst_245 = arith.constant dense<0.000000e+00> : vector<8x8xf32>
    %407 = tpu.matmul %406, %251, %cst_245 {dimension_numbers = #tpu.dot_dimension_numbers<[1], [1], [0], [0], [0, 0, 1, 0], [], []>} : vector<8x32xbf16>, vector<8x32xbf16>, vector<8x8xf32> -> vector<8x8xf32>
    %408 = vector.broadcast %259 : vector<1x8xf32> to vector<8x8xf32>
    %409 = arith.addf %407, %408 : vector<8x8xf32>
    %410 = arith.truncf %5 : vector<8x32xf32> to vector<8x32xbf16>
    %cst_246 = arith.constant dense<0.000000e+00> : vector<8x8xf32>
    %411 = tpu.matmul %410, %267, %cst_246 {dimension_numbers = #tpu.dot_dimension_numbers<[1], [1], [0], [0], [0, 0, 1, 0], [], []>} : vector<8x32xbf16>, vector<8x32xbf16>, vector<8x8xf32> -> vector<8x8xf32>
    %412 = vector.broadcast %275 : vector<1x8xf32> to vector<8x8xf32>
    %413 = arith.addf %411, %412 : vector<8x8xf32>
    %414 = arith.truncf %5 : vector<8x32xf32> to vector<8x32xbf16>
    %cst_247 = arith.constant dense<0.000000e+00> : vector<8x8xf32>
    %415 = tpu.matmul %414, %283, %cst_247 {dimension_numbers = #tpu.dot_dimension_numbers<[1], [1], [0], [0], [0, 0, 1, 0], [], []>} : vector<8x32xbf16>, vector<8x32xbf16>, vector<8x8xf32> -> vector<8x8xf32>
    %416 = vector.broadcast %291 : vector<1x8xf32> to vector<8x8xf32>
    %417 = arith.addf %415, %416 : vector<8x8xf32>
    %418 = arith.truncf %409 : vector<8x8xf32> to vector<8x8xbf16>
    %419 = arith.truncf %413 : vector<8x8xf32> to vector<8x8xbf16>
    %cst_248 = arith.constant dense<0.000000e+00> : vector<8x8xf32>
    %420 = tpu.matmul %418, %419, %cst_248 {dimension_numbers = #tpu.dot_dimension_numbers<[1], [1], [0], [0], [0, 0, 1, 0], [], []>} : vector<8x8xbf16>, vector<8x8xbf16>, vector<8x8xf32> -> vector<8x8xf32>
    %cst_249 = arith.constant 0.353553385 : f32
    %421 = vector.broadcast %cst_249 : f32 to vector<8x8xf32>
    %422 = arith.mulf %420, %421 : vector<8x8xf32>
    %423 = vector.broadcast %20 : vector<1x8xf32> to vector<8x8xf32>
    %424 = arith.addf %422, %423 : vector<8x8xf32>
    %cst_250 = arith.constant dense<0xFF800000> : vector<8xf32>
    %425 = vector.multi_reduction <maximumf>, %424, %cst_250 [1] : vector<8x8xf32> to vector<8xf32>
    %426 = vector.shape_cast %425 : vector<8xf32> to vector<8x1xf32>
    %427 = vector.broadcast %426 : vector<8x1xf32> to vector<8x8xf32>
    %428 = arith.subf %424, %427 : vector<8x8xf32>
    %429 = math.exp %428 : vector<8x8xf32>
    %cst_251 = arith.constant dense<0.000000e+00> : vector<8xf32>
    %430 = vector.multi_reduction <add>, %429, %cst_251 [1] : vector<8x8xf32> to vector<8xf32>
    %431 = vector.shape_cast %430 : vector<8xf32> to vector<8x1xf32>
    %432 = tpu.reciprocal %431 {approx = true} : vector<8x1xf32> -> vector<8x1xf32>
    %433 = vector.broadcast %432 : vector<8x1xf32> to vector<8x8xf32>
    %434 = arith.mulf %429, %433 : vector<8x8xf32>
    %435 = arith.truncf %434 : vector<8x8xf32> to vector<8x8xbf16>
    %436 = arith.truncf %417 : vector<8x8xf32> to vector<8x8xbf16>
    %cst_252 = arith.constant dense<0.000000e+00> : vector<8x8xf32>
    %437 = tpu.matmul %435, %436, %cst_252 {dimension_numbers = #tpu.dot_dimension_numbers<[1], [0], [0], [1], [0, 0, 1, 1], [], []>} : vector<8x8xbf16>, vector<8x8xbf16>, vector<8x8xf32> -> vector<8x8xf32>
    %438 = arith.truncf %437 : vector<8x8xf32> to vector<8x8xbf16>
    %cst_253 = arith.constant dense<0.000000e+00> : vector<8x32xf32>
    %439 = tpu.matmul %438, %299, %cst_253 {dimension_numbers = #tpu.dot_dimension_numbers<[1], [0], [0], [1], [0, 0, 1, 1], [], []>} : vector<8x8xbf16>, vector<8x32xbf16>, vector<8x32xf32> -> vector<8x32xf32>
    %440 = arith.addf %405, %439 : vector<8x32xf32>
    %441 = vector.broadcast %301 : vector<1x32xf32> to vector<8x32xf32>
    %442 = arith.addf %440, %441 : vector<8x32xf32>
    %443 = arith.addf %442, %243 : vector<8x32xf32>
    %c4_254 = arith.constant 4 : index
    %c0_255 = arith.constant 0 : index
    %c0_256 = arith.constant 0 : index
    %444 = vector.load %arg9[%c4_254, %c0_255, %c0_256] : memref<9x1x32xf32, #tpu.memory_space<vmem>>, vector<1x1x32xf32>
    %445 = vector.shape_cast %444 : vector<1x1x32xf32> to vector<1x32xf32>
    %c5_257 = arith.constant 5 : index
    %c0_258 = arith.constant 0 : index
    %c0_259 = arith.constant 0 : index
    %446 = vector.load %arg9[%c5_257, %c0_258, %c0_259] : memref<9x1x32xf32, #tpu.memory_space<vmem>>, vector<1x1x32xf32>
    %447 = vector.shape_cast %446 : vector<1x1x32xf32> to vector<1x32xf32>
    %cst_260 = arith.constant dense<0.000000e+00> : vector<8xf32>
    %448 = vector.multi_reduction <add>, %443, %cst_260 [1] : vector<8x32xf32> to vector<8xf32>
    %449 = vector.shape_cast %448 : vector<8xf32> to vector<8x1xf32>
    %cst_261 = arith.constant 3.200000e+01 : f32
    %450 = vector.broadcast %cst_261 : f32 to vector<8x1xf32>
    %451 = arith.divf %449, %450 : vector<8x1xf32>
    %452 = vector.broadcast %451 : vector<8x1xf32> to vector<8x32xf32>
    %453 = arith.subf %443, %452 : vector<8x32xf32>
    %454 = arith.mulf %453, %453 : vector<8x32xf32>
    %cst_262 = arith.constant dense<0.000000e+00> : vector<8xf32>
    %455 = vector.multi_reduction <add>, %454, %cst_262 [1] : vector<8x32xf32> to vector<8xf32>
    %456 = vector.shape_cast %455 : vector<8xf32> to vector<8x1xf32>
    %cst_263 = arith.constant 3.200000e+01 : f32
    %457 = vector.broadcast %cst_263 : f32 to vector<8x1xf32>
    %458 = arith.divf %456, %457 : vector<8x1xf32>
    %cst_264 = arith.constant 9.99999996E-13 : f32
    %459 = vector.broadcast %cst_264 : f32 to vector<8x1xf32>
    %460 = arith.addf %458, %459 : vector<8x1xf32>
    %461 = math.rsqrt %460 : vector<8x1xf32>
    %462 = vector.broadcast %461 : vector<8x1xf32> to vector<8x32xf32>
    %463 = arith.mulf %453, %462 : vector<8x32xf32>
    %464 = vector.broadcast %445 : vector<1x32xf32> to vector<8x32xf32>
    %465 = arith.mulf %463, %464 : vector<8x32xf32>
    %466 = vector.broadcast %447 : vector<1x32xf32> to vector<8x32xf32>
    %467 = arith.addf %465, %466 : vector<8x32xf32>
    %468 = arith.truncf %467 : vector<8x32xf32> to vector<8x32xbf16>
    %cst_265 = arith.constant dense<0.000000e+00> : vector<8x64xf32>
    %469 = tpu.matmul %468, %21, %cst_265 {dimension_numbers = #tpu.dot_dimension_numbers<[1], [0], [0], [1], [0, 0, 1, 1], [], []>} : vector<8x32xbf16>, vector<32x64xbf16>, vector<8x64xf32> -> vector<8x64xf32>
    %470 = vector.broadcast %22 : vector<1x64xf32> to vector<8x64xf32>
    %471 = arith.addf %469, %470 : vector<8x64xf32>
    %cst_266 = arith.constant 0.000000e+00 : f32
    %472 = vector.broadcast %cst_266 : f32 to vector<8x64xf32>
    %473 = arith.maximumf %471, %472 : vector<8x64xf32>
    %474 = arith.truncf %473 : vector<8x64xf32> to vector<8x64xbf16>
    %cst_267 = arith.constant dense<0.000000e+00> : vector<8x32xf32>
    %475 = tpu.matmul %474, %23, %cst_267 {dimension_numbers = #tpu.dot_dimension_numbers<[1], [0], [0], [1], [0, 0, 1, 1], [], []>} : vector<8x64xbf16>, vector<64x32xbf16>, vector<8x32xf32> -> vector<8x32xf32>
    %c6_268 = arith.constant 6 : index
    %c0_269 = arith.constant 0 : index
    %c0_270 = arith.constant 0 : index
    %476 = vector.load %arg9[%c6_268, %c0_269, %c0_270] : memref<9x1x32xf32, #tpu.memory_space<vmem>>, vector<1x1x32xf32>
    %477 = vector.shape_cast %476 : vector<1x1x32xf32> to vector<1x32xf32>
    %478 = vector.broadcast %477 : vector<1x32xf32> to vector<8x32xf32>
    %479 = arith.addf %475, %478 : vector<8x32xf32>
    %480 = arith.addf %479, %467 : vector<8x32xf32>
    %c7_271 = arith.constant 7 : index
    %c0_272 = arith.constant 0 : index
    %c0_273 = arith.constant 0 : index
    %481 = vector.load %arg9[%c7_271, %c0_272, %c0_273] : memref<9x1x32xf32, #tpu.memory_space<vmem>>, vector<1x1x32xf32>
    %482 = vector.shape_cast %481 : vector<1x1x32xf32> to vector<1x32xf32>
    %c8_274 = arith.constant 8 : index
    %c0_275 = arith.constant 0 : index
    %c0_276 = arith.constant 0 : index
    %483 = vector.load %arg9[%c8_274, %c0_275, %c0_276] : memref<9x1x32xf32, #tpu.memory_space<vmem>>, vector<1x1x32xf32>
    %484 = vector.shape_cast %483 : vector<1x1x32xf32> to vector<1x32xf32>
    %cst_277 = arith.constant dense<0.000000e+00> : vector<8xf32>
    %485 = vector.multi_reduction <add>, %480, %cst_277 [1] : vector<8x32xf32> to vector<8xf32>
    %486 = vector.shape_cast %485 : vector<8xf32> to vector<8x1xf32>
    %cst_278 = arith.constant 3.200000e+01 : f32
    %487 = vector.broadcast %cst_278 : f32 to vector<8x1xf32>
    %488 = arith.divf %486, %487 : vector<8x1xf32>
    %489 = vector.broadcast %488 : vector<8x1xf32> to vector<8x32xf32>
    %490 = arith.subf %480, %489 : vector<8x32xf32>
    %491 = arith.mulf %490, %490 : vector<8x32xf32>
    %cst_279 = arith.constant dense<0.000000e+00> : vector<8xf32>
    %492 = vector.multi_reduction <add>, %491, %cst_279 [1] : vector<8x32xf32> to vector<8xf32>
    %493 = vector.shape_cast %492 : vector<8xf32> to vector<8x1xf32>
    %cst_280 = arith.constant 3.200000e+01 : f32
    %494 = vector.broadcast %cst_280 : f32 to vector<8x1xf32>
    %495 = arith.divf %493, %494 : vector<8x1xf32>
    %cst_281 = arith.constant 9.99999996E-13 : f32
    %496 = vector.broadcast %cst_281 : f32 to vector<8x1xf32>
    %497 = arith.addf %495, %496 : vector<8x1xf32>
    %498 = math.rsqrt %497 : vector<8x1xf32>
    %499 = vector.broadcast %498 : vector<8x1xf32> to vector<8x32xf32>
    %500 = arith.mulf %490, %499 : vector<8x32xf32>
    %501 = vector.broadcast %482 : vector<1x32xf32> to vector<8x32xf32>
    %502 = arith.mulf %500, %501 : vector<8x32xf32>
    %503 = vector.broadcast %484 : vector<1x32xf32> to vector<8x32xf32>
    %504 = arith.addf %502, %503 : vector<8x32xf32>
    %c0_282 = arith.constant 0 : index
    %c0_283 = arith.constant 0 : index
    %c0_284 = arith.constant 0 : index
    %505 = vector.load %arg13[%c0_282, %c0_283, %c0_284] : memref<1x8x32xf32, #tpu.memory_space<vmem>>, vector<1x8x32xf32>
    %506 = vector.shape_cast %505 : vector<1x8x32xf32> to vector<8x32xf32>
    %507 = vector.shape_cast %504 : vector<8x32xf32> to vector<1x8x32xf32>
    tpu.vector_store %arg13[%c0_282, %c0_283, %c0_284], %507 {strides = array<i32>} : memref<1x8x32xf32, #tpu.memory_space<vmem>>, vector<1x8x32xf32>,
    return
  }
  func.func @transform_0(%arg0: i32, %arg1: i32) -> (i32, i32, i32) {
    %c0_i32 = arith.constant 0 : i32
    %c0_i32_0 = arith.constant 0 : i32
    return %arg0, %arg1, %c0_i32 : i32, i32, i32
  }
  func.func @transform_1(%arg0: i32, %arg1: i32) -> (i32, i32, i32) {
    %c0_i32 = arith.constant 0 : i32
    %c0_i32_0 = arith.constant 0 : i32
    %c0_i32_1 = arith.constant 0 : i32
    return %arg0, %c0_i32, %c0_i32_0 : i32, i32, i32
  }
  func.func @transform_2(%arg0: i32, %arg1: i32) -> (i32, i32, i32) {
    %c0_i32 = arith.constant 0 : i32
    %c0_i32_0 = arith.constant 0 : i32
    %c0_i32_1 = arith.constant 0 : i32
    return %arg0, %c0_i32, %c0_i32_0 : i32, i32, i32
  }
  func.func @transform_3(%arg0: i32, %arg1: i32) -> (i32, i32, i32) {
    %c0_i32 = arith.constant 0 : i32
    %c0_i32_0 = arith.constant 0 : i32
    %c0_i32_1 = arith.constant 0 : i32
    return %arg0, %c0_i32, %c0_i32_0 : i32, i32, i32
  }
  func.func @transform_4(%arg0: i32, %arg1: i32) -> (i32, i32, i32) {
    %c0_i32 = arith.constant 0 : i32
    %c0_i32_0 = arith.constant 0 : i32
    %c0_i32_1 = arith.constant 0 : i32
    %c0_i32_2 = arith.constant 0 : i32
    return %c0_i32, %c0_i32_0, %c0_i32_1 : i32, i32, i32
  }
  func.func @transform_5(%arg0: i32, %arg1: i32) -> (i32, i32, i32) {
    %c0_i32 = arith.constant 0 : i32
    %c0_i32_0 = arith.constant 0 : i32
    %c0_i32_1 = arith.constant 0 : i32
    %c0_i32_2 = arith.constant 0 : i32
    return %c0_i32, %c0_i32_0, %c0_i32_1 : i32, i32, i32
  }
  func.func @transform_6(%arg0: i32, %arg1: i32) -> (i32, i32, i32) {
    %c0_i32 = arith.constant 0 : i32
    %c0_i32_0 = arith.constant 0 : i32
    %c0_i32_1 = arith.constant 0 : i32
    %c0_i32_2 = arith.constant 0 : i32
    return %c0_i32, %c0_i32_0, %c0_i32_1 : i32, i32, i32
  }
  func.func @transform_7(%arg0: i32, %arg1: i32) -> (i32, i32, i32) {
    %c0_i32 = arith.constant 0 : i32
    %c0_i32_0 = arith.constant 0 : i32
    %c0_i32_1 = arith.constant 0 : i32
    %c0_i32_2 = arith.constant 0 : i32
    return %c0_i32, %c0_i32_0, %c0_i32_1 : i32, i32, i32
  }
  func.func @transform_8(%arg0: i32, %arg1: i32) -> (i32, i32) {
    %c0_i32 = arith.constant 0 : i32
    %c0_i32_0 = arith.constant 0 : i32
    %c0_i32_1 = arith.constant 0 : i32
    return %c0_i32, %c0_i32_0 : i32, i32
  }
  func.func @transform_9(%arg0: i32, %arg1: i32) -> (i32, i32) {
    %c0_i32 = arith.constant 0 : i32
    %c0_i32_0 = arith.constant 0 : i32
    %c0_i32_1 = arith.constant 0 : i32
    return %c0_i32, %c0_i32_0 : i32, i32
  }
  func.func @transform_10(%arg0: i32, %arg1: i32) -> (i32, i32) {
    %c0_i32 = arith.constant 0 : i32
    %c0_i32_0 = arith.constant 0 : i32
    %c0_i32_1 = arith.constant 0 : i32
    return %c0_i32, %c0_i32_0 : i32, i32
  }
  func.func @transform_11(%arg0: i32, %arg1: i32) -> (i32, i32, i32) {
    %c0_i32 = arith.constant 0 : i32
    %c0_i32_0 = arith.constant 0 : i32
    return %arg0, %arg1, %c0_i32 : i32, i32, i32
  }
}

</mosaic_0001>

<bundles_post_ra>
// kernel: tpu_custom_call.1
= control target key start
LH: loop header
LB: loop body
LE: loop exit
PB: predicated region body
PF: predicated region fallthrough
CT: control target
= control target key end

     0   :  { %s5489_s0 = inlined_call_operand.vmem [shape: f32[2,16,32], index: 0, kind: input, shape index: {}]   ;;  %s5490_s1 = inlined_call_operand.vmem [shape: f32[2,16,32], index: 1, kind: input, shape index: {}]   ;;  %s5491_s2 = inlined_call_operand.hbm [shape: f32[2,8,32], index: 2, kind: input, shape index: {}]   ;;  %s5492_s3 = inlined_call_operand.vmem [shape: f32[2,1,8], index: 3, kind: input, shape index: {}]   ;;  %s5493_s4 = inlined_call_operand.hbm [shape: bf16[24,8,32], index: 4, kind: input, shape index: {}]   ;;  %s5494_s5 = inlined_call_operand.vmem [shape: f32[24,1,8], index: 5, kind: input, shape index: {}]   ;;  %s5495_s6 = inlined_call_operand.vmem [shape: bf16[8,8,32], index: 6, kind: input, shape index: {}]   ;;  %s5496_s7 = inlined_call_operand.hbm [shape: f32[9,1,32], index: 7, kind: input, shape index: {}]   ;;  %s5497_s8 = inlined_call_operand.hbm [shape: bf16[32,64], index: 8, kind: input, shape index: {}]   ;;  %s5498_s9 = inlined_call_operand.hbm [shape: f32[1,64], index: 9, kind: input, shape index: {}]   ;;  %s5499_s10 = inlined_call_operand.vmem [shape: bf16[64,32], index: 10, kind: input, shape index: {}]   ;;  %s5500_s11 = inlined_call_operand.hbm [shape: f32[2,16,32], index: 11, kind: output, shape index: {}]  }
   0x1   :  { %5514 = sst [smem:[#allocation19_spill]] %s5489_s0 }
   0x2   :  { %5515 = sst [smem:[#allocation20_spill]] %s5490_s1 }
   0x3   :  { %5516 = sst [smem:[#allocation21_spill]] %s5491_s2 }
   0x4   :  { %5517 = sst [smem:[#allocation22_spill]] %s5492_s3 }
   0x5   :  { %5518 = sst [smem:[#allocation23_spill]] %s5493_s4 }
   0x6   :  { %5519 = sst [smem:[#allocation24_spill]] %s5494_s5 }
   0x7   :  { %5520 = sst [smem:[#allocation25_spill]] %s5495_s6 }
   0x8   :  { %5521 = sst [smem:[#allocation26_spill]] %s5496_s7 }
   0x9   :  { %5522 = sst [smem:[#allocation27_spill]] %s5497_s8 }
   0xa   :  { %5523 = sst [smem:[#allocation28_spill]] %s5498_s9 }
   0xb   :  { %5524 = sst [smem:[#allocation29_spill]] %s5499_s10 }
   0xc   :  { %5525 = sst [smem:[#allocation30_spill]] %s5500_s11 }
   0xd   :  { %16 = vsyncpa [#allocation3], 0 }
   0xe   :  { %18 = vsyncpa [#allocation3 + $0x1], 0 }
   0xf   :  { %19 = vsyncpa [#allocation6], 0 }
  0x10   :  { %20 = vsyncpa [#allocation9], 0 }
  0x11   :  { %21 = vsyncpa [#allocation4], 0 }
  0x12   :  { %23 = vsyncpa [#allocation4 + $0x1], 0  ;;  %s4657_s17 = smov 0   ;;  %s4659_s18 = smov 0  }
  0x13   :  { %s4661_s19 = smov 0   ;;  %s4663_s20 = smov 0  }
  0x14   :  { %s4665_s21 = smov 0   ;;  %s4667_s22 = smov 0  }
  0x15   :  { %s4669_s23 = smov 0   ;;  %s4671_s24 = smov 0  }
  0x16   :  { %s4673_s25 = smov 0   ;;  %s4675_s26 = smov 0  }
  0x17   :  { %s4677_s27 = smov 0  }
  0x18 LB: > { %5526 = sst [smem:[#allocation16_spill]] %s4567_s23  ;;  %s3557_s28 = sadd.s32 4294967295, %s4583_s27   ;;  %s4583_s27 = sphi %s4677_s27, %s29_s27   ;;  %s4579_s26 = sphi %s4675_s26, %s5572_s26   ;;  %s4575_s25 = sphi %s4673_s25, %s5571_s25   ;;  %s4571_s24 = sphi %s4671_s24, %s5570_s24   ;;  %s4567_s23 = sphi %s4669_s23, %s5569_s23   ;;  %s4563_s22 = sphi %s4667_s22, %s5568_s22   ;;  %s4559_s21 = sphi %s4665_s21, %s5567_s21   ;;  %s4555_s20 = sphi %s4663_s20, %s5566_s20   ;;  %s4551_s19 = sphi %s4661_s19, %s5565_s19   ;;  %s4547_s18 = sphi %s4659_s18, %s5564_s18   ;;  %s4543_s17 = sphi %s4657_s17, %s5563_s17  }
  0x19   : > { %5527 = sst [smem:[#allocation17_spill]] %s4571_s24  ;;  %p3559_p0 = scmp.ge.s32.totalorder %s4583_s27, 1 }
  0x1a   : > { %p4714_p1 = scmp.eq.s32.totalorder %s3557_s28, 0  ;;  %p4718_p2 = scmp.eq.s32.totalorder %s3557_s28, 3 }
  0x1b   : > { %p327_p3 = scmp.lt.s32.totalorder %s4583_s27, 5  ;;  %s4585_s13 = smov [#allocation5]  }
  0x1c   : > { %s5528_s29 = scalar_select %p4714_p1, 1, 0 }
  0x1d   : > { %s5529_s30 = scalar_select %p4718_p2, 1, 0 }
  0x1e   : > { %p4723_p4 = pnand %p3559_p0, %p327_p3  ;;  %s339_s14 = sshll.u32 %s4585_s13, 4  ;;  %s4727_s14 = int_to_ptr.vmem [resolvable:$true] %s339_s14 }
  0x1f   : > { %s4586_s16 = smov [#allocation8]   ;;  %s4587_s11 = smov [#allocation7]  }
  0x20   : > { %s5530_s12 = scalar_select %p4723_p4, 1, 0 }
  0x21   : > { %p4138_p5 = pneg %p4723_p4  ;;  %s371_s28 = sshll.u32 %s4586_s16, 4  ;;  %s4737_s28 = int_to_ptr.vmem [resolvable:$true] %s371_s28 }
  0x22   : > { %5531 = sst [smem:[#allocation18_spill]] %s5530_s12  ;;  %s358_s10 = sshll.u32 %s4587_s11, 4  ;;  %s4739_s10 = int_to_ptr.vmem [resolvable:$true] %s358_s10 }
  0x23   : > { %p4733_p6 = pnand %p4138_p5, %p4714_p1  ;;  %s5533_s4 = sld [smem:[#allocation23_spill]] }
  0x25   : > { %p4749_p8 = pneg %p4733_p6 }
  0x29   : > { %s4311_s6 = scalar_lea.hbm %s5533_s4, 1536 }
  0x2a   : > { %p4312_p7 = scmp.ne.s32.totalorder %s5533_s4, %s4311_s6  ;;  %p4318_p11 = scmp.lt.u32.totalorder %s4311_s6, %s5533_s4 }
  0x2c   : > { %p4314_p9 = pnand %p4749_p8, %p4312_p7 }
  0x2e   : > { %p4315_p10 = pneg %p4314_p9 }
  0x30   : > { %p4320_p12 = pnand %p4318_p11, %p4315_p10 }
  0x32   : > { %4323 = shalt.err (!%p4320_p12)
}
  0x33   : > { %s4324_s0 = scalar_lea.vmem %s4727_s14, 1536  ;;  %p4332_p5 = scmp.lt.s32.totalorder %s4727_s14, %s4727_s14 }
  0x34   : > { %p4325_p13 = scmp.ne.s32.totalorder %s4727_s14, %s4324_s0  ;;  %p4333_p4 = scmp.lt.s32.totalorder %s4324_s0, %s4324_s0 }
  0x36   : > { %p4327_p0 = pnand %p4325_p13, %p4749_p8  ;;  %p4334_p7 = por %p4333_p4, %p4332_p5 }
  0x38   : > { %p4328_p3 = pneg %p4327_p0 }
  0x3a   : > { %p4335_p9 = pnand %p4334_p7, %p4328_p3 }
  0x3c   : > { %4338 = shalt.err (!%p4335_p9)
}
  0x3d   : > { %s4588_s3 = smov 64   ;;  %s4589_s5 = smov 4  }
  0x3e   : > { %4141 = dma.hbm_to_vmem [thread:$0]  (!%p4733_p6), %s5533_s4, 1536, %s4727_s14, [#allocation6], %s4588_s3, %s4588_s3, %s4589_s5  }
  0x3f   : > { %s5535_s8 = sld [smem:[#allocation27_spill]] }
  0x45   : > { %s4339_s23 = scalar_lea.hbm %s5535_s8, 256 }
  0x46   : > { %p4340_p4 = scmp.ne.s32.totalorder %s5535_s8, %s4339_s23  ;;  %p4346_p12 = scmp.lt.u32.totalorder %s4339_s23, %s5535_s8 }
  0x48   : > { %p4342_p10 = pnand %p4340_p4, %p4749_p8 }
  0x4a   : > { %p4343_p11 = pneg %p4342_p10 }
  0x4c   : > { %p4348_p13 = pnand %p4346_p12, %p4343_p11 }
  0x4e   : > { %4351 = shalt.err (!%p4348_p13)
}
  0x4f   : > { %s4352_s14 = scalar_lea.vmem %s4737_s28, 256  ;;  %p4360_p7 = scmp.lt.s32.totalorder %s4737_s28, %s4737_s28 }
  0x50   : > { %p4353_p0 = scmp.ne.s32.totalorder %s4737_s28, %s4352_s14  ;;  %p4361_p9 = scmp.lt.s32.totalorder %s4352_s14, %s4352_s14 }
  0x52   : > { %p4355_p3 = pnand %p4353_p0, %p4749_p8  ;;  %p4362_p4 = por %p4361_p9, %p4360_p7 }
  0x54   : > { %p4356_p5 = pneg %p4355_p3 }
  0x56   : > { %p4363_p10 = pnand %p4362_p4, %p4356_p5 }
  0x58   : > { %4366 = shalt.err (!%p4363_p10)
}
  0x59   : > { %4147 = dma.hbm_to_vmem [thread:$0]  (!%p4733_p6), %s5535_s8, 256, %s4737_s28, [#allocation9], %s4588_s3, %s4588_s3, %s4589_s5  }
  0x5a   : > { %s5536_s7 = sld [smem:[#allocation26_spill]] }
  0x60   : > { %s4367_s6 = scalar_lea.hbm %s5536_s7, 144 }
  0x61   : > { %p4368_p11 = scmp.ne.s32.totalorder %s5536_s7, %s4367_s6  ;;  %p4374_p0 = scmp.lt.u32.totalorder %s4367_s6, %s5536_s7 }
  0x63   : > { %p4370_p12 = pnand %p4368_p11, %p4749_p8 }
  0x65   : > { %p4371_p13 = pneg %p4370_p12 }
  0x67   : > { %p4376_p3 = pnand %p4374_p0, %p4371_p13 }
  0x69   : > { %4379 = shalt.err (!%p4376_p3)
}
  0x6a   : > { %s4380_s28 = scalar_lea.vmem %s4739_s10, 144  ;;  %s4387_s3 = scalar_lea.vmem %s4739_s10, 160 }
  0x6b   : > { %p4381_p5 = scmp.ne.s32.totalorder %s4739_s10, %s4380_s28  ;;  %p4388_p4 = scmp.lt.s32.totalorder %s4739_s10, %s4739_s10 }
  0x6c   : > { %p4389_p10 = scmp.lt.s32.totalorder %s4387_s3, %s4380_s28 }
  0x6d   : > { %p4383_p7 = pnand %p4381_p5, %p4749_p8 }
  0x6e   : > { %p4390_p11 = por %p4389_p10, %p4388_p4 }
  0x6f   : > { %p4384_p9 = pneg %p4383_p7 }
  0x71   : > { %p4391_p12 = pnand %p4390_p11, %p4384_p9 }
  0x73   : > { %4394 = shalt.err (!%p4391_p12)
}
  0x74   : > { %s4590_s5 = smov 16   ;;  %s4591_s14 = smov 1  }
  0x75   : > { %4144 = dma.hbm_to_vmem [thread:$0]  (!%p4733_p6), %s5536_s7, 144, %s4739_s10, [#allocation6], %s4590_s5, %s4590_s5, %s4591_s14  }
  0x76   : > { %s4592_s24 = smov [#allocation10]   ;;  %s5537_s9 = sld [smem:[#allocation28_spill]] }
  0x77   : > { %s385_s12 = sshll.u32 %s4592_s24, 4  ;;  %s386_s12 = int_to_ptr.vmem [resolvable:$true] %s385_s12 }
  0x7c   : > { %s4395_s11 = scalar_lea.hbm %s5537_s9, 16 }
  0x7d   : > { %p4396_p13 = scmp.ne.s32.totalorder %s5537_s9, %s4395_s11  ;;  %p4402_p5 = scmp.lt.u32.totalorder %s4395_s11, %s5537_s9 }
  0x7f   : > { %p4398_p0 = pnand %p4396_p13, %p4749_p8 }
  0x81   : > { %p4399_p3 = pneg %p4398_p0 }
  0x83   : > { %p4404_p7 = pnand %p4402_p5, %p4399_p3 }
  0x85   : > { %4407 = shalt.err (!%p4404_p7)
}
  0x86   : > { %s4408_s10 = scalar_lea.vmem %s386_s12, 16  ;;  %s4415_s5 = scalar_lea.vmem %s386_s12, 32 }
  0x87   : > { %p4409_p9 = scmp.ne.s32.totalorder %s386_s12, %s4408_s10  ;;  %p4416_p11 = scmp.lt.s32.totalorder %s386_s12, %s386_s12 }
  0x88   : > { %p4417_p12 = scmp.lt.s32.totalorder %s4415_s5, %s4408_s10 }
  0x89   : > { %p4411_p4 = pnand %p4409_p9, %p4749_p8 }
  0x8a   : > { %p4418_p2 = por %p4417_p12, %p4416_p11 }
  0x8b   : > { %p4412_p10 = pneg %p4411_p4 }
  0x8d   : > { %p4419_p1 = pnand %p4418_p2, %p4412_p10 }
  0x8f   : > { %4422 = shalt.err (!%p4419_p1)
}
  0x90   : > { %4150 = dma.hbm_to_vmem [thread:$0]  (!%p4733_p6), %s5537_s9, 16, %s386_s12, [#allocation9]  }
  0x91   : > { %s3558_s1 = sadd.s32 4294967294, %s4583_s27   ;;  %s38_s15 = sadd.s32 1, %s4575_s25 }
  0x92   : > { %s41_s23 = sadd.s32 1, %s4579_s26  ;;  %p39_p1 = scmp.ge.s32.totalorder %s38_s15, 2 }
  0x93   : > { %s102_s24 = sadd.s32 1, %s4563_s22  ;;  %p109_p2 = scmp.ne.s32.totalorder %s4563_s22, %s4559_s21 }
  0x94   : > { %p110_p8 = scmp.eq.s32.totalorder %s4583_s27, 0  ;;  %s5574_s15 = smov (%p39_p1, %s38_s15), 0 }
  0x95   : > { %s5576_s23 = smov (!%p39_p1, %s41_s23), %s4579_s26  ;;  %p115_p6 = scmp.ne.s32.totalorder %s4559_s21, %s4555_s20 }
  0x96   : > { %p4845_p13 = por %p110_p8, %p109_p2  ;;  %p43_p0 = scmp.ge.s32.totalorder %s5576_s23, 2 }
  0x97   : > { %s299_s6 = ssub.s32 %s4575_s25, %s5574_s15  ;;  %p5539_p3 = scmp.ne.s32.totalorder %s5528_s29, 0 }
  0x98   : > { %s303_s11 = sadd.s32 1, %s4551_s19  ;;  %s5578_s23 = smov (%p43_p0, %s5576_s23), 0 }
  0x99   : > { %p4855_p5 = por %p5539_p3, %p115_p6  ;;  %p313_p7 = scmp.ne.s32.totalorder %s4551_s19, %s4547_s18 }
  0x9a   : > { %p319_p9 = scmp.ne.s32.totalorder %s4547_s18, %s4543_s17  ;;  %s99_s16 = ssub.s32 %s4579_s26, %s5578_s23 }
  0x9b   : > { %p320_p4 = scmp.eq.s32.totalorder %s3558_s1, 3  ;;  %p100_p10 = scmp.eq.s32.totalorder %s99_s16, 0 }
  0x9c   : > { %s300_s20 = sor.u32 %s299_s6, %s99_s16  ;;  %p5541_p12 = scmp.ne.s32.totalorder %s5529_s30, 0 }
  0x9d   : > { %p301_p11 = scmp.eq.s32.totalorder %s300_s20, 0  ;;  %p4880_p2 = por %p320_p4, %p319_p9 }
  0x9e   : > { %p4870_p1 = por %p5541_p12, %p313_p7  ;;  %p4163_p8 = scmp.lt.s32.totalorder %s4583_s27, 4 }
  0x9f   : > { %s4875_s28 = scalar_select %p100_p10, %s4563_s22, %s102_s24  }
  0xa0   : > { %s5542_s0 = scalar_select %p4870_p1, 1, 0 }
  0xa1   : > { %s4878_s3 = scalar_select %p301_p11, %s4551_s19, %s303_s11  }
  0xa2   : > { %s5543_s10 = scalar_select %p4880_p2, 1, 0 }
  0xa3   : > { %s418_s5 = sand.u32 1, %s4563_s22   ;;  %s3566_s14 = sshll.u32 %s4579_s26, 7 }
  0xa4   : > { %s3565_s2 = sshll.u32 %s418_s5, 3  ;;  %s5544_s16 = sld [smem:[#allocation21_spill]] }
  0xa5   : > { %s422_s24 = scalar_lea.vmem [#allocation2], %s3565_s2  ;;  %p4894_p6 = pnand %p4163_p8, %p4845_p13 }
  0xa6   : > { %s429_s11 = sshll.u32 %s422_s24, 4  ;;  %s419_s4 = scalar_lea.sflag [#allocation3], %s418_s5  ;;  %s4898_s11 = int_to_ptr.vmem [resolvable:$true] %s429_s11 }
  0xa7   : > { %p4425_p3 = pneg %p4894_p6 }
  0xaa   : > { %s4890_s30 = scalar_lea.hbm %s5544_s16, %s3566_s14  ;;  %s4428_s12 = scalar_lea.hbm %s5544_s16, 256 }
  0xab   : > { %s4423_s7 = scalar_lea.hbm %s4890_s30, 128  ;;  %p4429_p13 = scmp.lt.u32.totalorder %s4890_s30, %s5544_s16 }
  0xac   : > { %p4424_p0 = scmp.ne.s32.totalorder %s4890_s30, %s4423_s7  ;;  %p4430_p4 = scmp.lt.u32.totalorder %s4428_s12, %s4423_s7 }
  0xad   : > { %p4432_p11 = scmp.lt.u32.totalorder %s4423_s7, %s4890_s30 }
  0xae   : > { %p4426_p7 = pnand %p4425_p3, %p4424_p0  ;;  %p4431_p10 = por %p4430_p4, %p4429_p13 }
  0xb0   : > { %p4427_p9 = pneg %p4426_p7  ;;  %p4433_p12 = por %p4432_p11, %p4431_p10 }
  0xb2   : > { %p4434_p8 = pnand %p4433_p12, %p4427_p9 }
  0xb4   : > { %4437 = shalt.err (!%p4434_p8)
}
  0xb5   : > { %s4438_s5 = scalar_lea.vmem %s4898_s11, 128  ;;  %s4593_s24 = smov [#allocation2]  }
  0xb6   : > { %p4439_p0 = scmp.ne.s32.totalorder %s4898_s11, %s4438_s5  ;;  %s4443_s14 = sshll.u32 %s4593_s24, 4  ;;  %s4444_s14 = int_to_ptr.vmem [resolvable:$false] %s4443_s14 }
  0xb7   : > { %s4445_s2 = scalar_lea.vmem %s4444_s14, 256  ;;  %p4446_p1 = scmp.lt.s32.totalorder %s4898_s11, %s4444_s14 }
  0xb8   : > { %p4441_p7 = pnand %p4439_p0, %p4425_p3  ;;  %p4447_p13 = scmp.lt.s32.totalorder %s4445_s2, %s4438_s5 }
  0xba   : > { %p4442_p2 = pneg %p4441_p7  ;;  %p4448_p4 = por %p4447_p13, %p4446_p1 }
  0xbc   : > { %p4449_p10 = pnand %p4448_p4, %p4442_p2 }
  0xbe   : > { %4452 = shalt.err (!%p4449_p10)
}
  0xbf   : > { %4154 = dma.hbm_to_vmem [thread:$0]  (!%p4894_p6), %s4890_s30, 128, %s4898_s11, %s419_s4  }
  0xc0   : > { %s5546_s7 = sld [smem:[#allocation18_spill]] }
  0xc6   : > { %p5547_p9 = scmp.ne.s32.totalorder %s5546_s7, 0 }
  0xc7   : > { %s446_s12 = sand.u32 (!%p5547_p9), 1, %s4559_s21  }
  0xc8   : > { %444 = sbr.rel (%p5547_p9) target bundleno = 9417 (0x24c9), region = 64  ;;  %s4928_s1 = sshll.u32 (!%p5547_p9), %s446_s12, 3 }
  0xc9   : > { %s447_s6 = scalar_lea.sflag (!%p5547_p9), [#allocation3], %s446_s12 }
  0xcf   : > { %4526 = dma.done.wait (%p4855_p5), %s447_s6, 128  }
  0xd0   : > { %4528 = vsyncadd (%p4855_p5), %s447_s6, 4294967168  ;;  %p5548_p1 = scmp.ne.s32.totalorder %s5528_s29, 0 }
  0xd2   : > { %4530 = dma.done.wait (%p5548_p1), [#allocation6], 1680  }
  0xd3   : > { %4532 = vsyncadd (%p5548_p1), [#allocation6], 4294965616 }
  0xd4   : > { %4534 = dma.done.wait (%p5548_p1), [#allocation9], 272  }
  0xd5   : > { %4536 = vsyncadd (%p5548_p1), [#allocation9], 4294967024  ;;  %s5549_s4 = sld [smem:[#allocation17_spill]]  ;;  %s5550_s30 = sld [smem:[#allocation16_spill]]  ;;  %v4594_v0 = vmov 0.0   ;;  %vm4595_vm0 = vmmov 0   ;;  %v544_v28 = vlaneseq }
  0xd6   : > { %3816 = vmatprep.subr.bf16.mxu1 %v4594_v0  ;;  %3810 = vmatprep.subr.bf16.mxu0 %v4594_v0  ;;  %vm628_vm1 = vcmask 261120   ;;  %s5551_s2 = sld [smem:[#allocation20_spill]]  ;;  %v582_v1 = vld [vmem:[#allocation5 + $0x10] sm:$0xf]  ;;  %v567_v2 = vld [vmem:[#allocation5] sm:$0xf] }
  0xd7   : > { %3818 = vmatprep.mubr.msk.bf16.mxu1 %vm4595_vm0, %v4594_v0  ;;  %3812 = vmatprep.mubr.msk.bf16.mxu0 %vm4595_vm0, %v4594_v0  ;;  %s5552_s9 = sld [smem:[#allocation19_spill]]  ;;  %v686_v3 = vsel %vm628_vm1, %v582_v1, 0  ;;  %v633_v4 = vsel %vm628_vm1, %v567_v2, 0  ;;  %vm781_vm2 = vcmask 64512   ;;  %v598_v26 = vld [vmem:[#allocation5 + $0x20] sm:$0xf] }
  0xd8   : > { %3817 = vmatpush3.bf16.xpose.msra.mxu1 %v686_v3  ;;  %3811 = vmatpush3.bf16.xpose.msra.mxu0 %v633_v4  ;;  %v736_v27 = vsel %vm628_vm1, %v598_v26, 0  ;;  %v5001_v29 = vshrl.u32 %v544_v28, 7  ;;  %v549_v32 = vand.u32 127, %v544_v28  ;;  %vm830_vm4 = vcmask 130048   ;;  %v569_v54 = vld [vmem:[#allocation5 + $0x4] sm:$0xf] }
  0xd9   : > { %3828 = vmatprep.subr.bf16.mxu1 %v4594_v0  ;;  %3822 = vmatprep.subr.bf16.mxu0 %v4594_v0  ;;  %v895_v55 = vsel %vm628_vm1, %v569_v54, 0  ;;  %v584_v58 = vld [vmem:[#allocation5 + $0x14] sm:$0xf]  ;;  %vm1147_vm5 = vcmask 1043456   ;;  %v586_v54 = vld [vmem:[#allocation5 + $0x18] sm:$0xf] }
  0xda   : > { %v944_v61 = vsel %vm628_vm1, %v584_v58, 0  ;;  %s5556_s5 = sld [smem:[#allocation22_spill]]  ;;  %vm3304_vm6 = vcmask 523264   ;;  %p5560_p3 = scmp.ne.s32.totalorder %s5542_s0, 0 }
  0xdb   : > { %p521_p2 = scmp.lt.s32.totalorder %s5549_s4, 1  ;;  %p523_p5 = scmp.lt.s32.totalorder %s5550_s30, 1 }
  0xdc   : > { %s5558_s24 = sld [smem:[#allocation30_spill]] }
  0xdd   : > { %s4950_s13 = scalar_select %p521_p2, %s5549_s4, 1 }
  0xde   : > { %s524_s29 = scalar_select %p523_p5, %s5550_s30, 1 }
  0xdf   : > { %s3705_s11 = sshll.u32 %s4950_s13, 4  ;;  %s3574_s20 = sshll.u32 %s4950_s13, 1 }
  0xe0   : > { %s533_s7 = scalar_lea.vmem %s5551_s2, %s3705_s11  ;;  %s526_s12 = sadd.s32 %s3574_s20, %s524_s29 }
  0xe1   : > { %s3575_s6 = sshll.u32 %s526_s12, 3  ;;  %v539_v5 = vld [vmem:[%s533_s7] sm:$0xff]  ;;  %v540_v6 = vld [vmem:[%s533_s7 + $0x8] sm:$0xff]  ;;  %s3578_s11 = sshll.u32 %s5550_s30, 3 }
  0xe2   : > { %s528_s16 = scalar_lea.vmem %s5552_s9, %s3575_s6  ;;  %v4969_v8 = vpack.c.bf16 %v540_v6, %v539_v5  ;;  %v546_v30 = vstv %s3578_s11  ;;  %s5554_s29 = sld [smem:[#allocation25_spill]] }
  0xe3   : > { %v4965_v7 = vld [vmem:[%s528_s16] sm:$0xff]  ;;  %s5553_s16 = sld [smem:[#allocation24_spill]]  ;;  %v547_v31 = vadd.s32 %v546_v30, %v5001_v29  ;;  %s5555_s6 = scalar_lea.vmem [#allocation2], %s4928_s1 }
  0xe4   : > { %v4973_v9 = vpack.c.bf16 %v4965_v7, %v4965_v7  ;;  %3819 = vmatmul.mubr.msk.bf16.vlgmr.msra.gmra.mrb[0].mxu1 %vm628_vm1, %v4969_v8  ;;  %s536_s14 = scalar_lea.vmem %s5556_s5, %s4950_s13  ;;  %s518_s5 = sand.u32 1, %s4547_s18  }
  0xe5   : > { %3830 = vmatprep.mubr.msk.bf16.mxu1 %vm4595_vm0, %v4594_v0  ;;  %vm550_vm3 = vcmp.gt.s32.totalorder %v549_v32, %v547_v31  ;;  %s3701_s13 = sshll.u32 %s5549_s4, 1  ;;  %s5559_s11 = smov %s5558_s24 }
  0xe6   : > { %3813 = vmatmul.mubr.msk.bf16.vlgmr.msra.gmra.mrb[0].mxu0 %vm628_vm1, %v4973_v9  ;;  %v5005_v34 = vsel %vm550_vm3, -10000.0, %v4594_v0  ;;  %s3393_s2 = sadd.s32 %s5550_s30, %s3701_s13  ;;  %s3382_s4 = scalar_lea.sflag [#allocation4], %s518_s5 }
  0xe7   : > { %3824 = vmatprep.mubr.msk.bf16.mxu0 %vm4595_vm0, %v4594_v0  ;;  %3823 = vmatpush3.bf16.xpose.msra.mxu0 %v736_v27  ;;  %s3702_s7 = sshll.u32 %s3393_s2, 7 }
  0xe8   : > { %3834 = vmatprep.subr.bf16.mxu0 %v4594_v0  ;;  %s5426_s20 = scalar_lea.hbm %s5558_s24, %s3702_s7 }
  0xe9   : > { %v3596_v10 = vld [vmem:[%s5553_s16 + $0x4] ss:$0 sm:$0xff]  ;;  %v3594_v21 = vld [vmem:[%s5553_s16] ss:$0 sm:$0xff]  ;;  %v3598_v48 = vld [vmem:[%s5553_s16 + $0x8] ss:$0 sm:$0xff] }
  0xee   : > { %3825 = vmatmul.mubr.msk.bf16.vlgmr.msra.gmra.mrb[4].mxu0 %vm628_vm1, %v4969_v8 }
  0xef   : > { %3836 = vmatprep.mubr.msk.bf16.mxu0 %vm4595_vm0, %v4594_v0 }
 0x1b7   : > { %v722_v11 = vpop.f32.mrb[0].mxu1 }
 0x1b8   : > { %v3820_v13 = vpop.f32.mrb[1].mxu1  ;;  %v723_v17 = vadd.f32 %v3596_v10, %v722_v11 }
 0x1b9   : > { %v669_v12 = vpop.f32.mrb[0].mxu0  ;;  %v725_v15 = vpop.f32.mrb[2].mxu1 }
 0x1ba   : > { %v3814_v14 = vpop.f32.mrb[1].mxu0  ;;  %v726_v18 = vadd.f32 %v3596_v10, %v725_v15  ;;  %v3821_v19 = vpop.f32.mrb[3].mxu1  ;;  %v670_v23 = vadd.f32 %v3594_v21, %v669_v12  ;;  %v3604_v10 = vld [vmem:[%s5553_s16 + $0x5] ss:$0 sm:$0xff] }
 0x1bb   : > { %v672_v16 = vpop.f32.mrb[2].mxu0 }
 0x1bc   : > { %v3815_v20 = vpop.f32.mrb[3].mxu0  ;;  %v780_v22 = vpack.c.bf16 %v726_v18, %v723_v17  ;;  %v779_v25 = vpack.c.bf16 %v670_v23, %v670_v23  ;;  %v3602_v17 = vld [vmem:[%s5553_s16 + $0x1] ss:$0 sm:$0xff] }
 0x1be   : > { %v786_v24 = vsel %vm781_vm2, %v780_v22, 0  ;;  %v600_v22 = vld [vmem:[#allocation5 + $0x24] sm:$0xf] }
 0x1bf   : > { %3829 = vmatpush3.bf16.xpose.msra.mxu1 %v786_v24  ;;  %v994_v23 = vsel %vm628_vm1, %v600_v22, 0  ;;  %v3612_v22 = vld [vmem:[%s5553_s16 + $0x2] ss:$0 sm:$0xff] }
 0x1c0   : > { %3840 = vmatprep.subr.bf16.mxu1 %v4594_v0 }
 0x1c1   : > { %v772_v41 = vpop.f32.mrb[4].mxu0 }
 0x1c2   : > { %v3826_v42 = vpop.f32.mrb[5].mxu0  ;;  %v773_v49 = vadd.f32 %v3598_v48, %v772_v41 }
 0x1c3   : > { %v775_v50 = vpop.f32.mrb[6].mxu0 }
 0x1c4   : > { %v3827_v51 = vpop.f32.mrb[7].mxu0  ;;  %v776_v52 = vadd.f32 %v3598_v48, %v775_v50  ;;  %v613_v50 = vld [vmem:[%s5554_s29] sm:$0xf] }
 0x1c6   : > { %3831 = vmatmul.mubr.msk.bf16.vlgmr.msra.gmra.mrb[4].mxu1 %vm781_vm2, %v779_v25  ;;  %v843_v53 = vpack.c.bf16 %v776_v52, %v773_v49 }
 0x1c7   : > { %3842 = vmatprep.mubr.msk.bf16.mxu1 %vm4595_vm0, %v4594_v0  ;;  %3841 = vmatpush3.bf16.xpose.msra.mxu1 %v895_v55 }
 0x1c8   : > { %3835 = vmatpush3.bf16.msra.mxu0 %v843_v53  ;;  %3852 = vmatprep.subr.bf16.mxu1 %v4594_v0  ;;  %v1195_v53 = vsel %vm1147_vm5, %v613_v50, 0 }
 0x1c9   : > { %3846 = vmatprep.subr.bf16.mxu0 %v4594_v0 }
 0x1ce   : > { %3843 = vmatmul.mubr.msk.bf16.vlgmr.msra.gmra.mrb[8].mxu1 %vm628_vm1, %v4973_v9 }
 0x1cf   : > { %3854 = vmatprep.mubr.msk.bf16.mxu1 %vm4595_vm0, %v4594_v0  ;;  %3853 = vmatpush3.bf16.xpose.msra.mxu1 %v994_v23 }
 0x1d0   : > { %3864 = vmatprep.subr.bf16.mxu1 %v4594_v0 }
 0x1d6   : > { %3855 = vmatmul.mubr.msk.bf16.vlgmr.msra.gmra.mrb[12].mxu1 %vm628_vm1, %v4969_v8 }
 0x1d7   : > { %3866 = vmatprep.mubr.msk.bf16.mxu1 %vm4595_vm0, %v4594_v0 }
 0x299   : > { %v822_v33 = vpop.f32.mrb[4].mxu1 }
 0x29a   : > { %v828_v35 = vmul.f32 0.35355338, %v822_v33  ;;  %v3832_v36 = vpop.f32.mrb[5].mxu1 }
 0x29b   : > { %v825_v37 = vpop.f32.mrb[6].mxu1 }
 0x29c   : > { %v3833_v38 = vpop.f32.mrb[7].mxu1  ;;  %v829_v39 = vadd.f32 %v828_v35, %v5005_v34 }
 0x29e   : > { %v831_v40 = vsel %vm830_vm4, %v829_v39, -inf }
 0x29f   : > { %832 = vmax.xlane.f32.xlu0 %v831_v40  ;;  %v3606_v40 = vld [vmem:[%s5553_s16 + $0x9] ss:$0 sm:$0xff] }
 0x2a1   : > { %v931_v62 = vpop.f32.mrb[8].mxu1 }
 0x2a2   : > { %v3844_v63 = vpop.f32.mrb[9].mxu1  ;;  %v932_v19 = vadd.f32 %v3602_v17, %v931_v62 }
 0x2a3   : > { %v934_v1 = vpop.f32.mrb[10].mxu1 }
 0x2a4   : > { %v3845_v2 = vpop.f32.mrb[11].mxu1  ;;  %v1037_v21 = vpack.c.bf16 %v932_v19, %v932_v19 }
 0x2a9   : > { %v1030_v32 = vpop.f32.mrb[12].mxu1 }
 0x2aa   : > { %v3856_v33 = vpop.f32.mrb[13].mxu1  ;;  %v1031_v41 = vadd.f32 %v3606_v40, %v1030_v32 }
 0x2ab   : > { %v1033_v42 = vpop.f32.mrb[14].mxu1 }
 0x32c   : > { %v833_v43 = vpop.xlane.xlu0 %832 }
 0x32d   : > { %v834_v44 = vsub.f32 %v829_v39, %v833_v43  ;;  %v3857_v43 = vpop.f32.mrb[15].mxu1 }
 0x32f   : > { %v835_v45 = vmul.f32 1.442695, %v834_v44  ;;  %v1034_v44 = vadd.f32 %v3606_v40, %v1033_v42 }
 0x331   : > { %4273 = vpow2.f32 %v835_v45  ;;  %v1099_v45 = vpack.c.bf16 %v1034_v44, %v1031_v41 }
 0x333   : > { %3865 = vmatpush3.bf16.msra.mxu1 %v1099_v45 }
 0x334   : > { %3876 = vmatprep.subr.bf16.mxu1 %v4594_v0 }
 0x33b   : > { %v4274_v46 = vpop.eup %4273 }
 0x33c   : > { %v837_v47 = vsel %vm830_vm4, %v4274_v46, 0.0 }
 0x33d   : > { %838 = vadd.xlane.f32.xlu0 %v837_v47 }
 0x3ca   : > { %v839_v56 = vpop.xlane.xlu0 %838 }
 0x3cb   : > { %4275 = vrcp.f32 %v839_v56  ;;  %v1293_v56 = vsel %vm628_vm1, %v586_v54, 0 }
 0x3d5   : > { %v4276_v57 = vpop.eup %4275 }
 0x3d6   : > { %v841_v59 = vmul.f32 %v4276_v57, %v4274_v46  ;;  %v3591_v46 = vld [vmem:[%s5554_s29 + $0x4] sm:$0xf]  ;;  %v571_v57 = vld [vmem:[#allocation5 + $0x8] sm:$0xf] }
 0x3d7   : > { %v1149_v47 = vsel %vm1147_vm5, %v3591_v46, 0 }
 0x3d8   : > { %v842_v60 = vpack.c.bf16 %v841_v59, %v841_v59 }
 0x3da   : > { %3837 = vmatmul.mubr.msk.bf16.vlgmr.msra.gmra.mrb[8].mxu0 %vm830_vm4, %v842_v60 }
 0x3db   : > { %3847 = vmatpush3.bf16.xpose.msra.mxu0 %v944_v61  ;;  %3848 = vmatprep.mubr.msk.bf16.mxu0 %vm4595_vm0, %v4594_v0  ;;  %v1244_v61 = vsel %vm628_vm1, %v571_v57, 0 }
 0x3dc   : > { %3858 = vmatprep.subr.bf16.mxu0 %v4594_v0 }
 0x3e2   : > { %3849 = vmatmul.mubr.msk.bf16.vlgmr.msra.gmra.mrb[12].mxu0 %vm628_vm1, %v4969_v8 }
 0x3e3   : > { %3860 = vmatprep.mubr.msk.bf16.mxu0 %vm4595_vm0, %v4594_v0 }
 0x4ad   : > { %v5029_v3 = vpop.f32.mrb[8].mxu0 }
 0x4ae   : > { %v3838_v4 = vpop.f32.mrb[9].mxu0  ;;  %v887_v55 = vpack.c.bf16 %v5029_v3, %v5029_v3 }
 0x4af   : > { %v884_v5 = vpop.f32.mrb[10].mxu0 }
 0x4b0   : > { %v3839_v6 = vpop.f32.mrb[11].mxu0  ;;  %v3614_v5 = vld [vmem:[%s5553_s16 + $0x6] ss:$0 sm:$0xff] }
 0x4b5   : > { %v980_v11 = vpop.f32.mrb[12].mxu0 }
 0x4b6   : > { %v3850_v12 = vpop.f32.mrb[13].mxu0  ;;  %v981_v14 = vadd.f32 %v3604_v10, %v980_v11 }
 0x4b7   : > { %v983_v13 = vpop.f32.mrb[14].mxu0 }
 0x4b8   : > { %v984_v15 = vadd.f32 %v3604_v10, %v983_v13  ;;  %v3851_v16 = vpop.f32.mrb[15].mxu0 }
 0x4ba   : > { %v1038_v18 = vpack.c.bf16 %v984_v15, %v981_v14 }
 0x4bc   : > { %v1043_v20 = vsel %vm781_vm2, %v1038_v18, 0 }
 0x4bd   : > { %3859 = vmatpush3.bf16.xpose.msra.mxu0 %v1043_v20 }
 0x4be   : > { %3870 = vmatprep.subr.bf16.mxu0 %v4594_v0 }
 0x4c4   : > { %3861 = vmatmul.mubr.msk.bf16.vlgmr.msra.gmra.mrb[16].mxu0 %vm781_vm2, %v1037_v21 }
 0x4c5   : > { %3872 = vmatprep.mubr.msk.bf16.mxu0 %vm4595_vm0, %v4594_v0  ;;  %3871 = vmatpush3.bf16.msra.mxu0 %v1149_v47  ;;  %v3616_v47 = vld [vmem:[%s5553_s16 + $0xa] ss:$0 sm:$0xff] }
 0x4c6   : > { %3882 = vmatprep.subr.bf16.mxu0 %v4594_v0 }
 0x597   : > { %v1079_v24 = vpop.f32.mrb[16].mxu0 }
 0x598   : > { %v1085_v25 = vmul.f32 0.35355338, %v1079_v24  ;;  %v3862_v26 = vpop.f32.mrb[17].mxu0 }
 0x599   : > { %v1082_v27 = vpop.f32.mrb[18].mxu0 }
 0x59a   : > { %v3863_v28 = vpop.f32.mrb[19].mxu0  ;;  %v1086_v30 = vadd.f32 %v1085_v25, %v5005_v34 }
 0x59c   : > { %v1087_v31 = vsel %vm830_vm4, %v1086_v30, -inf }
 0x59d   : > { %1088 = vmax.xlane.f32.xlu1 %v1087_v31 }
 0x62a   : > { %v1089_v35 = vpop.xlane.xlu1 %1088 }
 0x62b   : > { %v1090_v36 = vsub.f32 %v1086_v30, %v1089_v35  ;;  %v602_v30 = vld [vmem:[#allocation5 + $0x28] sm:$0xf] }
 0x62c   : > { %v1343_v31 = vsel %vm628_vm1, %v602_v30, 0 }
 0x62d   : > { %v1091_v37 = vmul.f32 1.442695, %v1090_v36 }
 0x62f   : > { %4277 = vpow2.f32 %v1091_v37 }
 0x639   : > { %v4278_v38 = vpop.eup %4277 }
 0x63a   : > { %v1093_v39 = vsel %vm830_vm4, %v4278_v38, 0.0 }
 0x63b   : > { %1094 = vadd.xlane.f32.xlu1 %v1093_v39 }
 0x6c8   : > { %v1095_v48 = vpop.xlane.xlu1 %1094 }
 0x6c9   : > { %4279 = vrcp.f32 %v1095_v48 }
 0x6d3   : > { %v4280_v49 = vpop.eup %4279 }
 0x6d4   : > { %v1097_v51 = vmul.f32 %v4280_v49, %v4278_v38 }
 0x6d6   : > { %v1098_v52 = vpack.c.bf16 %v1097_v51, %v1097_v51 }
 0x6d8   : > { %3867 = vmatmul.mubr.msk.bf16.vlgmr.msra.gmra.mrb[16].mxu1 %vm830_vm4, %v1098_v52 }
 0x6d9   : > { %3877 = vmatpush3.bf16.msra.mxu1 %v1195_v53  ;;  %3878 = vmatprep.mubr.msk.bf16.mxu1 %vm4595_vm0, %v4594_v0  ;;  %v3592_v53 = vld [vmem:[%s5554_s29 + $0x8] sm:$0xf] }
 0x6da   : > { %3888 = vmatprep.subr.bf16.mxu1 %v4594_v0  ;;  %v1497_v54 = vsel %vm1147_vm5, %v3592_v53, 0 }
 0x6e0   : > { %3879 = vmatmul.mubr.msk.bf16.vlgmr.msra.gmra.mrb[20].mxu1 %vm781_vm2, %v887_v55 }
 0x6e1   : > { %3890 = vmatprep.mubr.msk.bf16.mxu1 %vm4595_vm0, %v4594_v0 }
 0x6e2   : > { %3889 = vmatpush3.bf16.xpose.msra.mxu1 %v1293_v56 }
 0x6e3   : > { %3900 = vmatprep.subr.bf16.mxu1 %v4594_v0 }
 0x6e9   : > { %3891 = vmatmul.mubr.msk.bf16.vlgmr.msra.gmra.mrb[24].mxu1 %vm628_vm1, %v4969_v8 }
 0x6ea   : > { %3902 = vmatprep.mubr.msk.bf16.mxu1 %vm4595_vm0, %v4594_v0 }
 0x7ab   : > { %v1137_v58 = vpop.f32.mrb[16].mxu1 }
 0x7ac   : > { %v1143_v59 = vpack.c.bf16 %v1137_v58, %v1137_v58  ;;  %v3868_v60 = vpop.f32.mrb[17].mxu1 }
 0x7ad   : > { %v1140_v62 = vpop.f32.mrb[18].mxu1 }
 0x7ae   : > { %v3869_v63 = vpop.f32.mrb[19].mxu1  ;;  %3873 = vmatmul.mubr.msk.bf16.vlgmr.msra.gmra.mrb[20].mxu0 %vm781_vm2, %v1143_v59  ;;  %v573_v59 = vld [vmem:[#allocation5 + $0xc] sm:$0xf] }
 0x7af   : > { %3883 = vmatpush3.bf16.xpose.msra.mxu0 %v1244_v61  ;;  %3884 = vmatprep.mubr.msk.bf16.mxu0 %vm4595_vm0, %v4594_v0  ;;  %v1547_v60 = vsel %vm628_vm1, %v573_v59, 0  ;;  %v588_v61 = vld [vmem:[#allocation5 + $0x1c] sm:$0xf] }
 0x7b0   : > { %3894 = vmatprep.subr.bf16.mxu0 %v4594_v0 }
 0x7b3   : > { %v1231_v1 = vpop.f32.mrb[20].mxu1 }
 0x7b4   : > { %v3880_v2 = vpop.f32.mrb[21].mxu1 }
 0x7b5   : > { %v1234_v3 = vpop.f32.mrb[22].mxu1  ;;  %v1596_v2 = vsel %vm628_vm1, %v588_v61, 0  ;;  %v3630_v61 = vld [vmem:[#allocation7] ss:$0 sm:$0xff] }
 0x7b6   : > { %v3881_v4 = vpop.f32.mrb[23].mxu1  ;;  %3885 = vmatmul.mubr.msk.bf16.vlgmr.msra.gmra.mrb[24].mxu0 %vm628_vm1, %v4973_v9 }
 0x7b7   : > { %3896 = vmatprep.mubr.msk.bf16.mxu0 %vm4595_vm0, %v4594_v0  ;;  %3895 = vmatpush3.bf16.xpose.msra.mxu0 %v1343_v31 }
 0x7b8   : > { %3906 = vmatprep.subr.bf16.mxu0 %v4594_v0 }
 0x7bc   : > { %v1329_v6 = vpop.f32.mrb[24].mxu1 }
 0x7bd   : > { %v1330_v10 = vadd.f32 %v3614_v5, %v1329_v6  ;;  %v3892_v11 = vpop.f32.mrb[25].mxu1 }
 0x7be   : > { %v1332_v12 = vpop.f32.mrb[26].mxu1  ;;  %3897 = vmatmul.mubr.msk.bf16.vlgmr.msra.gmra.mrb[28].mxu0 %vm628_vm1, %v4969_v8 }
 0x7bf   : > { %v1333_v13 = vadd.f32 %v3614_v5, %v1332_v12  ;;  %v3893_v14 = vpop.f32.mrb[27].mxu1  ;;  %3908 = vmatprep.mubr.msk.bf16.mxu0 %vm4595_vm0, %v4594_v0 }
 0x7c1   : > { %v1387_v15 = vpack.c.bf16 %v1333_v13, %v1330_v10 }
 0x7c3   : > { %v1392_v16 = vsel %vm781_vm2, %v1387_v15, 0 }
 0x7c4   : > { %3901 = vmatpush3.bf16.xpose.msra.mxu1 %v1392_v16  ;;  %v3623_v16 = vld [vmem:[%s5553_s16 + $0x7] ss:$0 sm:$0xff] }
 0x7c5   : > { %3912 = vmatprep.subr.bf16.mxu1 %v4594_v0 }
 0x881   : > { %v1185_v17 = vpop.f32.mrb[20].mxu0 }
 0x882   : > { %v5093_v18 = vadd.f32 %v1231_v1, %v1185_v17  ;;  %v3874_v19 = vpop.f32.mrb[21].mxu0 }
 0x883   : > { %v1188_v20 = vpop.f32.mrb[22].mxu0 }
 0x884   : > { %v3875_v21 = vpop.f32.mrb[23].mxu0 }
 0x889   : > { %v1280_v23 = vpop.f32.mrb[24].mxu0 }
 0x88a   : > { %v1281_v24 = vadd.f32 %v3612_v22, %v1280_v23  ;;  %v3886_v25 = vpop.f32.mrb[25].mxu0 }
 0x88b   : > { %v1283_v26 = vpop.f32.mrb[26].mxu0 }
 0x88c   : > { %v1386_v27 = vpack.c.bf16 %v1281_v24, %v1281_v24  ;;  %v3887_v28 = vpop.f32.mrb[27].mxu0  ;;  %v3621_v24 = vld [vmem:[%s5553_s16 + $0x3] ss:$0 sm:$0xff] }
 0x88d   : > { %v604_v28 = vld [vmem:[#allocation5 + $0x2c] sm:$0xf] }
 0x88e   : > { %3903 = vmatmul.mubr.msk.bf16.vlgmr.msra.gmra.mrb[28].mxu1 %vm781_vm2, %v1386_v27  ;;  %v1646_v30 = vsel %vm628_vm1, %v604_v28, 0 }
 0x88f   : > { %3914 = vmatprep.mubr.msk.bf16.mxu1 %vm4595_vm0, %v4594_v0  ;;  %3913 = vmatpush3.bf16.msra.mxu1 %v1497_v54 }
 0x890   : > { %3924 = vmatprep.subr.bf16.mxu1 %v4594_v0 }
 0x891   : > { %v1379_v40 = vpop.f32.mrb[28].mxu0 }
 0x892   : > { %v3898_v41 = vpop.f32.mrb[29].mxu0  ;;  %v1380_v48 = vadd.f32 %v3616_v47, %v1379_v40 }
 0x893   : > { %v1382_v49 = vpop.f32.mrb[30].mxu0 }
 0x894   : > { %v3899_v50 = vpop.f32.mrb[31].mxu0  ;;  %v1383_v51 = vadd.f32 %v3616_v47, %v1382_v49 }
 0x895   : > { %v3593_v50 = vld [vmem:[%s5554_s29 + $0xc] sm:$0xf] }
 0x896   : > { %v1448_v52 = vpack.c.bf16 %v1383_v51, %v1380_v48  ;;  %v1800_v51 = vsel %vm1147_vm5, %v3593_v50, 0 }
 0x898   : > { %3907 = vmatpush3.bf16.msra.mxu0 %v1448_v52 }
 0x899   : > { %3918 = vmatprep.subr.bf16.mxu0 %v4594_v0 }
 0x961   : > { %v1428_v32 = vpop.f32.mrb[28].mxu1 }
 0x962   : > { %v1434_v33 = vmul.f32 0.35355338, %v1428_v32  ;;  %v3904_v35 = vpop.f32.mrb[29].mxu1 }
 0x963   : > { %v1431_v36 = vpop.f32.mrb[30].mxu1 }
 0x964   : > { %v3905_v37 = vpop.f32.mrb[31].mxu1  ;;  %v1435_v38 = vadd.f32 %v1434_v33, %v5005_v34 }
 0x966   : > { %v1436_v39 = vsel %vm830_vm4, %v1435_v38, -inf }
 0x967   : > { %1437 = vmax.xlane.f32.xlu0 %v1436_v39 }
 0x9f4   : > { %v1438_v42 = vpop.xlane.xlu0 %1437 }
 0x9f5   : > { %v1439_v43 = vsub.f32 %v1435_v38, %v1438_v42 }
 0x9f7   : > { %v1440_v44 = vmul.f32 1.442695, %v1439_v43 }
 0x9f9   : > { %4281 = vpow2.f32 %v1440_v44 }
 0xa03   : > { %v4282_v45 = vpop.eup %4281 }
 0xa04   : > { %v1442_v46 = vsel %vm830_vm4, %v4282_v45, 0.0 }
 0xa05   : > { %1443 = vadd.xlane.f32.xlu1 %v1442_v46 }
 0xa92   : > { %v1444_v55 = vpop.xlane.xlu1 %1443 }
 0xa93   : > { %4283 = vrcp.f32 %v1444_v55 }
 0xa9d   : > { %v4284_v56 = vpop.eup %4283 }
 0xa9e   : > { %v1446_v57 = vmul.f32 %v4284_v56, %v4282_v45  ;;  %v3625_v45 = vld [vmem:[%s5553_s16 + $0xb] ss:$0 sm:$0xff] }
 0xaa0   : > { %v1447_v58 = vpack.c.bf16 %v1446_v57, %v1446_v57 }
 0xaa2   : > { %3909 = vmatmul.mubr.msk.bf16.vlgmr.msra.gmra.mrb[32].mxu0 %vm830_vm4, %v1447_v58 }
 0xaa3   : > { %3920 = vmatprep.mubr.msk.bf16.mxu0 %vm4595_vm0, %v4594_v0  ;;  %3919 = vmatpush3.bf16.xpose.msra.mxu0 %v1547_v60 }
 0xaa4   : > { %3930 = vmatprep.subr.bf16.mxu0 %v4594_v0 }
 0xaaa   : > { %3921 = vmatmul.mubr.msk.bf16.vlgmr.msra.gmra.mrb[36].mxu0 %vm628_vm1, %v4973_v9 }
 0xaab   : > { %3932 = vmatprep.mubr.msk.bf16.mxu0 %vm4595_vm0, %v4594_v0  ;;  %3931 = vmatpush3.bf16.xpose.msra.mxu0 %v1646_v30  ;;  %v3651_v30 = vld [vmem:[%s5553_s16 + $0x10] ss:$0 sm:$0xff] }
 0xaac   : > { %3942 = vmatprep.subr.bf16.mxu0 %v4594_v0 }
 0xab2   : > { %3933 = vmatmul.mubr.msk.bf16.vlgmr.msra.gmra.mrb[40].mxu0 %vm628_vm1, %v4969_v8 }
 0xab3   : > { %3944 = vmatprep.mubr.msk.bf16.mxu0 %vm4595_vm0, %v4594_v0 }
 0xb75   : > { %v1486_v62 = vpop.f32.mrb[32].mxu0 }
 0xb76   : > { %v1492_v63 = vpack.c.bf16 %v1486_v62, %v1486_v62  ;;  %v3910_v1 = vpop.f32.mrb[33].mxu0 }
 0xb77   : > { %v1489_v3 = vpop.f32.mrb[34].mxu0 }
 0xb78   : > { %v3911_v4 = vpop.f32.mrb[35].mxu0  ;;  %3915 = vmatmul.mubr.msk.bf16.vlgmr.msra.gmra.mrb[32].mxu1 %vm781_vm2, %v1492_v63 }
 0xb79   : > { %3925 = vmatpush3.bf16.xpose.msra.mxu1 %v1596_v2  ;;  %3926 = vmatprep.mubr.msk.bf16.mxu1 %vm4595_vm0, %v4594_v0 }
 0xb7a   : > { %3936 = vmatprep.subr.bf16.mxu1 %v4594_v0 }
 0xb7d   : > { %v1583_v9 = vpop.f32.mrb[36].mxu0 }
 0xb7e   : > { %v3922_v5 = vpop.f32.mrb[37].mxu0 }
 0xb7f   : > { %v1586_v6 = vpop.f32.mrb[38].mxu0 }
 0xb80   : > { %3927 = vmatmul.mubr.msk.bf16.vlgmr.msra.gmra.mrb[36].mxu1 %vm628_vm1, %v4969_v8  ;;  %v3923_v10 = vpop.f32.mrb[39].mxu0 }
 0xb81   : > { %3938 = vmatprep.mubr.msk.bf16.mxu1 %vm4595_vm0, %v4594_v0 }
 0xb85   : > { %v1682_v39 = vpop.f32.mrb[40].mxu0 }
 0xb86   : > { %v3934_v40 = vpop.f32.mrb[41].mxu0  ;;  %v1683_v46 = vadd.f32 %v3625_v45, %v1682_v39  ;;  %v3649_v39 = vld [vmem:[%s5553_s16 + $0xc] ss:$0 sm:$0xff] }
 0xb87   : > { %v1685_v47 = vpop.f32.mrb[42].mxu0 }
 0xb88   : > { %v1686_v48 = vadd.f32 %v3625_v45, %v1685_v47  ;;  %v1916_v47 = vld [vmem:[#allocation5 + $0x50] sm:$0xf] }
 0xb8a   : > { %v1751_v49 = vpack.c.bf16 %v1686_v48, %v1683_v46  ;;  %v542_v48 = vld [vmem:[%s536_s14] sm:$0x1]  ;;  %s3573_s14 = sshll.u32 %s518_s5, 3 }
 0xb8b   : > { %s520_s12 = scalar_lea.vmem [#allocation11], %s3573_s14  ;;  %s4596_s14 = smov [#allocation11]  }
 0xb8c   : > { %3943 = vmatpush3.bf16.msra.mxu0 %v1751_v49  ;;  %v3579_v49 = vadd.f32 -1.0, %v542_v48  ;;  %s3397_s1 = sshll.u32 %s520_s12, 4  ;;  %s4457_s13 = sshll.u32 %s4596_s14, 4  ;;  %s5428_s1 = int_to_ptr.vmem [resolvable:$true] %s3397_s1  ;;  %s4458_s13 = int_to_ptr.vmem [resolvable:$false] %s4457_s13 }
 0xb8d   : > { %3954 = vmatprep.subr.bf16.mxu0 %v4594_v0  ;;  %s4453_s30 = scalar_lea.vmem %s5428_s1, 128  ;;  %s4459_s2 = scalar_lea.vmem %s4458_s13, 256 }
 0xb8e   : > { %v553_v50 = vmul.f32 10000.0, %v3579_v49  ;;  %p4454_p6 = scmp.ne.s32.totalorder %s5428_s1, %s4453_s30  ;;  %p4460_p8 = scmp.lt.s32.totalorder %s5428_s1, %s4458_s13 }
 0xb8f   : > { %p4461_p0 = scmp.lt.s32.totalorder %s4459_s2, %s4453_s30 }
 0xb90   : > { %p4455_p11 = pnand %p4454_p6, %p5560_p3 }
 0xb91   : > { %p4462_p7 = por %p4461_p0, %p4460_p8 }
 0xb92   : > { %p4456_p12 = pneg %p4455_p11 }
 0xb94   : > { %p4463_p13 = pnand %p4462_p7, %p4456_p12 }
 0xc4b   : > { %v1533_v11 = vpop.f32.mrb[32].mxu1 }
 0xc4c   : > { %v5138_v12 = vadd.f32 %v1533_v11, %v5093_v18  ;;  %v3916_v13 = vpop.f32.mrb[33].mxu1  ;;  %v1584_v18 = vadd.f32 %v3621_v24, %v1583_v9  ;;  %v3631_v24 = vld [vmem:[#allocation7 + $0x1] ss:$0 sm:$0xff] }
 0xc4d   : > { %v1536_v14 = vpop.f32.mrb[34].mxu1 }
 0xc4e   : > { %v3917_v15 = vpop.f32.mrb[35].mxu1  ;;  %v1689_v27 = vpack.c.bf16 %v1584_v18, %v1584_v18  ;;  %v3632_v18 = vld [vmem:[#allocation7 + $0x2] ss:$0 sm:$0xff] }
 0xc4f   : > { %v1900_v15 = vld [vmem:[#allocation5 + $0x40] sm:$0xf] }
 0xc53   : > { %v1632_v17 = vpop.f32.mrb[36].mxu1 }
 0xc54   : > { %v3928_v19 = vpop.f32.mrb[37].mxu1  ;;  %v1633_v21 = vadd.f32 %v3623_v16, %v1632_v17 }
 0xc55   : > { %v1635_v20 = vpop.f32.mrb[38].mxu1 }
 0xc56   : > { %v1636_v22 = vadd.f32 %v3623_v16, %v1635_v20  ;;  %v3929_v23 = vpop.f32.mrb[39].mxu1  ;;  %v541_v16 = vld [vmem:[%s5555_s6] sm:$0xff]  ;;  %s5557_s6 = sld [smem:[#allocation29_spill]] }
 0xc57   : > { %v5183_v17 = vpack.c.bf16 %v541_v16, %v541_v16 }
 0xc58   : > { %v1690_v25 = vpack.c.bf16 %v1636_v22, %v1633_v21 }
 0xc5a   : > { %v1695_v26 = vsel %vm781_vm2, %v1690_v25, 0 }
 0xc5b   : > { %3937 = vmatpush3.bf16.xpose.msra.mxu1 %v1695_v26 }
 0xc5c   : > { %3948 = vmatprep.subr.bf16.mxu1 %v4594_v0 }
 0xc62   : > { %3939 = vmatmul.mubr.msk.bf16.vlgmr.msra.gmra.mrb[40].mxu1 %vm781_vm2, %v1689_v27 }
 0xc63   : > { %3950 = vmatprep.mubr.msk.bf16.mxu1 %vm4595_vm0, %v4594_v0  ;;  %3949 = vmatpush3.bf16.msra.mxu1 %v1800_v51  ;;  %v2148_v51 = vsub.s32 0, %v5001_v29  ;;  %v3653_v29 = vld [vmem:[%s5553_s16 + $0x14] ss:$0 sm:$0xff] }
 0xc64   : > { %3960 = vmatprep.subr.bf16.mxu1 %v4594_v0 }
 0xd35   : > { %v1731_v31 = vpop.f32.mrb[40].mxu1 }
 0xd36   : > { %v1737_v32 = vmul.f32 0.35355338, %v1731_v31  ;;  %v3940_v33 = vpop.f32.mrb[41].mxu1 }
 0xd37   : > { %v1734_v35 = vpop.f32.mrb[42].mxu1 }
 0xd38   : > { %v3941_v36 = vpop.f32.mrb[43].mxu1  ;;  %v1738_v37 = vadd.f32 %v1737_v32, %v5005_v34  ;;  %v3935_v34 = vpop.f32.mrb[43].mxu0 }
 0xd39   : > { %v2054_v34 = vsel %vm628_vm1, %v1916_v47, 0 }
 0xd3a   : > { %v1739_v38 = vsel %vm830_vm4, %v1738_v37, -inf }
 0xd3b   : > { %1740 = vmax.xlane.f32.xlu0 %v1739_v38 }
 0xdc8   : > { %v1741_v41 = vpop.xlane.xlu0 %1740 }
 0xdc9   : > { %v1742_v42 = vsub.f32 %v1738_v37, %v1741_v41  ;;  %v1886_v41 = vld [vmem:[#allocation5 + $0x34] sm:$0xf] }
 0xdca   : > { %v2219_v46 = vsel %vm628_vm1, %v1886_v41, 0 }
 0xdcb   : > { %v1743_v43 = vmul.f32 1.442695, %v1742_v42 }
 0xdcd   : > { %4285 = vpow2.f32 %v1743_v43 }
 0xdd7   : > { %v4286_v8 = vpop.eup %4285 }
 0xdd8   : > { %v1745_v44 = vsel %vm830_vm4, %v4286_v8, 0.0 }
 0xdd9   : > { %1746 = vadd.xlane.f32.xlu1 %v1745_v44 }
 0xe66   : > { %v1747_v52 = vpop.xlane.xlu1 %1746 }
 0xe67   : > { %4287 = vrcp.f32 %v1747_v52  ;;  %v5229_v52 = vrot.slane %v553_v50, %v2148_v51 }
 0xe71   : > { %v4288_v53 = vpop.eup %4287 }
 0xe72   : > { %v1749_v54 = vmul.f32 %v4288_v53, %v4286_v8 }
 0xe74   : > { %v1750_v55 = vpack.c.bf16 %v1749_v54, %v1749_v54 }
 0xe76   : > { %3945 = vmatmul.mubr.msk.bf16.vlgmr.msra.gmra.mrb[44].mxu0 %vm830_vm4, %v1750_v55 }
 0xe77   : > { %3956 = vmatprep.mubr.msk.bf16.mxu0 %vm4595_vm0, %v4594_v0 }
 0xf49   : > { %v1789_v56 = vpop.f32.mrb[44].mxu0 }
 0xf4a   : > { %v1795_v57 = vpack.c.bf16 %v1789_v56, %v1789_v56  ;;  %v3946_v58 = vpop.f32.mrb[45].mxu0 }
 0xf4b   : > { %v1792_v59 = vpop.f32.mrb[46].mxu0 }
 0xf4c   : > { %v3947_v60 = vpop.f32.mrb[47].mxu0  ;;  %3951 = vmatmul.mubr.msk.bf16.vlgmr.msra.gmra.mrb[44].mxu1 %vm781_vm2, %v1795_v57 }
 0xf4d   : > { %3962 = vmatprep.mubr.msk.bf16.mxu1 %vm4595_vm0, %v4594_v0 }
0x101f   : > { %v1836_v62 = vpop.f32.mrb[44].mxu1 }
0x1020   : > { %v1842_v63 = vadd.f32 %v1836_v62, %v5138_v12  ;;  %v3952_v1 = vpop.f32.mrb[45].mxu1  ;;  %v2005_v12 = vsel %vm628_vm1, %v1900_v15, 0 }
0x1021   : > { %v1839_v2 = vpop.f32.mrb[46].mxu1  ;;  %3961 = vmatpush3.bf16.xpose.msra.mxu1 %v2005_v12 }
0x1022   : > { %v1849_v3 = vadd.f32 %v3630_v61, %v1842_v63  ;;  %v3953_v4 = vpop.f32.mrb[47].mxu1  ;;  %3972 = vmatprep.subr.bf16.mxu1 %v4594_v0 }
0x1024   : > { %v1850_v9 = vadd.f32 %v1849_v3, %v4965_v7  ;;  %v1884_v7 = vld [vmem:[#allocation5 + $0x30] sm:$0xf] }
0x1025   : > { %v1952_v19 = vsel %vm628_vm1, %v1884_v7, 0  ;;  %v1902_v7 = vld [vmem:[#allocation5 + $0x44] sm:$0xf] }
0x1026   : > { %v1855_v5 = vsel %vm628_vm1, %v1850_v9, 0.0  ;;  %3955 = vmatpush3.bf16.xpose.msra.mxu0 %v1952_v19 }
0x1027   : > { %1856 = vadd.xlane.f32.xlu0 %v1855_v5  ;;  %3966 = vmatprep.subr.bf16.mxu0 %v4594_v0 }
0x1028   : > { %3963 = vmatmul.mubr.msk.bf16.vlgmr.msra.gmra.mrb[48].mxu1 %vm628_vm1, %v5183_v17 }
0x1029   : > { %3974 = vmatprep.mubr.msk.bf16.mxu1 %vm4595_vm0, %v4594_v0 }
0x10b4   : > { %v1857_v6 = vpop.xlane.xlu0 %1856 }
0x10b5   : > { %v1859_v10 = vmul.f32 0.03125, %v1857_v6 }
0x10b7   : > { %v1860_v11 = vsub.f32 %v1850_v9, %v1859_v10 }
0x10b9   : > { %v1861_v13 = vmul.f32 %v1860_v11, %v1860_v11 }
0x10bb   : > { %v1862_v14 = vsel %vm628_vm1, %v1861_v13, 0.0 }
0x10bc   : > { %1863 = vadd.xlane.f32.xlu1 %v1862_v14 }
0x10fb   : > { %v2041_v31 = vpop.f32.mrb[48].mxu1 }
0x10fc   : > { %v2042_v32 = vadd.f32 %v3651_v30, %v2041_v31  ;;  %v3964_v33 = vpop.f32.mrb[49].mxu1 }
0x10fd   : > { %v2044_v35 = vpop.f32.mrb[50].mxu1 }
0x10fe   : > { %v2097_v36 = vpack.c.bf16 %v2042_v32, %v2042_v32  ;;  %v3965_v37 = vpop.f32.mrb[51].mxu1 }
0x1100   : > { %v2102_v38 = vsel %vm781_vm2, %v2097_v36, 0  ;;  %v3657_v36 = vld [vmem:[%s5553_s16 + $0xd] ss:$0 sm:$0xff] }
0x1101   : > { %3973 = vmatpush3.bf16.xpose.msra.mxu1 %v2102_v38 }
0x1102   : > { %3984 = vmatprep.subr.bf16.mxu1 %v4594_v0 }
0x1149   : > { %v1864_v20 = vpop.xlane.xlu1 %1863 }
0x114a   : > { %v1865_v21 = vmul.f32 0.03125, %v1864_v20 }
0x114c   : > { %v1866_v22 = vadd.f32 1e-12, %v1865_v21  ;;  %v2268_v21 = vsel %vm628_vm1, %v1902_v7, 0 }
0x114e   : > { %4289 = vrsqrt.f32 %v1866_v22 }
0x1158   : > { %v4290_v23 = vpop.eup %4289 }
0x1159   : > { %v1868_v25 = vmul.f32 %v4290_v23, %v1860_v11 }
0x115b   : > { %v1875_v26 = vmul.f32 %v3631_v24, %v1868_v25 }
0x115d   : > { %v5191_v27 = vadd.f32 %v3632_v18, %v1875_v26  ;;  %v3659_v18 = vld [vmem:[%s5553_s16 + $0x11] ss:$0 sm:$0xff] }
0x115f   : > { %v5195_v28 = vpack.c.bf16 %v5191_v27, %v5191_v27 }
0x1161   : > { %3957 = vmatmul.mubr.msk.bf16.vlgmr.msra.gmra.mrb[48].mxu0 %vm628_vm1, %v5195_v28 }
0x1162   : > { %3968 = vmatprep.mubr.msk.bf16.mxu0 %vm4595_vm0, %v4594_v0  ;;  %3967 = vmatpush3.bf16.xpose.msra.mxu0 %v2054_v34  ;;  %v3661_v34 = vld [vmem:[%s5553_s16 + $0x15] ss:$0 sm:$0xff] }
0x1163   : > { %3978 = vmatprep.subr.bf16.mxu0 %v4594_v0 }
0x1169   : > { %3969 = vmatmul.mubr.msk.bf16.vlgmr.msra.gmra.mrb[52].mxu0 %vm628_vm1, %v5183_v17 }
0x116a   : > { %3980 = vmatprep.mubr.msk.bf16.mxu0 %vm4595_vm0, %v4594_v0 }
0x1234   : > { %v1988_v40 = vpop.f32.mrb[48].mxu0 }
0x1235   : > { %v1989_v42 = vadd.f32 %v3649_v39, %v1988_v40  ;;  %v3958_v43 = vpop.f32.mrb[49].mxu0  ;;  %v1918_v40 = vld [vmem:[#allocation5 + $0x54] sm:$0xf] }
0x1236   : > { %v1991_v8 = vpop.f32.mrb[50].mxu0  ;;  %v2317_v41 = vsel %vm628_vm1, %v1918_v40, 0 }
0x1237   : > { %v2096_v44 = vpack.c.bf16 %v1989_v42, %v1989_v42  ;;  %v3959_v45 = vpop.f32.mrb[51].mxu0 }
0x1239   : > { %3975 = vmatmul.mubr.msk.bf16.vlgmr.msra.gmra.mrb[52].mxu1 %vm781_vm2, %v2096_v44 }
0x123a   : > { %3985 = vmatpush3.bf16.xpose.msra.mxu1 %v2219_v46  ;;  %3986 = vmatprep.mubr.msk.bf16.mxu1 %vm4595_vm0, %v4594_v0 }
0x123b   : > { %3996 = vmatprep.subr.bf16.mxu1 %v4594_v0 }
0x123c   : > { %v2090_v1 = vpop.f32.mrb[52].mxu0 }
0x123d   : > { %v2091_v2 = vadd.f32 %v3653_v29, %v2090_v1  ;;  %v3970_v3 = vpop.f32.mrb[53].mxu0  ;;  %v3645_v1 = vld [vmem:[%s5554_s29 + $0x10] sm:$0xf] }
0x123e   : > { %v2093_v4 = vpop.f32.mrb[54].mxu0 }
0x123f   : > { %v2164_v9 = vpack.c.bf16 %v2091_v2, %v2091_v2  ;;  %v3971_v5 = vpop.f32.mrb[55].mxu0  ;;  %v2519_v4 = vsel %vm1147_vm5, %v3645_v1, 0 }
0x1241   : > { %3987 = vmatmul.mubr.msk.bf16.vlgmr.msra.gmra.mrb[56].mxu1 %vm628_vm1, %v5195_v28  ;;  %v2169_v6 = vsel %vm1147_vm5, %v2164_v9, 0  ;;  %v1904_v9 = vld [vmem:[#allocation5 + $0x48] sm:$0xf] }
0x1242   : > { %3998 = vmatprep.mubr.msk.bf16.mxu1 %vm4595_vm0, %v4594_v0  ;;  %3979 = vmatpush3.bf16.msra.mxu0 %v2169_v6  ;;  %v2617_v6 = vsel %vm628_vm1, %v1904_v9, 0 }
0x1243   : > { %3990 = vmatprep.subr.bf16.mxu0 %v4594_v0  ;;  %3997 = vmatpush3.bf16.xpose.msra.mxu1 %v2317_v41 }
0x1244   : > { %4008 = vmatprep.subr.bf16.mxu1 %v4594_v0 }
0x124a   : > { %3999 = vmatmul.mubr.msk.bf16.vlgmr.msra.gmra.mrb[60].mxu1 %vm628_vm1, %v5183_v17 }
0x124b   : > { %4010 = vmatprep.mubr.msk.bf16.mxu1 %vm4595_vm0, %v4594_v0 }
0x130c   : > { %v2138_v53 = vpop.f32.mrb[52].mxu1 }
0x130d   : > { %v2144_v54 = vmul.f32 0.35355338, %v2138_v53  ;;  %v3976_v55 = vpop.f32.mrb[53].mxu1 }
0x130e   : > { %v2141_v56 = vpop.f32.mrb[54].mxu1 }
0x130f   : > { %v3977_v57 = vpop.f32.mrb[55].mxu1  ;;  %v2151_v58 = vadd.f32 %v5229_v52, %v2144_v54 }
0x1311   : > { %v2152_v59 = vsel %vm781_vm2, %v2151_v58, -inf }
0x1312   : > { %2153 = vmax.xlane.f32.xlu0 %v2152_v59 }
0x1314   : > { %v2255_v60 = vpop.f32.mrb[56].mxu1 }
0x1315   : > { %v3988_v61 = vpop.f32.mrb[57].mxu1  ;;  %v2256_v38 = vadd.f32 %v3657_v36, %v2255_v60 }
0x1316   : > { %v2258_v62 = vpop.f32.mrb[58].mxu1  ;;  %v3646_v61 = vld [vmem:[%s5554_s29 + $0x14] sm:$0xf] }
0x1317   : > { %v3989_v63 = vpop.f32.mrb[59].mxu1  ;;  %v2359_v39 = vpack.c.bf16 %v2256_v38, %v2256_v38  ;;  %v2473_v62 = vsel %vm1147_vm5, %v3646_v61, 0  ;;  %v3667_v38 = vld [vmem:[%s5553_s16 + $0xe] ss:$0 sm:$0xff] }
0x131d   : > { %v2353_v48 = vpop.f32.mrb[60].mxu1 }
0x131e   : > { %v2354_v49 = vadd.f32 %v3661_v34, %v2353_v48  ;;  %v4000_v50 = vpop.f32.mrb[61].mxu1 }
0x131f   : > { %v2356_v51 = vpop.f32.mrb[62].mxu1 }
0x1320   : > { %v2421_v53 = vpack.c.bf16 %v2354_v49, %v2354_v49  ;;  %v4001_v54 = vpop.f32.mrb[63].mxu1 }
0x1322   : > { %v2426_v55 = vsel %vm1147_vm5, %v2421_v53, 0 }
0x1323   : > { %4009 = vmatpush3.bf16.msra.mxu1 %v2426_v55 }
0x1324   : > { %4020 = vmatprep.subr.bf16.mxu1 %v4594_v0 }
0x139f   : > { %v2154_v10 = vpop.xlane.xlu0 %2153 }
0x13a0   : > { %v2155_v11 = vsub.f32 %v2151_v58, %v2154_v10  ;;  %v1888_v10 = vld [vmem:[#allocation5 + $0x38] sm:$0xf] }
0x13a2   : > { %v2156_v13 = vmul.f32 1.442695, %v2155_v11 }
0x13a4   : > { %4291 = vpow2.f32 %v2156_v13 }
0x13ae   : > { %v4292_v14 = vpop.eup %4291 }
0x13af   : > { %v2158_v15 = vsel %vm781_vm2, %v4292_v14, 0.0 }
0x13b0   : > { %2159 = vadd.xlane.f32.xlu1 %v2158_v15  ;;  %v2568_v15 = vsel %vm628_vm1, %v1888_v10, 0 }
0x143d   : > { %v2160_v12 = vpop.xlane.xlu1 %2159 }
0x143e   : > { %4293 = vrcp.f32 %v2160_v12 }
0x1448   : > { %v4294_v16 = vpop.eup %4293 }
0x1449   : > { %v2162_v19 = vmul.f32 %v4294_v16, %v4292_v14 }
0x144b   : > { %v2163_v20 = vpack.c.bf16 %v2162_v19, %v2162_v19 }
0x144d   : > { %3981 = vmatmul.mubr.msk.bf16.vlgmr.msra.gmra.mrb[56].mxu0 %vm781_vm2, %v2163_v20 }
0x144e   : > { %3991 = vmatpush3.bf16.xpose.msra.mxu0 %v2268_v21  ;;  %3992 = vmatprep.mubr.msk.bf16.mxu0 %vm4595_vm0, %v4594_v0 }
0x144f   : > { %4002 = vmatprep.subr.bf16.mxu0 %v4594_v0 }
0x1455   : > { %3993 = vmatmul.mubr.msk.bf16.vlgmr.msra.gmra.mrb[60].mxu0 %vm628_vm1, %v5183_v17 }
0x1456   : > { %4004 = vmatprep.mubr.msk.bf16.mxu0 %vm4595_vm0, %v4594_v0 }
0x1520   : > { %v5248_v22 = vpop.f32.mrb[56].mxu0 }
0x1521   : > { %v3982_v23 = vpop.f32.mrb[57].mxu0  ;;  %v2211_v5 = vpack.c.bf16 %v5248_v22, %v5248_v22  ;;  %v3669_v22 = vld [vmem:[%s5553_s16 + $0x12] ss:$0 sm:$0xff] }
0x1522   : > { %v2208_v24 = vpop.f32.mrb[58].mxu0 }
0x1523   : > { %v3983_v25 = vpop.f32.mrb[59].mxu0 }
0x1528   : > { %v2304_v26 = vpop.f32.mrb[60].mxu0 }
0x1529   : > { %v2305_v30 = vadd.f32 %v3659_v18, %v2304_v26  ;;  %v3994_v31 = vpop.f32.mrb[61].mxu0 }
0x152a   : > { %v2307_v32 = vpop.f32.mrb[62].mxu0 }
0x152b   : > { %v2360_v33 = vpack.c.bf16 %v2305_v30, %v2305_v30  ;;  %v3995_v35 = vpop.f32.mrb[63].mxu0 }
0x152d   : > { %v2365_v37 = vsel %vm781_vm2, %v2360_v33, 0 }
0x152e   : > { %4003 = vmatpush3.bf16.xpose.msra.mxu0 %v2365_v37 }
0x152f   : > { %4014 = vmatprep.subr.bf16.mxu0 %v4594_v0 }
0x1535   : > { %4005 = vmatmul.mubr.msk.bf16.vlgmr.msra.gmra.mrb[64].mxu0 %vm781_vm2, %v2359_v39 }
0x1536   : > { %4016 = vmatprep.mubr.msk.bf16.mxu0 %vm4595_vm0, %v4594_v0  ;;  %4015 = vmatpush3.bf16.msra.mxu0 %v2473_v62 }
0x1537   : > { %4026 = vmatprep.subr.bf16.mxu0 %v4594_v0 }
0x1608   : > { %v2401_v42 = vpop.f32.mrb[64].mxu0 }
0x1609   : > { %v2407_v43 = vmul.f32 0.35355338, %v2401_v42  ;;  %v4006_v8 = vpop.f32.mrb[65].mxu0 }
0x160a   : > { %v2404_v44 = vpop.f32.mrb[66].mxu0 }
0x160b   : > { %v4007_v45 = vpop.f32.mrb[67].mxu0  ;;  %v2408_v46 = vadd.f32 %v2407_v43, %v5229_v52  ;;  %v1920_v44 = vld [vmem:[#allocation5 + $0x58] sm:$0xf] }
0x160c   : > { %v2666_v45 = vsel %vm628_vm1, %v1920_v44, 0 }
0x160d   : > { %v2409_v47 = vsel %vm781_vm2, %v2408_v46, -inf }
0x160e   : > { %2410 = vmax.xlane.f32.xlu0 %v2409_v47 }
0x169b   : > { %v2411_v56 = vpop.xlane.xlu0 %2410 }
0x169c   : > { %v2412_v57 = vsub.f32 %v2408_v46, %v2411_v56 }
0x169e   : > { %v2413_v58 = vmul.f32 1.442695, %v2412_v57 }
0x16a0   : > { %4295 = vpow2.f32 %v2413_v58  ;;  %v3671_v58 = vld [vmem:[%s5553_s16 + $0x16] ss:$0 sm:$0xff] }
0x16aa   : > { %v4296_v59 = vpop.eup %4295 }
0x16ab   : > { %v2415_v60 = vsel %vm781_vm2, %v4296_v59, 0.0 }
0x16ac   : > { %2416 = vadd.xlane.f32.xlu1 %v2415_v60 }
0x1739   : > { %v2417_v63 = vpop.xlane.xlu1 %2416 }
0x173a   : > { %4297 = vrcp.f32 %v2417_v63 }
0x1744   : > { %v4298_v29 = vpop.eup %4297 }
0x1745   : > { %v2419_v2 = vmul.f32 %v4298_v29, %v4296_v59 }
0x1747   : > { %v2420_v3 = vpack.c.bf16 %v2419_v2, %v2419_v2  ;;  %v3647_v2 = vld [vmem:[%s5554_s29 + $0x18] sm:$0xf] }
0x1749   : > { %4011 = vmatmul.mubr.msk.bf16.vlgmr.msra.gmra.mrb[64].mxu1 %vm781_vm2, %v2420_v3  ;;  %v2822_v3 = vsel %vm1147_vm5, %v3647_v2, 0 }
0x174a   : > { %4021 = vmatpush3.bf16.msra.mxu1 %v2519_v4  ;;  %4022 = vmatprep.mubr.msk.bf16.mxu1 %vm4595_vm0, %v4594_v0 }
0x174b   : > { %4032 = vmatprep.subr.bf16.mxu1 %v4594_v0 }
0x1751   : > { %4023 = vmatmul.mubr.msk.bf16.vlgmr.msra.gmra.mrb[68].mxu1 %vm781_vm2, %v2211_v5  ;;  %v1890_v5 = vld [vmem:[#allocation5 + $0x3c] sm:$0xf] }
0x1752   : > { %4034 = vmatprep.mubr.msk.bf16.mxu1 %vm4595_vm0, %v4594_v0 }
0x1753   : > { %4033 = vmatpush3.bf16.xpose.msra.mxu1 %v2617_v6 }
0x1754   : > { %4044 = vmatprep.subr.bf16.mxu1 %v4594_v0 }
0x175a   : > { %4035 = vmatmul.mubr.msk.bf16.vlgmr.msra.gmra.mrb[72].mxu1 %vm628_vm1, %v5183_v17 }
0x175b   : > { %4046 = vmatprep.mubr.msk.bf16.mxu1 %vm4595_vm0, %v4594_v0 }
0x181c   : > { %v2462_v11 = vpop.f32.mrb[64].mxu1 }
0x181d   : > { %v2468_v13 = vpack.c.bf16 %v2462_v11, %v2462_v11  ;;  %v4012_v14 = vpop.f32.mrb[65].mxu1  ;;  %v2872_v11 = vsel %vm628_vm1, %v1890_v5, 0 }
0x181e   : > { %v2465_v12 = vpop.f32.mrb[66].mxu1 }
0x181f   : > { %v4013_v16 = vpop.f32.mrb[67].mxu1  ;;  %4017 = vmatmul.mubr.msk.bf16.vlgmr.msra.gmra.mrb[68].mxu0 %vm781_vm2, %v2468_v13  ;;  %v1906_v13 = vld [vmem:[#allocation5 + $0x4c] sm:$0xf] }
0x1820   : > { %4027 = vmatpush3.bf16.xpose.msra.mxu0 %v2568_v15  ;;  %4028 = vmatprep.mubr.msk.bf16.mxu0 %vm4595_vm0, %v4594_v0  ;;  %v2921_v16 = vsel %vm628_vm1, %v1906_v13, 0 }
0x1821   : > { %4038 = vmatprep.subr.bf16.mxu0 %v4594_v0 }
0x1824   : > { %v2555_v7 = vpop.f32.mrb[68].mxu1 }
0x1825   : > { %v4024_v19 = vpop.f32.mrb[69].mxu1 }
0x1826   : > { %v2558_v20 = vpop.f32.mrb[70].mxu1 }
0x1827   : > { %v4025_v21 = vpop.f32.mrb[71].mxu1  ;;  %4029 = vmatmul.mubr.msk.bf16.vlgmr.msra.gmra.mrb[72].mxu0 %vm628_vm1, %v5195_v28 }
0x1828   : > { %4040 = vmatprep.mubr.msk.bf16.mxu0 %vm4595_vm0, %v4594_v0  ;;  %4039 = vmatpush3.bf16.xpose.msra.mxu0 %v2666_v45 }
0x1829   : > { %4050 = vmatprep.subr.bf16.mxu0 %v4594_v0 }
0x182d   : > { %v2653_v23 = vpop.f32.mrb[72].mxu1 }
0x182e   : > { %v2654_v24 = vadd.f32 %v3669_v22, %v2653_v23  ;;  %v4036_v25 = vpop.f32.mrb[73].mxu1 }
0x182f   : > { %v2656_v18 = vpop.f32.mrb[74].mxu1  ;;  %4041 = vmatmul.mubr.msk.bf16.vlgmr.msra.gmra.mrb[76].mxu0 %vm628_vm1, %v5183_v17 }
0x1830   : > { %v2709_v26 = vpack.c.bf16 %v2654_v24, %v2654_v24  ;;  %v4037_v30 = vpop.f32.mrb[75].mxu1  ;;  %4052 = vmatprep.mubr.msk.bf16.mxu0 %vm4595_vm0, %v4594_v0 }
0x1831   : > { %v3678_v30 = vld [vmem:[%s5553_s16 + $0x13] ss:$0 sm:$0xff] }
0x1832   : > { %v2714_v31 = vsel %vm781_vm2, %v2709_v26, 0 }
0x1833   : > { %4045 = vmatpush3.bf16.xpose.msra.mxu1 %v2714_v31 }
0x1834   : > { %4056 = vmatprep.subr.bf16.mxu1 %v4594_v0 }
0x18f2   : > { %v2509_v32 = vpop.f32.mrb[68].mxu0 }
0x18f3   : > { %v5313_v33 = vadd.f32 %v2555_v7, %v2509_v32  ;;  %v4018_v35 = vpop.f32.mrb[69].mxu0 }
0x18f4   : > { %v2512_v36 = vpop.f32.mrb[70].mxu0 }
0x18f5   : > { %v4019_v37 = vpop.f32.mrb[71].mxu0 }
0x18fa   : > { %v2604_v39 = vpop.f32.mrb[72].mxu0 }
0x18fb   : > { %v2605_v40 = vadd.f32 %v3667_v38, %v2604_v39  ;;  %v4030_v41 = vpop.f32.mrb[73].mxu0  ;;  %v3676_v39 = vld [vmem:[%s5553_s16 + $0xf] ss:$0 sm:$0xff] }
0x18fc   : > { %v2607_v42 = vpop.f32.mrb[74].mxu0 }
0x18fd   : > { %v2708_v43 = vpack.c.bf16 %v2605_v40, %v2605_v40  ;;  %v4031_v8 = vpop.f32.mrb[75].mxu0  ;;  %v1922_v42 = vld [vmem:[#allocation5 + $0x5c] sm:$0xf] }
0x18ff   : > { %4047 = vmatmul.mubr.msk.bf16.vlgmr.msra.gmra.mrb[76].mxu1 %vm781_vm2, %v2708_v43  ;;  %v2970_v43 = vsel %vm628_vm1, %v1922_v42, 0  ;;  %v3688_v42 = vld [vmem:[#allocation10] ss:$0 sm:$0xff] }
0x1900   : > { %4058 = vmatprep.mubr.msk.bf16.mxu1 %vm4595_vm0, %v4594_v0  ;;  %4057 = vmatpush3.bf16.msra.mxu1 %v2822_v3 }
0x1901   : > { %4068 = vmatprep.subr.bf16.mxu1 %v4594_v0 }
0x1902   : > { %v2702_v59 = vpop.f32.mrb[76].mxu0 }
0x1903   : > { %v2703_v60 = vadd.f32 %v3671_v58, %v2702_v59  ;;  %v4042_v61 = vpop.f32.mrb[77].mxu0 }
0x1904   : > { %v2705_v62 = vpop.f32.mrb[78].mxu0  ;;  %v3648_v61 = vld [vmem:[%s5554_s29 + $0x1c] sm:$0xf] }
0x1905   : > { %v2770_v63 = vpack.c.bf16 %v2703_v60, %v2703_v60  ;;  %v4043_v29 = vpop.f32.mrb[79].mxu0  ;;  %v3126_v62 = vsel %vm1147_vm5, %v3648_v61, 0 }
0x1907   : > { %v2775_v1 = vsel %vm1147_vm5, %v2770_v63, 0 }
0x1908   : > { %4051 = vmatpush3.bf16.msra.mxu0 %v2775_v1 }
0x1909   : > { %4062 = vmatprep.subr.bf16.mxu0 %v4594_v0 }
0x19d2   : > { %v2750_v46 = vpop.f32.mrb[76].mxu1 }
0x19d3   : > { %v2756_v47 = vmul.f32 0.35355338, %v2750_v46  ;;  %v4048_v34 = vpop.f32.mrb[77].mxu1 }
0x19d4   : > { %v2753_v48 = vpop.f32.mrb[78].mxu1 }
0x19d5   : > { %v4049_v49 = vpop.f32.mrb[79].mxu1  ;;  %v2757_v50 = vadd.f32 %v2756_v47, %v5229_v52 }
0x19d7   : > { %v2758_v51 = vsel %vm781_vm2, %v2757_v50, -inf }
0x19d8   : > { %2759 = vmax.xlane.f32.xlu0 %v2758_v51 }
0x1a65   : > { %v2760_v53 = vpop.xlane.xlu0 %2759 }
0x1a66   : > { %v2761_v54 = vsub.f32 %v2757_v50, %v2760_v53 }
0x1a68   : > { %v2762_v55 = vmul.f32 1.442695, %v2761_v54 }
0x1a6a   : > { %4299 = vpow2.f32 %v2762_v55 }
0x1a74   : > { %v4300_v56 = vpop.eup %4299 }
0x1a75   : > { %v2764_v57 = vsel %vm781_vm2, %v4300_v56, 0.0 }
0x1a76   : > { %2765 = vadd.xlane.f32.xlu1 %v2764_v57  ;;  %v3680_v57 = vld [vmem:[%s5553_s16 + $0x17] ss:$0 sm:$0xff] }
0x1b03   : > { %v2766_v4 = vpop.xlane.xlu1 %2765 }
0x1b04   : > { %4301 = vrcp.f32 %v2766_v4 }
0x1b0e   : > { %v4302_v9 = vpop.eup %4301 }
0x1b0f   : > { %v2768_v6 = vmul.f32 %v4302_v9, %v4300_v56 }
0x1b11   : > { %v2769_v10 = vpack.c.bf16 %v2768_v6, %v2768_v6 }
0x1b13   : > { %4053 = vmatmul.mubr.msk.bf16.vlgmr.msra.gmra.mrb[80].mxu0 %vm781_vm2, %v2769_v10  ;;  %v3685_v10 = vld [vmem:[#allocation7 + $0x3] ss:$0 sm:$0xff] }
0x1b14   : > { %4063 = vmatpush3.bf16.xpose.msra.mxu0 %v2872_v11  ;;  %4064 = vmatprep.mubr.msk.bf16.mxu0 %vm4595_vm0, %v4594_v0 }
0x1b15   : > { %4074 = vmatprep.subr.bf16.mxu0 %v4594_v0 }
0x1b1b   : > { %4065 = vmatmul.mubr.msk.bf16.vlgmr.msra.gmra.mrb[84].mxu0 %vm628_vm1, %v5195_v28 }
0x1b1c   : > { %4076 = vmatprep.mubr.msk.bf16.mxu0 %vm4595_vm0, %v4594_v0  ;;  %4075 = vmatpush3.bf16.xpose.msra.mxu0 %v2970_v43 }
0x1b1d   : > { %4086 = vmatprep.subr.bf16.mxu0 %v4594_v0 }
0x1b23   : > { %4077 = vmatmul.mubr.msk.bf16.vlgmr.msra.gmra.mrb[88].mxu0 %vm628_vm1, %v5183_v17 }
0x1b24   : > { %4088 = vmatprep.mubr.msk.bf16.mxu0 %vm4595_vm0, %v4594_v0 }
0x1be6   : > { %v2811_v14 = vpop.f32.mrb[80].mxu0 }
0x1be7   : > { %v2817_v15 = vpack.c.bf16 %v2811_v14, %v2811_v14  ;;  %v4054_v12 = vpop.f32.mrb[81].mxu0 }
0x1be8   : > { %v2814_v7 = vpop.f32.mrb[82].mxu0 }
0x1be9   : > { %v4055_v19 = vpop.f32.mrb[83].mxu0  ;;  %4059 = vmatmul.mubr.msk.bf16.vlgmr.msra.gmra.mrb[80].mxu1 %vm781_vm2, %v2817_v15 }
0x1bea   : > { %4069 = vmatpush3.bf16.xpose.msra.mxu1 %v2921_v16  ;;  %4070 = vmatprep.mubr.msk.bf16.mxu1 %vm4595_vm0, %v4594_v0 }
0x1beb   : > { %4080 = vmatprep.subr.bf16.mxu1 %v4594_v0 }
0x1bee   : > { %v2908_v28 = vpop.f32.mrb[84].mxu0 }
0x1bef   : > { %v4066_v20 = vpop.f32.mrb[85].mxu0  ;;  %v2909_v40 = vadd.f32 %v3676_v39, %v2908_v28 }
0x1bf0   : > { %v2911_v21 = vpop.f32.mrb[86].mxu0 }
0x1bf1   : > { %v4067_v22 = vpop.f32.mrb[87].mxu0  ;;  %4071 = vmatmul.mubr.msk.bf16.vlgmr.msra.gmra.mrb[84].mxu1 %vm628_vm1, %v5183_v17  ;;  %v3012_v41 = vpack.c.bf16 %v2909_v40, %v2909_v40  ;;  %v4271_v40 = vld [vmem:[%s5557_s6 + $0x10] sm:$0xff]  }
0x1bf2   : > { %4082 = vmatprep.mubr.msk.bf16.mxu1 %vm4595_vm0, %v4594_v0 }
0x1bf6   : > { %v3006_v54 = vpop.f32.mrb[88].mxu0 }
0x1bf7   : > { %v4078_v55 = vpop.f32.mrb[89].mxu0 }
0x1bf8   : > { %v3009_v56 = vpop.f32.mrb[90].mxu0 }
0x1bf9   : > { %v4079_v58 = vpop.f32.mrb[91].mxu0 }
0x1cbc   : > { %v2858_v23 = vpop.f32.mrb[80].mxu1 }
0x1cbd   : > { %v5359_v24 = vadd.f32 %v2858_v23, %v5313_v33  ;;  %v4060_v25 = vpop.f32.mrb[81].mxu1 }
0x1cbe   : > { %v2861_v18 = vpop.f32.mrb[82].mxu1  ;;  %v4267_v25 = vld [vmem:[#allocation8] sm:$0xff]  }
0x1cbf   : > { %v4061_v26 = vpop.f32.mrb[83].mxu1  ;;  %v4270_v18 = vld [vmem:[%s5557_s6 + $0x8] sm:$0xff]  }
0x1cc4   : > { %v2957_v31 = vpop.f32.mrb[84].mxu1 }
0x1cc5   : > { %v2958_v32 = vadd.f32 %v3678_v30, %v2957_v31  ;;  %v4072_v35 = vpop.f32.mrb[85].mxu1 }
0x1cc6   : > { %v2960_v36 = vpop.f32.mrb[86].mxu1  ;;  %v3686_v35 = vld [vmem:[#allocation7 + $0x4] ss:$0 sm:$0xff] }
0x1cc7   : > { %v3013_v37 = vpack.c.bf16 %v2958_v32, %v2958_v32  ;;  %v4073_v38 = vpop.f32.mrb[87].mxu1 }
0x1cc9   : > { %v3018_v33 = vsel %vm781_vm2, %v3013_v37, 0  ;;  %v3687_v37 = vld [vmem:[#allocation7 + $0x5] ss:$0 sm:$0xff] }
0x1cca   : > { %4081 = vmatpush3.bf16.xpose.msra.mxu1 %v3018_v33 }
0x1ccb   : > { %4092 = vmatprep.subr.bf16.mxu1 %v4594_v0 }
0x1cd1   : > { %4083 = vmatmul.mubr.msk.bf16.vlgmr.msra.gmra.mrb[88].mxu1 %vm781_vm2, %v3012_v41  ;;  %v4272_v41 = vld [vmem:[%s5557_s6 + $0x18] sm:$0xff]  }
0x1cd2   : > { %4094 = vmatprep.mubr.msk.bf16.mxu1 %vm4595_vm0, %v4594_v0  ;;  %4093 = vmatpush3.bf16.msra.mxu1 %v3126_v62 }
0x1cd3   : > { %4106 = vmatprep.subr.bf16.mxu1 %v4594_v0 }
0x1da4   : > { %v3054_v8 = vpop.f32.mrb[88].mxu1 }
0x1da5   : > { %v3060_v44 = vmul.f32 0.35355338, %v3054_v8  ;;  %v4084_v45 = vpop.f32.mrb[89].mxu1 }
0x1da6   : > { %v3057_v46 = vpop.f32.mrb[90].mxu1 }
0x1da7   : > { %v4085_v47 = vpop.f32.mrb[91].mxu1  ;;  %v3061_v34 = vadd.f32 %v3060_v44, %v5229_v52  ;;  %v3007_v52 = vadd.f32 %v3680_v57, %v3006_v54 }
0x1da9   : > { %v3062_v48 = vsel %vm781_vm2, %v3061_v34, -inf  ;;  %v3074_v59 = vpack.c.bf16 %v3007_v52, %v3007_v52 }
0x1daa   : > { %3063 = vmax.xlane.f32.xlu0 %v3062_v48  ;;  %v3692_v48 = vld [vmem:[#allocation7 + $0x6] ss:$0 sm:$0xff] }
0x1dab   : > { %v3079_v60 = vsel %vm1147_vm5, %v3074_v59, 0 }
0x1dac   : > { %4087 = vmatpush3.bf16.msra.mxu0 %v3079_v60 }
0x1dad   : > { %4098 = vmatprep.subr.bf16.mxu0 %v4594_v0 }
0x1e37   : > { %v3064_v49 = vpop.xlane.xlu0 %3063 }
0x1e38   : > { %v3065_v50 = vsub.f32 %v3061_v34, %v3064_v49 }
0x1e3a   : > { %v3066_v51 = vmul.f32 1.442695, %v3065_v50 }
0x1e3c   : > { %4303 = vpow2.f32 %v3066_v51 }
0x1e46   : > { %v4304_v53 = vpop.eup %4303 }
0x1e47   : > { %v3068_v17 = vsel %vm781_vm2, %v4304_v53, 0.0 }
0x1e48   : > { %3069 = vadd.xlane.f32.xlu1 %v3068_v17 }
0x1ed5   : > { %v3070_v63 = vpop.xlane.xlu1 %3069 }
0x1ed6   : > { %4305 = vrcp.f32 %v3070_v63  ;;  %v3698_v63 = vld [vmem:[#allocation7 + $0x7] ss:$0 sm:$0xff] }
0x1ee0   : > { %v4306_v29 = vpop.eup %4305 }
0x1ee1   : > { %v3072_v1 = vmul.f32 %v4306_v29, %v4304_v53 }
0x1ee3   : > { %v3073_v2 = vpack.c.bf16 %v3072_v1, %v3072_v1  ;;  %v3699_v1 = vld [vmem:[#allocation7 + $0x8] ss:$0 sm:$0xff] }
0x1ee5   : > { %4089 = vmatmul.mubr.msk.bf16.vlgmr.msra.gmra.mrb[92].mxu0 %vm781_vm2, %v3073_v2 }
0x1ee6   : > { %4102 = vmatprep.mubr.msk.bf16.mxu0 %vm4595_vm0, %v4594_v0  ;;  %4099 = vmatpush3.bf16.msra.mxu0 %v4267_v25 }
0x1ee7   : > { %4100 = vmatprep.subr.bf16.mxu0 %v4594_v0 }
0x1fb8   : > { %v3115_v3 = vpop.f32.mrb[92].mxu0 }
0x1fb9   : > { %v3121_v4 = vpack.c.bf16 %v3115_v3, %v3115_v3  ;;  %v4090_v9 = vpop.f32.mrb[93].mxu0 }
0x1fba   : > { %v3118_v5 = vpop.f32.mrb[94].mxu0 }
0x1fbb   : > { %v4091_v6 = vpop.f32.mrb[95].mxu0  ;;  %4095 = vmatmul.mubr.msk.bf16.vlgmr.msra.gmra.mrb[92].mxu1 %vm781_vm2, %v3121_v4 }
0x1fbc   : > { %4114 = vmatprep.mubr.msk.bf16.mxu1 %vm4595_vm0, %v4594_v0 }
0x208e   : > { %v3162_v11 = vpop.f32.mrb[92].mxu1 }
0x208f   : > { %v3168_v13 = vadd.f32 %v3162_v11, %v5359_v24  ;;  %v4096_v14 = vpop.f32.mrb[93].mxu1  ;;  %v4268_v24 = vld [vmem:[#allocation8 + $0x8] sm:$0xff]  }
0x2090   : > { %v3165_v15 = vpop.f32.mrb[94].mxu1  ;;  %4101 = vmatpush3.bf16.msra.mxu0 %v4268_v24 }
0x2091   : > { %v3175_v12 = vadd.f32 %v3685_v10, %v3168_v13  ;;  %v4097_v16 = vpop.f32.mrb[95].mxu1 }
0x2093   : > { %v3176_v7 = vadd.f32 %v3175_v12, %v5191_v27  ;;  %v4269_v27 = vld [vmem:[%s5557_s6] sm:$0xff]  }
0x2094   : > { %4107 = vmatpush3.bf16.msra.mxu1 %v4269_v27 }
0x2095   : > { %v3181_v19 = vsel %vm628_vm1, %v3176_v7, 0.0  ;;  %4108 = vmatprep.subr.bf16.mxu1 %v4594_v0 }
0x2096   : > { %3182 = vadd.xlane.f32.xlu0 %v3181_v19 }
0x2098   : > { %4109 = vmatpush3.bf16.msra.mxu1 %v4270_v18 }
0x2099   : > { %4110 = vmatprep.subr.bf16.mxu1 %v4594_v0 }
0x209c   : > { %4111 = vmatpush3.bf16.msra.mxu1 %v4271_v40 }
0x209d   : > { %4112 = vmatprep.subr.bf16.mxu1 %v4594_v0 }
0x20a0   : > { %4113 = vmatpush3.bf16.msra.mxu1 %v4272_v41 }
0x2123   : > { %v3183_v28 = vpop.xlane.xlu0 %3182 }
0x2124   : > { %v3184_v20 = vmul.f32 0.03125, %v3183_v28 }
0x2126   : > { %v3185_v21 = vsub.f32 %v3176_v7, %v3184_v20 }
0x2128   : > { %v3186_v22 = vmul.f32 %v3185_v21, %v3185_v21 }
0x212a   : > { %v3187_v23 = vsel %vm628_vm1, %v3186_v22, 0.0 }
0x212b   : > { %3188 = vadd.xlane.f32.xlu1 %v3187_v23 }
0x21b8   : > { %v3189_v26 = vpop.xlane.xlu1 %3188 }
0x21b9   : > { %v3190_v30 = vmul.f32 0.03125, %v3189_v26 }
0x21bb   : > { %v3191_v31 = vadd.f32 1e-12, %v3190_v30 }
0x21bd   : > { %4307 = vrsqrt.f32 %v3191_v31 }
0x21c7   : > { %v4308_v32 = vpop.eup %4307 }
0x21c8   : > { %v3193_v36 = vmul.f32 %v4308_v32, %v3185_v21 }
0x21ca   : > { %v3200_v38 = vmul.f32 %v3686_v35, %v3193_v36 }
0x21cc   : > { %v3207_v39 = vadd.f32 %v3687_v37, %v3200_v38 }
0x21ce   : > { %v3208_v33 = vpack.c.bf16 %v3207_v39, %v3207_v39 }
0x21d0   : > { %4103 = vmatmul.mubr.msk.bf16.vlgmr.msra.gmra.mrb[96].mxu0 %vm628_vm1, %v3208_v33 }
0x22a3   : > { %v3264_v43 = vpop.f32.mrb[96].mxu0 }
0x22a4   : > { %v3265_v8 = vadd.f32 %v3688_v42, %v3264_v43  ;;  %v4104_v44 = vpop.f32.mrb[97].mxu0 }
0x22a5   : > { %v3267_v45 = vpop.f32.mrb[98].mxu0 }
0x22a6   : > { %v3270_v46 = vmax.f32 %v3265_v8, 0.0  ;;  %v4105_v47 = vpop.f32.mrb[99].mxu0 }
0x22a8   : > { %v3271_v34 = vpack.c.bf16 %v3270_v46, %v3270_v46 }
0x22aa   : > { %4115 = vmatmul.mubr.msk.bf16.vlgmr.msra.gmra.mrb[96].mxu1 %vm3304_vm6, %v3271_v34 }
0x237d   : > { %v3342_v49 = vpop.f32.mrb[96].mxu1 }
0x237e   : > { %v3343_v50 = vadd.f32 %v3692_v48, %v3342_v49  ;;  %v4116_v51 = vpop.f32.mrb[97].mxu1 }
0x237f   : > { %v3345_v0 = vpop.f32.mrb[98].mxu1 }
0x2380   : > { %v4117_v53 = vpop.f32.mrb[99].mxu1  ;;  %v3348_v17 = vadd.f32 %v3343_v50, %v3207_v39 }
0x2382   : > { %v3353_v54 = vsel %vm628_vm1, %v3348_v17, 0.0 }
0x2383   : > { %3354 = vadd.xlane.f32.xlu0 %v3353_v54 }
0x2410   : > { %v3355_v55 = vpop.xlane.xlu0 %3354 }
0x2411   : > { %v3356_v56 = vmul.f32 0.03125, %v3355_v55 }
0x2413   : > { %v3357_v57 = vsub.f32 %v3348_v17, %v3356_v56 }
0x2415   : > { %v3358_v58 = vmul.f32 %v3357_v57, %v3357_v57 }
0x2417   : > { %v3359_v52 = vsel %vm628_vm1, %v3358_v58, 0.0 }
0x2418   : > { %3360 = vadd.xlane.f32.xlu1 %v3359_v52 }
0x24a5   : > { %v3361_v59 = vpop.xlane.xlu1 %3360 }
0x24a6   : > { %v3362_v60 = vmul.f32 0.03125, %v3361_v59 }
0x24a8   : > { %v3363_v61 = vadd.f32 1e-12, %v3362_v60 }
0x24aa   : > { %4309 = vrsqrt.f32 %v3363_v61 }
0x24b4   : > { %v4310_v62 = vpop.eup %4309 }
0x24b5   : > { %v3365_v29 = vmul.f32 %v4310_v62, %v3357_v57 }
0x24b7   : > { %v3372_v2 = vmul.f32 %v3698_v63, %v3365_v29 }
0x24b9   : > { %v3379_v3 = vadd.f32 %v3699_v1, %v3372_v2 }
0x24bb   : > { %3380 = vst.msk [vmem:[%s520_s12] sm:$0xff] %vm628_vm1, %v3379_v3 }
0x24bc   : > { %4466 = shalt.err (!%p4463_p13)
}
0x24bd   : > { %s4467_s5 = scalar_lea.hbm %s5426_s20, 128  ;;  %s4471_s8 = scalar_lea.hbm %s5559_s11, 512 }
0x24be   : > { %p4468_p4 = scmp.ne.s32.totalorder %s5426_s20, %s4467_s5  ;;  %p4472_p1 = scmp.lt.u32.totalorder %s5426_s20, %s5559_s11 }
0x24bf   : > { %p4473_p2 = scmp.lt.u32.totalorder %s4471_s8, %s4467_s5  ;;  %p4475_p6 = scmp.lt.u32.totalorder %s4467_s5, %s5426_s20 }
0x24c0   : > { %p4469_p10 = pnand %p4468_p4, %p5560_p3 }
0x24c1   : > { %p4474_p5 = por %p4473_p2, %p4472_p1 }
0x24c2   : > { %p4470_p9 = pneg %p4469_p10 }
0x24c3   : > { %p4476_p11 = por %p4475_p6, %p4474_p5 }
0x24c5   : > { %p4477_p12 = pnand %p4476_p11, %p4470_p9 }
0x24c7   : > { %4480 = shalt.err (!%p4477_p12)
}
0x24c8   : > { %4136 = dma.vmem_to_hbm [thread:$0]  (%p5560_p3), %s5428_s1, 128, %s5426_s20, %s3382_s4  }
0x24c9 PF: > { %p4168_p8 = scmp.ge.s32.totalorder %s4583_s27, 2  ;;  %s3409_s30 = sand.u32 1, %s4543_s17  }
0x24ca   : > { %p5561_p0 = scmp.ne.s32.totalorder %s5543_s10, 0  ;;  %s3410_s14 = scalar_lea.sflag [#allocation4], %s3409_s30 }
0x24cc   : > { %p4156_p7 = pnand %p4168_p8, %p5561_p0 }
0x24ce   : > { %4538 = dma.done.wait (!%p4156_p7), %s3410_s14, 128  }
0x24cf   : > { %4540 = vsyncadd (!%p4156_p7), %s3410_s14, 4294967168  ;;  %s29_s27 = sadd.s32 1, %s4583_s27   ;;  %s5562_s0 = smov %s5578_s23 }
0x24d0   : > { %p26_p13 = scmp.ge.s32.totalorder %s29_s27, 6   ;;  %s5563_s17 = smov %s4547_s18 }
0x24d1   : > { %s5564_s18 = smov %s4551_s19  ;;  %s5565_s19 = smov %s4878_s3 }
0x24d2   : > { %s5566_s20 = smov %s4559_s21  ;;  %s5567_s21 = smov %s4563_s22 }
0x24d3   : > { %s5568_s22 = smov %s4875_s28  ;;  %s5569_s23 = smov %s4575_s25 }
0x24d4   : > { %s5570_s24 = smov %s4579_s26  ;;  %s5571_s25 = smov %s5574_s15 }
0x24d5   : > { %s5572_s26 = smov %s5562_s0  ;;  %28 = sbr.rel (!%p26_p13) target bundleno = 24 (0x18), region = 195 }
0x24dc   :  { %3415 = vsyncpa [#allocation3], 1 }
0x24dd   :  { %3417 = vsyncpa [#allocation3 + $0x1], 1 }
0x24de   :  { %3418 = vsyncpa [#allocation6], 1 }
0x24df   :  { %3419 = vsyncpa [#allocation9], 1 }
0x24e0   :  { %3420 = vsyncpa [#allocation4], 1 }
0x24e1   :  { %3422 = vsyncpa [#allocation4 + $0x1], 1 }

</bundles_post_ra>
